<compile_context>
chip_gen: v7x
topology: tpu7x:2x2x1
jax: 0.10.0
libtpu: 0.0.40
codegen_flags: <defaults>
</compile_context>

<pallas_src>
import jax
import jax.numpy as jnp
import numpy as np
from jax.experimental import pallas as pl
from jax.experimental.pallas import tpu as pltpu

LN_EPS = 1e-5       # nn.LayerNorm default
L2_EPS = 1e-12      # tiny eps under the L2-norm rsqrt (zero-row safety)
_SQRT1_2 = np.float32(1.0 / np.sqrt(2.0))


def _round_up(x, m):
    return ((x + m - 1) // m) * m


# ------------------------------ kernel math ------------------------------
def _embedding_mapper_and_norm(x, w1, w2, gamma, beta):
    """EmbeddingMapper (eval mode, dropout == identity) + L2 normalization.

    x:     [TB, Din]  f32 tile
    w1:    [Din, D]   bf16 (linear1.weight, pre-transposed; no bias)
    w2:    [D, D]     bf16 (linear2.weight, pre-transposed; no bias)
    gamma: [1, D]     f32 LayerNorm weight
    beta:  [1, D]     f32 LayerNorm bias
    Matmuls run bf16 on the MXU with f32 accumulation; the rest stays f32.
    """
    h1 = jnp.dot(x.astype(jnp.bfloat16), w1, preferred_element_type=jnp.float32)
    # exact (erf) GELU — matches PyTorch F.gelu default
    g = 0.5 * h1 * (1.0 + jax.lax.erf(h1 * _SQRT1_2))
    h2 = jnp.dot(g.astype(jnp.bfloat16), w2, preferred_element_type=jnp.float32)
    # layer_norm(inputs1 + inputs2)
    y = h1 + h2
    mu = jnp.mean(y, axis=-1, keepdims=True)
    var = jnp.mean((y - mu) ** 2, axis=-1, keepdims=True)
    y = (y - mu) * jax.lax.rsqrt(var + LN_EPS)
    y = y * gamma + beta
    # embeddings / ||embeddings||_2   (rsqrt * y instead of sqrt-divide)
    inv_norm = jax.lax.rsqrt(jnp.sum(y * y, axis=-1, keepdims=True) + L2_EPS)
    return y * inv_norm


def _similarity(img_emb, txt_emb):
    # image_embeddings @ text_embeddings.T expressed as a contraction over the
    # LAST dim of BOTH operands (no explicit transpose), bf16 into the MXU.
    return jax.lax.dot_general(
        img_emb.astype(jnp.bfloat16), txt_emb.astype(jnp.bfloat16),
        dimension_numbers=(((1,), (1,)), ((), ())),
        preferred_element_type=jnp.float32)


# ------------------------------ kernel bodies ------------------------------
def fused_kernel(img_ref, txt_ref,
                 wi1_ref, wi2_ref, gi_ref, bi_ref,
                 wt1_ref, wt2_ref, gt_ref, bt_ref,
                 sim_ref, img_emb_ref, txt_emb_ref):
    """Tiny-batch path: both mappers + L2 norm + similarity in ONE launch."""
    ie = _embedding_mapper_and_norm(
        img_ref[...], wi1_ref[...], wi2_ref[...], gi_ref[...], bi_ref[...])
    te = _embedding_mapper_and_norm(
        txt_ref[...], wt1_ref[...], wt2_ref[...], gt_ref[...], bt_ref[...])
    img_emb_ref[...] = ie
    txt_emb_ref[...] = te
    sim_ref[...] = _similarity(ie, te)


def mapper_kernel(img_ref, txt_ref,
                  wi1_ref, wi2_ref, gi_ref, bi_ref,
                  wt1_ref, wt2_ref, gt_ref, bt_ref,
                  img_emb_ref, txt_emb_ref):
    img_emb_ref[...] = _embedding_mapper_and_norm(
        img_ref[...], wi1_ref[...], wi2_ref[...], gi_ref[...], bi_ref[...])
    txt_emb_ref[...] = _embedding_mapper_and_norm(
        txt_ref[...], wt1_ref[...], wt2_ref[...], gt_ref[...], bt_ref[...])


def sim_kernel(img_emb_ref, txt_emb_ref, sim_ref):
    sim_ref[...] = _similarity(img_emb_ref[...], txt_emb_ref[...])


# ------------------------------- wrappers --------------------------------
def _default_batch_tile():
    """256-wide tiles fill the 2x256x256 MXU on v6e/v7x; 128 is the v5e sweet spot."""
    try:
        kind = jax.devices()[0].device_kind.lower()
    except Exception:
        kind = ""
    if ("v5" in kind) or ("v4" in kind) or ("v3" in kind) or ("v2" in kind):
        return 128
    return 256


def prepare_params(params):
    """One-time parameter prep, hoisted out of the forward path:
    zero-pad wi1's K dim (1000 -> 1024) so every MXU K-pass / vld is full,
    and cast the matmul weights to bf16 (MXU-native, halves weight DMA)."""
    kin_img = params["wi1"].shape[0]
    k_img = _round_up(kin_img, 128)
    wi1_p = jnp.pad(params["wi1"], ((0, k_img - kin_img), (0, 0)))
    return {
        "wi1": wi1_p.astype(jnp.bfloat16),
        "wi2": params["wi2"].astype(jnp.bfloat16),
        "gi": params["gi"].astype(jnp.float32),
        "bi": params["bi"].astype(jnp.float32),
        "wt1": params["wt1"].astype(jnp.bfloat16),
        "wt2": params["wt2"].astype(jnp.bfloat16),
        "gt": params["gt"].astype(jnp.float32),
        "bt": params["bt"].astype(jnp.float32),
    }


def clip_like_forward(img_feat, txt_feat, prepped, *, batch_tile=None):
    """Returns (similarity [B,B], image_embeddings [B,D], text_embeddings [B,D])."""
    B = img_feat.shape[0]
    k_img, D = prepped["wi1"].shape          # padded K (1024), output dim (512)
    kin_img = img_feat.shape[1]              # 1000
    kin_txt = txt_feat.shape[1]              # 384  (already a multiple of 128)
    if batch_tile is None:
        batch_tile = _default_batch_tile()

    # Pad only the activations per call (weight pad is in prepare_params).
    img_p = jnp.pad(img_feat, ((0, 0), (0, k_img - kin_img)))
    txt_p = txt_feat

    weights = (prepped["wi1"], prepped["wi2"], prepped["gi"], prepped["bi"],
               prepped["wt1"], prepped["wt2"], prepped["gt"], prepped["bt"])
    w_shapes = [(k_img, D), (D, D), (1, D), (1, D),
                (kin_txt, D), (D, D), (1, D), (1, D)]

    # ---------------- tiny-batch path: one fused launch ----------------
    if B < 16:
        tb = _round_up(B, 8)
        if tb != B:
            img_p = jnp.pad(img_p, ((0, tb - B), (0, 0)))
            txt_p = jnp.pad(txt_p, ((0, tb - B), (0, 0)))
        one = lambda i: (0, 0)
        sim, ie, te = pl.pallas_call(
            fused_kernel,
            out_shape=(jax.ShapeDtypeStruct((tb, tb), jnp.float32),
                       jax.ShapeDtypeStruct((tb, D), jnp.float32),
                       jax.ShapeDtypeStruct((tb, D), jnp.float32)),
            grid=(1,),
            in_specs=[pl.BlockSpec((tb, k_img), one),
                      pl.BlockSpec((tb, kin_txt), one)]
                     + [pl.BlockSpec(s, one) for s in w_shapes],
            out_specs=(pl.BlockSpec((tb, tb), one),
                       pl.BlockSpec((tb, D), one),
                       pl.BlockSpec((tb, D), one)),
            compiler_params=pltpu.CompilerParams(
                dimension_semantics=("arbitrary",),
                vmem_limit_bytes=32 << 20),
        )(img_p, txt_p, *weights)
        return sim[:B, :B], ie[:B], te[:B]

    # ---------------- batched path ----------------
    if B <= batch_tile:
        # use >= 2 tiles so both v7x TensorCores get work on the "parallel" axis
        tb = _round_up((B + 1) // 2, 8)
        b_pad = 2 * tb
    else:
        tb = batch_tile
        b_pad = _round_up(B, tb)
    n_tiles = b_pad // tb
    if b_pad != B:
        img_p = jnp.pad(img_p, ((0, b_pad - B), (0, 0)))
        txt_p = jnp.pad(txt_p, ((0, b_pad - B), (0, 0)))

    row = lambda i: (i, 0)
    # Constant-index weight blocks: single-buffered (don't double-buffer a
    # block that never changes) to reclaim VMEM headroom, esp. on v7x (64 MiB).
    w_spec = lambda s: pl.BlockSpec(s, lambda *_: (0, 0),
                                    pipeline_mode=pl.Buffered(1))

    img_emb_p, txt_emb_p = pl.pallas_call(
        mapper_kernel,
        out_shape=(jax.ShapeDtypeStruct((b_pad, D), jnp.float32),
                   jax.ShapeDtypeStruct((b_pad, D), jnp.float32)),
        grid=(n_tiles,),
        in_specs=[pl.BlockSpec((tb, k_img), row),
                  pl.BlockSpec((tb, kin_txt), row)]
                 + [w_spec(s) for s in w_shapes],
        out_specs=(pl.BlockSpec((tb, D), row),
                   pl.BlockSpec((tb, D), row)),
        compiler_params=pltpu.CompilerParams(
            dimension_semantics=("parallel",),
            vmem_limit_bytes=32 << 20),
    )(img_p, txt_p, *weights)

    # Similarity: keep the whole text-embedding slab VMEM-resident when it fits
    # (kills the B^2*D/tb HBM re-read, lane-dense (tb, b_pad) output stores);
    # otherwise fall back to the classic 2-D tiled matmul.
    resident_bytes = (b_pad * D * 4          # f32 txt slab (single-buffered)
                      + b_pad * D * 2        # in-kernel bf16 cast of the slab
                      + 2 * tb * D * 6       # img tile (double-buffered) + cast
                      + 2 * tb * b_pad * 4)  # output tile (double-buffered)
    if resident_bytes <= (24 << 20):
        sim_p = pl.pallas_call(
            sim_kernel,
            out_shape=jax.ShapeDtypeStruct((b_pad, b_pad), jnp.float32),
            grid=(n_tiles,),
            in_specs=[pl.BlockSpec((tb, D), row),
                      pl.BlockSpec((b_pad, D), lambda i: (0, 0),
                                   pipeline_mode=pl.Buffered(1))],
            out_specs=pl.BlockSpec((tb, b_pad), row),
            compiler_params=pltpu.CompilerParams(
                dimension_semantics=("parallel",),
                vmem_limit_bytes=32 << 20),
        )(img_emb_p, txt_emb_p)
    else:
        sim_p = pl.pallas_call(
            sim_kernel,
            out_shape=jax.ShapeDtypeStruct((b_pad, b_pad), jnp.float32),
            grid=(n_tiles, n_tiles),
            in_specs=[pl.BlockSpec((tb, D), lambda i, j: (i, 0)),
                      pl.BlockSpec((tb, D), lambda i, j: (j, 0))],
            out_specs=pl.BlockSpec((tb, tb), lambda i, j: (i, j)),
            compiler_params=pltpu.CompilerParams(
                dimension_semantics=("parallel", "parallel"),
                vmem_limit_bytes=32 << 20),
        )(img_emb_p, txt_emb_p)

    return sim_p[:B, :B], img_emb_p[:B], txt_emb_p[:B]


# ------------------------ deterministic parameter init -------------------------
def init_params(key, din_img=1000, din_txt=384, dim_out=512):
    ks = jax.random.split(key, 4)

    def linear_w(k, fan_in, fan_out):
        # PyTorch nn.Linear default: U(-1/sqrt(fan_in), 1/sqrt(fan_in)); stored
        # [out,in] in torch, kept pre-transposed [in,out] for row-major matmul.
        bound = 1.0 / np.sqrt(fan_in)
        return jax.random.uniform(k, (fan_in, fan_out), jnp.float32, -bound, bound)

    return {
        # image EmbeddingMapper(1000 -> 512)
        "wi1": linear_w(ks[0], din_img, dim_out),
        "wi2": linear_w(ks[1], dim_out, dim_out),
        "gi": jnp.ones((1, dim_out), jnp.float32),
        "bi": jnp.zeros((1, dim_out), jnp.float32),
        # text EmbeddingMapper(384 -> 512)
        "wt1": linear_w(ks[2], din_txt, dim_out),
        "wt2": linear_w(ks[3], dim_out, dim_out),
        "gt": jnp.ones((1, dim_out), jnp.float32),
        "bt": jnp.zeros((1, dim_out), jnp.float32),
    }


# ------------------------------ plain-JAX reference ----------------------------
def _reference(img_feat, txt_feat, p):
    def mapper(x, w1, w2, g, b):
        h1 = x @ w1
        h2 = jax.nn.gelu(h1, approximate=False) @ w2
        y = h1 + h2
        mu = y.mean(-1, keepdims=True)
        var = ((y - mu) ** 2).mean(-1, keepdims=True)
        y = (y - mu) / jnp.sqrt(var + LN_EPS) * g + b
        return y / jnp.linalg.norm(y, axis=-1, keepdims=True)

    ie = mapper(img_feat, p["wi1"], p["wi2"], p["gi"], p["bi"])
    te = mapper(txt_feat, p["wt1"], p["wt2"], p["gt"], p["bt"])
    return ie @ te.T, ie, te


# ---------------------------------- main ---------------------------------------
if __name__ == "__main__":
    key = jax.random.PRNGKey(0)
    k_img, k_txt, k_par = jax.random.split(key, 3)

    B = 2
    # Stand-ins for the frozen backbone outputs (ResNet50 logits / MiniLM pooled).
    img_feat = jax.random.normal(k_img, (B, 1000), jnp.float32)
    txt_feat = jax.random.normal(k_txt, (B, 384), jnp.float32)
    params = init_params(k_par)
    prepped = prepare_params(params)          # one-time: K pad + bf16 weight cast

    fwd = jax.jit(clip_like_forward)
    sim, img_emb, txt_emb = jax.block_until_ready(fwd(img_feat, txt_feat, prepped))

    # sanity check against the pure-JAX f32 reference (bf16-MXU tolerance)
    sim_r, img_r, txt_r = _reference(img_feat, txt_feat, params)
    np.testing.assert_allclose(np.asarray(img_emb), np.asarray(img_r), rtol=2e-2, atol=2e-2)
    np.testing.assert_allclose(np.asarray(txt_emb), np.asarray(txt_r), rtol=2e-2, atol=2e-2)
    np.testing.assert_allclose(np.asarray(sim), np.asarray(sim_r), rtol=2e-2, atol=2e-2)

    print("KERNEL_OK")
</pallas_src>

<mosaic_0001>
module attributes {stable_mosaic.version = 11 : i64} {
  func.func @fused_kernel(%arg0: i32, %arg1: memref<8x1024xf32, #tpu.memory_space<vmem>>, %arg2: memref<8x384xf32, #tpu.memory_space<vmem>>, %arg3: memref<1024x512xbf16, #tpu.memory_space<vmem>>, %arg4: memref<512x512xbf16, #tpu.memory_space<vmem>>, %arg5: memref<1x512xf32, #tpu.memory_space<vmem>>, %arg6: memref<1x512xf32, #tpu.memory_space<vmem>>, %arg7: memref<384x512xbf16, #tpu.memory_space<vmem>>, %arg8: memref<512x512xbf16, #tpu.memory_space<vmem>>, %arg9: memref<1x512xf32, #tpu.memory_space<vmem>>, %arg10: memref<1x512xf32, #tpu.memory_space<vmem>>, %arg11: memref<8x8xf32, #tpu.memory_space<vmem>>, %arg12: memref<8x512xf32, #tpu.memory_space<vmem>>, %arg13: memref<8x512xf32, #tpu.memory_space<vmem>>) attributes {dimension_semantics = [#tpu.dimension_semantics<arbitrary>], iteration_bounds = array<i64: 1>, scalar_prefetch = 0 : i64, scratch_operands = 0 : i64, tpu.core_type = #tpu.core_type<tc>, window_params = [{pipeline_mode = #tpu.pipeline_mode<synchronous>, transform_indices = @transform_0, window_bounds = array<i64: 8, 1024>}, {pipeline_mode = #tpu.pipeline_mode<synchronous>, transform_indices = @transform_1, window_bounds = array<i64: 8, 384>}, {pipeline_mode = #tpu.pipeline_mode<synchronous>, transform_indices = @transform_2, window_bounds = array<i64: 1024, 512>}, {pipeline_mode = #tpu.pipeline_mode<synchronous>, transform_indices = @transform_3, window_bounds = array<i64: 512, 512>}, {pipeline_mode = #tpu.pipeline_mode<synchronous>, transform_indices = @transform_4, window_bounds = array<i64: 1, 512>}, {pipeline_mode = #tpu.pipeline_mode<synchronous>, transform_indices = @transform_5, window_bounds = array<i64: 1, 512>}, {pipeline_mode = #tpu.pipeline_mode<synchronous>, transform_indices = @transform_6, window_bounds = array<i64: 384, 512>}, {pipeline_mode = #tpu.pipeline_mode<synchronous>, transform_indices = @transform_7, window_bounds = array<i64: 512, 512>}, {pipeline_mode = #tpu.pipeline_mode<synchronous>, transform_indices = @transform_8, window_bounds = array<i64: 1, 512>}, {pipeline_mode = #tpu.pipeline_mode<synchronous>, transform_indices = @transform_9, window_bounds = array<i64: 1, 512>}, {pipeline_mode = #tpu.pipeline_mode<synchronous>, transform_indices = @transform_10, window_bounds = array<i64: 8, 8>}, {pipeline_mode = #tpu.pipeline_mode<synchronous>, transform_indices = @transform_11, window_bounds = array<i64: 8, 512>}, {pipeline_mode = #tpu.pipeline_mode<synchronous>, transform_indices = @transform_12, window_bounds = array<i64: 8, 512>}]} {
    %c0 = arith.constant 0 : index
    %c0_0 = arith.constant 0 : index
    %0 = vector.load %arg1[%c0, %c0_0] : memref<8x1024xf32, #tpu.memory_space<vmem>>, vector<8x1024xf32>
    %c0_1 = arith.constant 0 : index
    %c0_2 = arith.constant 0 : index
    %1 = vector.load %arg3[%c0_1, %c0_2] : memref<1024x512xbf16, #tpu.memory_space<vmem>>, vector<1024x512xbf16>
    %c0_3 = arith.constant 0 : index
    %c0_4 = arith.constant 0 : index
    %2 = vector.load %arg4[%c0_3, %c0_4] : memref<512x512xbf16, #tpu.memory_space<vmem>>, vector<512x512xbf16>
    %c0_5 = arith.constant 0 : index
    %c0_6 = arith.constant 0 : index
    %3 = vector.load %arg5[%c0_5, %c0_6] : memref<1x512xf32, #tpu.memory_space<vmem>>, vector<1x512xf32>
    %c0_7 = arith.constant 0 : index
    %c0_8 = arith.constant 0 : index
    %4 = vector.load %arg6[%c0_7, %c0_8] : memref<1x512xf32, #tpu.memory_space<vmem>>, vector<1x512xf32>
    %5 = arith.truncf %0 : vector<8x1024xf32> to vector<8x1024xbf16>
    %cst = arith.constant dense<0.000000e+00> : vector<8x512xf32>
    %6 = tpu.matmul %5, %1, %cst {dimension_numbers = #tpu.dot_dimension_numbers<[1], [0], [0], [1], [0, 0, 1, 1], [], []>} : vector<8x1024xbf16>, vector<1024x512xbf16>, vector<8x512xf32> -> vector<8x512xf32>
    %cst_9 = arith.constant 5.000000e-01 : f32
    %7 = vector.broadcast %cst_9 : f32 to vector<8x512xf32>
    %8 = arith.mulf %7, %6 : vector<8x512xf32>
    %cst_10 = arith.constant 0.707106769 : f32
    %9 = vector.broadcast %cst_10 : f32 to vector<8x512xf32>
    %10 = arith.mulf %6, %9 : vector<8x512xf32>
    %11 = math.erf %10 : vector<8x512xf32>
    %cst_11 = arith.constant 1.000000e+00 : f32
    %12 = vector.broadcast %cst_11 : f32 to vector<8x512xf32>
    %13 = arith.addf %12, %11 : vector<8x512xf32>
    %14 = arith.mulf %8, %13 : vector<8x512xf32>
    %15 = arith.truncf %14 : vector<8x512xf32> to vector<8x512xbf16>
    %cst_12 = arith.constant dense<0.000000e+00> : vector<8x512xf32>
    %16 = tpu.matmul %15, %2, %cst_12 {dimension_numbers = #tpu.dot_dimension_numbers<[1], [0], [0], [1], [0, 0, 1, 1], [], []>} : vector<8x512xbf16>, vector<512x512xbf16>, vector<8x512xf32> -> vector<8x512xf32>
    %17 = arith.addf %6, %16 : vector<8x512xf32>
    %cst_13 = arith.constant dense<0.000000e+00> : vector<8xf32>
    %18 = vector.multi_reduction <add>, %17, %cst_13 [1] : vector<8x512xf32> to vector<8xf32>
    %19 = vector.shape_cast %18 : vector<8xf32> to vector<8x1xf32>
    %cst_14 = arith.constant 5.120000e+02 : f32
    %20 = vector.broadcast %cst_14 : f32 to vector<8x1xf32>
    %21 = arith.divf %19, %20 : vector<8x1xf32>
    %22 = vector.broadcast %21 : vector<8x1xf32> to vector<8x512xf32>
    %23 = arith.subf %17, %22 : vector<8x512xf32>
    %24 = arith.mulf %23, %23 : vector<8x512xf32>
    %cst_15 = arith.constant dense<0.000000e+00> : vector<8xf32>
    %25 = vector.multi_reduction <add>, %24, %cst_15 [1] : vector<8x512xf32> to vector<8xf32>
    %26 = vector.shape_cast %25 : vector<8xf32> to vector<8x1xf32>
    %cst_16 = arith.constant 5.120000e+02 : f32
    %27 = vector.broadcast %cst_16 : f32 to vector<8x1xf32>
    %28 = arith.divf %26, %27 : vector<8x1xf32>
    %29 = vector.broadcast %21 : vector<8x1xf32> to vector<8x512xf32>
    %30 = arith.subf %17, %29 : vector<8x512xf32>
    %cst_17 = arith.constant 9.99999974E-6 : f32
    %31 = vector.broadcast %cst_17 : f32 to vector<8x1xf32>
    %32 = arith.addf %28, %31 : vector<8x1xf32>
    %33 = math.rsqrt %32 : vector<8x1xf32>
    %34 = vector.broadcast %33 : vector<8x1xf32> to vector<8x512xf32>
    %35 = arith.mulf %30, %34 : vector<8x512xf32>
    %36 = vector.broadcast %3 : vector<1x512xf32> to vector<8x512xf32>
    %37 = arith.mulf %35, %36 : vector<8x512xf32>
    %38 = vector.broadcast %4 : vector<1x512xf32> to vector<8x512xf32>
    %39 = arith.addf %37, %38 : vector<8x512xf32>
    %40 = arith.mulf %39, %39 : vector<8x512xf32>
    %cst_18 = arith.constant dense<0.000000e+00> : vector<8xf32>
    %41 = vector.multi_reduction <add>, %40, %cst_18 [1] : vector<8x512xf32> to vector<8xf32>
    %42 = vector.shape_cast %41 : vector<8xf32> to vector<8x1xf32>
    %cst_19 = arith.constant 9.99999996E-13 : f32
    %43 = vector.broadcast %cst_19 : f32 to vector<8x1xf32>
    %44 = arith.addf %42, %43 : vector<8x1xf32>
    %45 = math.rsqrt %44 : vector<8x1xf32>
    %46 = vector.broadcast %45 : vector<8x1xf32> to vector<8x512xf32>
    %47 = arith.mulf %39, %46 : vector<8x512xf32>
    %c0_20 = arith.constant 0 : index
    %c0_21 = arith.constant 0 : index
    %48 = vector.load %arg2[%c0_20, %c0_21] : memref<8x384xf32, #tpu.memory_space<vmem>>, vector<8x384xf32>
    %c0_22 = arith.constant 0 : index
    %c0_23 = arith.constant 0 : index
    %49 = vector.load %arg7[%c0_22, %c0_23] : memref<384x512xbf16, #tpu.memory_space<vmem>>, vector<384x512xbf16>
    %c0_24 = arith.constant 0 : index
    %c0_25 = arith.constant 0 : index
    %50 = vector.load %arg8[%c0_24, %c0_25] : memref<512x512xbf16, #tpu.memory_space<vmem>>, vector<512x512xbf16>
    %c0_26 = arith.constant 0 : index
    %c0_27 = arith.constant 0 : index
    %51 = vector.load %arg9[%c0_26, %c0_27] : memref<1x512xf32, #tpu.memory_space<vmem>>, vector<1x512xf32>
    %c0_28 = arith.constant 0 : index
    %c0_29 = arith.constant 0 : index
    %52 = vector.load %arg10[%c0_28, %c0_29] : memref<1x512xf32, #tpu.memory_space<vmem>>, vector<1x512xf32>
    %53 = arith.truncf %48 : vector<8x384xf32> to vector<8x384xbf16>
    %cst_30 = arith.constant dense<0.000000e+00> : vector<8x512xf32>
    %54 = tpu.matmul %53, %49, %cst_30 {dimension_numbers = #tpu.dot_dimension_numbers<[1], [0], [0], [1], [0, 0, 1, 1], [], []>} : vector<8x384xbf16>, vector<384x512xbf16>, vector<8x512xf32> -> vector<8x512xf32>
    %cst_31 = arith.constant 5.000000e-01 : f32
    %55 = vector.broadcast %cst_31 : f32 to vector<8x512xf32>
    %56 = arith.mulf %55, %54 : vector<8x512xf32>
    %cst_32 = arith.constant 0.707106769 : f32
    %57 = vector.broadcast %cst_32 : f32 to vector<8x512xf32>
    %58 = arith.mulf %54, %57 : vector<8x512xf32>
    %59 = math.erf %58 : vector<8x512xf32>
    %cst_33 = arith.constant 1.000000e+00 : f32
    %60 = vector.broadcast %cst_33 : f32 to vector<8x512xf32>
    %61 = arith.addf %60, %59 : vector<8x512xf32>
    %62 = arith.mulf %56, %61 : vector<8x512xf32>
    %63 = arith.truncf %62 : vector<8x512xf32> to vector<8x512xbf16>
    %cst_34 = arith.constant dense<0.000000e+00> : vector<8x512xf32>
    %64 = tpu.matmul %63, %50, %cst_34 {dimension_numbers = #tpu.dot_dimension_numbers<[1], [0], [0], [1], [0, 0, 1, 1], [], []>} : vector<8x512xbf16>, vector<512x512xbf16>, vector<8x512xf32> -> vector<8x512xf32>
    %65 = arith.addf %54, %64 : vector<8x512xf32>
    %cst_35 = arith.constant dense<0.000000e+00> : vector<8xf32>
    %66 = vector.multi_reduction <add>, %65, %cst_35 [1] : vector<8x512xf32> to vector<8xf32>
    %67 = vector.shape_cast %66 : vector<8xf32> to vector<8x1xf32>
    %cst_36 = arith.constant 5.120000e+02 : f32
    %68 = vector.broadcast %cst_36 : f32 to vector<8x1xf32>
    %69 = arith.divf %67, %68 : vector<8x1xf32>
    %70 = vector.broadcast %69 : vector<8x1xf32> to vector<8x512xf32>
    %71 = arith.subf %65, %70 : vector<8x512xf32>
    %72 = arith.mulf %71, %71 : vector<8x512xf32>
    %cst_37 = arith.constant dense<0.000000e+00> : vector<8xf32>
    %73 = vector.multi_reduction <add>, %72, %cst_37 [1] : vector<8x512xf32> to vector<8xf32>
    %74 = vector.shape_cast %73 : vector<8xf32> to vector<8x1xf32>
    %cst_38 = arith.constant 5.120000e+02 : f32
    %75 = vector.broadcast %cst_38 : f32 to vector<8x1xf32>
    %76 = arith.divf %74, %75 : vector<8x1xf32>
    %77 = vector.broadcast %69 : vector<8x1xf32> to vector<8x512xf32>
    %78 = arith.subf %65, %77 : vector<8x512xf32>
    %cst_39 = arith.constant 9.99999974E-6 : f32
    %79 = vector.broadcast %cst_39 : f32 to vector<8x1xf32>
    %80 = arith.addf %76, %79 : vector<8x1xf32>
    %81 = math.rsqrt %80 : vector<8x1xf32>
    %82 = vector.broadcast %81 : vector<8x1xf32> to vector<8x512xf32>
    %83 = arith.mulf %78, %82 : vector<8x512xf32>
    %84 = vector.broadcast %51 : vector<1x512xf32> to vector<8x512xf32>
    %85 = arith.mulf %83, %84 : vector<8x512xf32>
    %86 = vector.broadcast %52 : vector<1x512xf32> to vector<8x512xf32>
    %87 = arith.addf %85, %86 : vector<8x512xf32>
    %88 = arith.mulf %87, %87 : vector<8x512xf32>
    %cst_40 = arith.constant dense<0.000000e+00> : vector<8xf32>
    %89 = vector.multi_reduction <add>, %88, %cst_40 [1] : vector<8x512xf32> to vector<8xf32>
    %90 = vector.shape_cast %89 : vector<8xf32> to vector<8x1xf32>
    %cst_41 = arith.constant 9.99999996E-13 : f32
    %91 = vector.broadcast %cst_41 : f32 to vector<8x1xf32>
    %92 = arith.addf %90, %91 : vector<8x1xf32>
    %93 = math.rsqrt %92 : vector<8x1xf32>
    %94 = vector.broadcast %93 : vector<8x1xf32> to vector<8x512xf32>
    %95 = arith.mulf %87, %94 : vector<8x512xf32>
    %c0_42 = arith.constant 0 : index
    %c0_43 = arith.constant 0 : index
    %96 = vector.load %arg12[%c0_42, %c0_43] : memref<8x512xf32, #tpu.memory_space<vmem>>, vector<8x512xf32>
    tpu.vector_store %arg12[%c0_42, %c0_43], %47 {strides = array<i32>} : memref<8x512xf32, #tpu.memory_space<vmem>>, vector<8x512xf32>,
    %c0_44 = arith.constant 0 : index
    %c0_45 = arith.constant 0 : index
    %97 = vector.load %arg13[%c0_44, %c0_45] : memref<8x512xf32, #tpu.memory_space<vmem>>, vector<8x512xf32>
    tpu.vector_store %arg13[%c0_44, %c0_45], %95 {strides = array<i32>} : memref<8x512xf32, #tpu.memory_space<vmem>>, vector<8x512xf32>,
    %98 = arith.truncf %47 : vector<8x512xf32> to vector<8x512xbf16>
    %99 = arith.truncf %95 : vector<8x512xf32> to vector<8x512xbf16>
    %cst_46 = arith.constant dense<0.000000e+00> : vector<8x8xf32>
    %100 = tpu.matmul %98, %99, %cst_46 {dimension_numbers = #tpu.dot_dimension_numbers<[1], [1], [0], [0], [0, 0, 1, 0], [], []>} : vector<8x512xbf16>, vector<8x512xbf16>, vector<8x8xf32> -> vector<8x8xf32>
    %c0_47 = arith.constant 0 : index
    %c0_48 = arith.constant 0 : index
    %101 = vector.load %arg11[%c0_47, %c0_48] : memref<8x8xf32, #tpu.memory_space<vmem>>, vector<8x8xf32>
    tpu.vector_store %arg11[%c0_47, %c0_48], %100 {strides = array<i32>} : memref<8x8xf32, #tpu.memory_space<vmem>>, vector<8x8xf32>,
    return
  }
  func.func @transform_0(%arg0: i32) -> (i32, i32) {
    %c0_i32 = arith.constant 0 : i32
    %c0_i32_0 = arith.constant 0 : i32
    %c0_i32_1 = arith.constant 0 : i32
    return %c0_i32, %c0_i32_0 : i32, i32
  }
  func.func @transform_1(%arg0: i32) -> (i32, i32) {
    %c0_i32 = arith.constant 0 : i32
    %c0_i32_0 = arith.constant 0 : i32
    %c0_i32_1 = arith.constant 0 : i32
    return %c0_i32, %c0_i32_0 : i32, i32
  }
  func.func @transform_2(%arg0: i32) -> (i32, i32) {
    %c0_i32 = arith.constant 0 : i32
    %c0_i32_0 = arith.constant 0 : i32
    %c0_i32_1 = arith.constant 0 : i32
    return %c0_i32, %c0_i32_0 : i32, i32
  }
  func.func @transform_3(%arg0: i32) -> (i32, i32) {
    %c0_i32 = arith.constant 0 : i32
    %c0_i32_0 = arith.constant 0 : i32
    %c0_i32_1 = arith.constant 0 : i32
    return %c0_i32, %c0_i32_0 : i32, i32
  }
  func.func @transform_4(%arg0: i32) -> (i32, i32) {
    %c0_i32 = arith.constant 0 : i32
    %c0_i32_0 = arith.constant 0 : i32
    %c0_i32_1 = arith.constant 0 : i32
    return %c0_i32, %c0_i32_0 : i32, i32
  }
  func.func @transform_5(%arg0: i32) -> (i32, i32) {
    %c0_i32 = arith.constant 0 : i32
    %c0_i32_0 = arith.constant 0 : i32
    %c0_i32_1 = arith.constant 0 : i32
    return %c0_i32, %c0_i32_0 : i32, i32
  }
  func.func @transform_6(%arg0: i32) -> (i32, i32) {
    %c0_i32 = arith.constant 0 : i32
    %c0_i32_0 = arith.constant 0 : i32
    %c0_i32_1 = arith.constant 0 : i32
    return %c0_i32, %c0_i32_0 : i32, i32
  }
  func.func @transform_7(%arg0: i32) -> (i32, i32) {
    %c0_i32 = arith.constant 0 : i32
    %c0_i32_0 = arith.constant 0 : i32
    %c0_i32_1 = arith.constant 0 : i32
    return %c0_i32, %c0_i32_0 : i32, i32
  }
  func.func @transform_8(%arg0: i32) -> (i32, i32) {
    %c0_i32 = arith.constant 0 : i32
    %c0_i32_0 = arith.constant 0 : i32
    %c0_i32_1 = arith.constant 0 : i32
    return %c0_i32, %c0_i32_0 : i32, i32
  }
  func.func @transform_9(%arg0: i32) -> (i32, i32) {
    %c0_i32 = arith.constant 0 : i32
    %c0_i32_0 = arith.constant 0 : i32
    %c0_i32_1 = arith.constant 0 : i32
    return %c0_i32, %c0_i32_0 : i32, i32
  }
  func.func @transform_10(%arg0: i32) -> (i32, i32) {
    %c0_i32 = arith.constant 0 : i32
    %c0_i32_0 = arith.constant 0 : i32
    %c0_i32_1 = arith.constant 0 : i32
    return %c0_i32, %c0_i32_0 : i32, i32
  }
  func.func @transform_11(%arg0: i32) -> (i32, i32) {
    %c0_i32 = arith.constant 0 : i32
    %c0_i32_0 = arith.constant 0 : i32
    %c0_i32_1 = arith.constant 0 : i32
    return %c0_i32, %c0_i32_0 : i32, i32
  }
  func.func @transform_12(%arg0: i32) -> (i32, i32) {
    %c0_i32 = arith.constant 0 : i32
    %c0_i32_0 = arith.constant 0 : i32
    %c0_i32_1 = arith.constant 0 : i32
    return %c0_i32, %c0_i32_0 : i32, i32
  }
}

</mosaic_0001>

<bundles_post_ra>
// kernel: clip_like_forward.1
= control target key start
LH: loop header
LB: loop body
LE: loop exit
PB: predicated region body
PF: predicated region fallthrough
CT: control target
= control target key end

     0   :  { %18 = vsyncpa [#allocation3], 0  ;;  %s6918_s0 = inlined_call_operand.vmem [shape: f32[8,1024], index: 0, kind: input, shape index: {}]   ;;  %s6919_s1 = inlined_call_operand.vmem [shape: f32[8,384], index: 1, kind: input, shape index: {}]   ;;  %s6920_s2 = inlined_call_operand.hbm [shape: bf16[1024,512], index: 2, kind: input, shape index: {}]   ;;  %s6921_s3 = inlined_call_operand.hbm [shape: bf16[512,512], index: 3, kind: input, shape index: {}]   ;;  %s6922_s4 = inlined_call_operand.vmem [shape: f32[1,512], index: 4, kind: input, shape index: {}]   ;;  %s6923_s5 = inlined_call_operand.vmem [shape: f32[1,512], index: 5, kind: input, shape index: {}]   ;;  %s6924_s6 = inlined_call_operand.hbm [shape: bf16[384,512], index: 6, kind: input, shape index: {}]   ;;  %s6925_s7 = inlined_call_operand.hbm [shape: bf16[512,512], index: 7, kind: input, shape index: {}]   ;;  %s6926_s8 = inlined_call_operand.vmem [shape: f32[1,512], index: 8, kind: input, shape index: {}]   ;;  %s6927_s9 = inlined_call_operand.vmem [shape: f32[1,512], index: 9, kind: input, shape index: {}]   ;;  %s6928_s10 = inlined_call_operand.vmem [shape: f32[8,8], index: 10, kind: output, shape index: {0}]   ;;  %s6929_s11 = inlined_call_operand.vmem [shape: f32[8,512], index: 11, kind: output, shape index: {1}]   ;;  %s6930_s12 = inlined_call_operand.vmem [shape: f32[8,512], index: 12, kind: output, shape index: {2}]  }
   0x1   :  { %19 = vsyncpa [#allocation5], 0 }
   0x2   :  { %20 = vsyncpa [#allocation8], 0  ;;  %s6618_s21 = smov [#allocation4]   ;;  %s6619_s23 = smov [#allocation2]  }
   0x3   :  { %s42_s22 = sshll.u32 %s6618_s21, 4  ;;  %s30_s24 = sshll.u32 %s6619_s23, 4  ;;  %s43_s22 = int_to_ptr.vmem [resolvable:$true] %s42_s22  ;;  %s6690_s24 = int_to_ptr.vmem [resolvable:$true] %s30_s24 }
   0x4   :  { %s6524_s27 = scalar_lea.hbm %s6921_s3, 16384 }
   0x5   :  { %p6525_p0 = scmp.ne.s32.totalorder %s6921_s3, %s6524_s27  ;;  %p6528_p1 = scmp.lt.u32.totalorder %s6524_s27, %s6921_s3 }
   0x7   :  { %p6530_p2 = pnand %p6528_p1, %p6525_p0 }
   0x9   :  { %6533 = shalt.err (!%p6530_p2)
}
   0xa   :  { %s6534_s14 = scalar_lea.vmem %s43_s22, 16384  ;;  %p6539_p4 = scmp.lt.s32.totalorder %s43_s22, %s43_s22 }
   0xb   :  { %p6535_p3 = scmp.ne.s32.totalorder %s43_s22, %s6534_s14  ;;  %p6540_p5 = scmp.lt.s32.totalorder %s6534_s14, %s6534_s14 }
   0xd   :  { %p6541_p6 = por %p6540_p5, %p6539_p4 }
   0xf   :  { %p6542_p7 = pnand %p6541_p6, %p6535_p3 }
  0x11   :  { %6545 = shalt.err (!%p6542_p7)
}
  0x12   :  { %s6620_s15 = smov 256   ;;  %s6621_s16 = smov 16  }
  0x13   :  { %48 = dma.hbm_to_vmem [thread:$0]  %s6921_s3, 16384, %s43_s22, [#allocation5], %s6620_s15, %s6620_s15, %s6621_s16  }
  0x14   :  { %s6546_s21 = scalar_lea.hbm %s6920_s2, 32768 }
  0x15   :  { %p6547_p8 = scmp.ne.s32.totalorder %s6920_s2, %s6546_s21  ;;  %p6550_p9 = scmp.lt.u32.totalorder %s6546_s21, %s6920_s2 }
  0x17   :  { %p6552_p10 = pnand %p6550_p9, %p6547_p8 }
  0x19   :  { %6555 = shalt.err (!%p6552_p10)
}
  0x1a   :  { %s6556_s28 = scalar_lea.vmem %s6690_s24, 32768  ;;  %p6561_p12 = scmp.lt.s32.totalorder %s6690_s24, %s6690_s24 }
  0x1b   :  { %p6557_p11 = scmp.ne.s32.totalorder %s6690_s24, %s6556_s28  ;;  %p6562_p13 = scmp.lt.s32.totalorder %s6556_s28, %s6556_s28 }
  0x1d   :  { %p6563_p0 = por %p6562_p13, %p6561_p12 }
  0x1f   :  { %p6564_p1 = pnand %p6563_p0, %p6557_p11 }
  0x21   :  { %6567 = shalt.err (!%p6564_p1)
}
  0x22   :  { %36 = dma.hbm_to_vmem [thread:$0]  %s6920_s2, 32768, %s6690_s24, [#allocation3], %s6620_s15, %s6620_s15, %s6621_s16  }
  0x23   :  { %s6622_s29 = smov [#allocation6]   ;;  %s6623_s13 = smov [#allocation7]  }
  0x24   :  { %s58_s30 = sshll.u32 %s6622_s29, 4  ;;  %s70_s14 = sshll.u32 %s6623_s13, 4  ;;  %s59_s30 = int_to_ptr.vmem [resolvable:$true] %s58_s30  ;;  %s6727_s14 = int_to_ptr.vmem [resolvable:$true] %s70_s14 }
  0x25   :  { %s6568_s19 = scalar_lea.hbm %s6924_s6, 12288 }
  0x26   :  { %p6569_p2 = scmp.ne.s32.totalorder %s6924_s6, %s6568_s19  ;;  %p6572_p3 = scmp.lt.u32.totalorder %s6568_s19, %s6924_s6 }
  0x28   :  { %p6574_p4 = pnand %p6572_p3, %p6569_p2 }
  0x2a   :  { %6577 = shalt.err (!%p6574_p4)
}
  0x2b   :  { %s6578_s2 = scalar_lea.vmem %s59_s30, 12288  ;;  %p6583_p6 = scmp.lt.s32.totalorder %s59_s30, %s59_s30 }
  0x2c   :  { %p6579_p5 = scmp.ne.s32.totalorder %s59_s30, %s6578_s2  ;;  %p6584_p7 = scmp.lt.s32.totalorder %s6578_s2, %s6578_s2 }
  0x2e   :  { %p6585_p8 = por %p6584_p7, %p6583_p6 }
  0x30   :  { %p6586_p9 = pnand %p6585_p8, %p6579_p5 }
  0x32   :  { %6589 = shalt.err (!%p6586_p9)
}
  0x33   :  { %64 = dma.hbm_to_vmem [thread:$0]  %s6924_s6, 12288, %s59_s30, [#allocation5], %s6620_s15, %s6620_s15, %s6621_s16  }
  0x34   :  { %s6590_s3 = scalar_lea.hbm %s6925_s7, 16384 }
  0x35   :  { %p6591_p10 = scmp.ne.s32.totalorder %s6925_s7, %s6590_s3  ;;  %p6594_p11 = scmp.lt.u32.totalorder %s6590_s3, %s6925_s7 }
  0x37   :  { %p6596_p12 = pnand %p6594_p11, %p6591_p10 }
  0x39   :  { %6599 = shalt.err (!%p6596_p12)
}
  0x3a   :  { %s6600_s18 = scalar_lea.vmem %s6727_s14, 16384  ;;  %p6605_p0 = scmp.lt.s32.totalorder %s6727_s14, %s6727_s14 }
  0x3b   :  { %p6601_p13 = scmp.ne.s32.totalorder %s6727_s14, %s6600_s18  ;;  %p6606_p1 = scmp.lt.s32.totalorder %s6600_s18, %s6600_s18 }
  0x3d   :  { %p6607_p2 = por %p6606_p1, %p6605_p0 }
  0x3f   :  { %p6608_p3 = pnand %p6607_p2, %p6601_p13 }
  0x41   :  { %6611 = shalt.err (!%p6608_p3)
}
  0x42   :  { %76 = dma.hbm_to_vmem [thread:$0]  %s6925_s7, 16384, %s6727_s14, [#allocation8], %s6620_s15, %s6620_s15, %s6621_s16  }
  0x43   :  { %6612 = dma.done.wait [#allocation3], 32768  }
  0x44   :  { %6613 = vsyncadd [#allocation3], 4294934528 }
  0x45   :  { %6614 = dma.done.wait [#allocation5], 28672  }
  0x46   :  { %6615 = vsyncadd [#allocation5], 4294938624 }
  0x47   :  { %6616 = dma.done.wait [#allocation8], 16384  }
  0x48   :  { %6617 = vsyncadd [#allocation8], 4294950912  ;;  %v5588_v0 = vld [vmem:[#allocation2 + $0x4] ss:$16 sps:$4 sm:$0xff]   ;;  %v5590_v1 = vld [vmem:[#allocation2 + $0xc] ss:$16 sps:$4 sm:$0xff]  }
  0x49   :  { %1776 = vmatprep.subr.bf16.mxu0 %v5588_v0  ;;  %v5592_v2 = vld [vmem:[#allocation2] ss:$16 sps:$4 sm:$0xff]   ;;  %v5593_v3 = vld [vmem:[#allocation2 + $0x8] ss:$16 sps:$4 sm:$0xff]   ;;  %1940 = vmatprep.subr.bf16.mxu1 %v5590_v1  ;;  %v5594_v4 = vld [vmem:[#allocation2 + $0x24] ss:$16 sps:$4 sm:$0xff]  }
  0x4a   :  { %1777 = vmatpush1.bf16.msra.mxu0 %v5592_v2  ;;  %1941 = vmatpush1.bf16.msra.mxu1 %v5593_v3  ;;  %v5596_v5 = vld [vmem:[#allocation2 + $0x2c] ss:$16 sps:$4 sm:$0xff]   ;;  %v5598_v6 = vld [vmem:[#allocation2 + $0x20] ss:$16 sps:$4 sm:$0xff]   ;;  %v5599_v7 = vld [vmem:[#allocation2 + $0x28] ss:$16 sps:$4 sm:$0xff]  }
  0x4b   :  { %1778 = vmatprep.subr.bf16.mxu0 %v5594_v4  ;;  %1942 = vmatprep.subr.bf16.mxu1 %v5596_v5  ;;  %v5600_v8 = vld [vmem:[#allocation2 + $0x44] ss:$16 sps:$4 sm:$0xff]   ;;  %v5602_v9 = vld [vmem:[#allocation2 + $0x4c] ss:$16 sps:$4 sm:$0xff]   ;;  %v5604_v10 = vld [vmem:[#allocation2 + $0x40] ss:$16 sps:$4 sm:$0xff]  }
  0x4c   :  { %v5605_v11 = vld [vmem:[#allocation2 + $0x48] ss:$16 sps:$4 sm:$0xff]   ;;  %v5606_v12 = vld [vmem:[#allocation2 + $0x64] ss:$16 sps:$4 sm:$0xff]   ;;  %v5608_v13 = vld [vmem:[#allocation2 + $0x6c] ss:$16 sps:$4 sm:$0xff]  }
  0x4d   :  { %v5610_v14 = vld [vmem:[#allocation2 + $0x60] ss:$16 sps:$4 sm:$0xff]   ;;  %v5611_v15 = vld [vmem:[#allocation2 + $0x68] ss:$16 sps:$4 sm:$0xff]   ;;  %v5612_v16 = vld [vmem:[#allocation2 + $0x84] ss:$16 sps:$4 sm:$0xff]  }
  0x4e   :  { %1779 = vmatpush1.bf16.msra.mxu0 %v5598_v6  ;;  %1943 = vmatpush1.bf16.msra.mxu1 %v5599_v7  ;;  %v5614_v17 = vld [vmem:[#allocation2 + $0x8c] ss:$16 sps:$4 sm:$0xff]   ;;  %v5616_v18 = vld [vmem:[#allocation2 + $0x80] ss:$16 sps:$4 sm:$0xff]   ;;  %v5617_v19 = vld [vmem:[#allocation2 + $0x88] ss:$16 sps:$4 sm:$0xff]  }
  0x4f   :  { %1780 = vmatprep.subr.bf16.mxu0 %v5600_v8  ;;  %1944 = vmatprep.subr.bf16.mxu1 %v5602_v9  ;;  %v5618_v20 = vld [vmem:[#allocation2 + $0xa4] ss:$16 sps:$4 sm:$0xff]   ;;  %v5620_v21 = vld [vmem:[#allocation2 + $0xac] ss:$16 sps:$4 sm:$0xff]   ;;  %v5622_v22 = vld [vmem:[#allocation2 + $0xa0] ss:$16 sps:$4 sm:$0xff]  }
  0x50   :  { %v5623_v23 = vld [vmem:[#allocation2 + $0xa8] ss:$16 sps:$4 sm:$0xff]   ;;  %v5624_v24 = vld [vmem:[#allocation2 + $0xc4] ss:$16 sps:$4 sm:$0xff]   ;;  %v5626_v25 = vld [vmem:[#allocation2 + $0xcc] ss:$16 sps:$4 sm:$0xff]  }
  0x51   :  { %v5628_v26 = vld [vmem:[#allocation2 + $0xc0] ss:$16 sps:$4 sm:$0xff]   ;;  %v5629_v27 = vld [vmem:[#allocation2 + $0xc8] ss:$16 sps:$4 sm:$0xff]   ;;  %v5630_v28 = vld [vmem:[#allocation2 + $0xe4] ss:$16 sps:$4 sm:$0xff]  }
  0x52   :  { %1781 = vmatpush1.bf16.msra.mxu0 %v5604_v10  ;;  %1945 = vmatpush1.bf16.msra.mxu1 %v5605_v11  ;;  %v5632_v29 = vld [vmem:[#allocation2 + $0xec] ss:$16 sps:$4 sm:$0xff]   ;;  %v5634_v30 = vld [vmem:[#allocation2 + $0xe0] ss:$16 sps:$4 sm:$0xff]   ;;  %v5635_v31 = vld [vmem:[#allocation2 + $0xe8] ss:$16 sps:$4 sm:$0xff]  }
  0x53   :  { %1782 = vmatprep.subr.bf16.mxu0 %v5606_v12  ;;  %1946 = vmatprep.subr.bf16.mxu1 %v5608_v13  ;;  %v5636_v32 = vld [vmem:[#allocation2 + $0x104] ss:$16 sps:$4 sm:$0xff]   ;;  %v5638_v33 = vld [vmem:[#allocation2 + $0x10c] ss:$16 sps:$4 sm:$0xff]   ;;  %v5640_v34 = vld [vmem:[#allocation2 + $0x100] ss:$16 sps:$4 sm:$0xff]  }
  0x54   :  { %v5641_v35 = vld [vmem:[#allocation2 + $0x108] ss:$16 sps:$4 sm:$0xff]   ;;  %v5642_v36 = vld [vmem:[#allocation2 + $0x124] ss:$16 sps:$4 sm:$0xff]   ;;  %v5644_v37 = vld [vmem:[#allocation2 + $0x12c] ss:$16 sps:$4 sm:$0xff]  }
  0x55   :  { %v5646_v38 = vld [vmem:[#allocation2 + $0x120] ss:$16 sps:$4 sm:$0xff]   ;;  %v5647_v39 = vld [vmem:[#allocation2 + $0x128] ss:$16 sps:$4 sm:$0xff]   ;;  %v5648_v40 = vld [vmem:[#allocation2 + $0x144] ss:$16 sps:$4 sm:$0xff]  }
  0x56   :  { %1783 = vmatpush1.bf16.msra.mxu0 %v5610_v14  ;;  %1947 = vmatpush1.bf16.msra.mxu1 %v5611_v15  ;;  %v5650_v41 = vld [vmem:[#allocation2 + $0x14c] ss:$16 sps:$4 sm:$0xff]   ;;  %v5652_v42 = vld [vmem:[#allocation2 + $0x140] ss:$16 sps:$4 sm:$0xff]   ;;  %v5653_v43 = vld [vmem:[#allocation2 + $0x148] ss:$16 sps:$4 sm:$0xff]  }
  0x57   :  { %1784 = vmatprep.subr.bf16.mxu0 %v5612_v16  ;;  %1948 = vmatprep.subr.bf16.mxu1 %v5614_v17  ;;  %v5654_v44 = vld [vmem:[#allocation2 + $0x164] ss:$16 sps:$4 sm:$0xff]   ;;  %v5656_v45 = vld [vmem:[#allocation2 + $0x16c] ss:$16 sps:$4 sm:$0xff]   ;;  %v5658_v47 = vld [vmem:[#allocation2 + $0x160] ss:$16 sps:$4 sm:$0xff]  }
  0x58   :  { %v95_v46 = vld [vmem:[%s6918_s0 + $0x8] sm:$0xff]  ;;  %v5660_v50 = vld [vmem:[#allocation2 + $0x184] ss:$16 sps:$4 sm:$0xff]   ;;  %v5664_v52 = vld [vmem:[#allocation2 + $0x180] ss:$16 sps:$4 sm:$0xff]   ;;  %vm4923_vm0 = vcmask 64512  }
  0x59   :  { %v489_v48 = vpack.c.bf16 %v95_v46, %v95_v46  ;;  %v5659_v49 = vld [vmem:[#allocation2 + $0x168] ss:$16 sps:$4 sm:$0xff]   ;;  %v5662_v51 = vld [vmem:[#allocation2 + $0x18c] ss:$16 sps:$4 sm:$0xff]   ;;  %v5666_v54 = vld [vmem:[#allocation2 + $0x1a4] ss:$16 sps:$4 sm:$0xff]  }
  0x5a   :  { %1785 = vmatpush1.bf16.msra.mxu0 %v5616_v18  ;;  %1949 = vmatpush1.bf16.msra.mxu1 %v5617_v19  ;;  %v5665_v53 = vld [vmem:[#allocation2 + $0x188] ss:$16 sps:$4 sm:$0xff]   ;;  %v5668_v55 = vld [vmem:[#allocation2 + $0x1ac] ss:$16 sps:$4 sm:$0xff]   ;;  %v5670_v56 = vld [vmem:[#allocation2 + $0x1a0] ss:$16 sps:$4 sm:$0xff]  }
  0x5b   :  { %1786 = vmatprep.subr.bf16.mxu0 %v5618_v20  ;;  %1950 = vmatprep.subr.bf16.mxu1 %v5620_v21  ;;  %v5671_v57 = vld [vmem:[#allocation2 + $0x1a8] ss:$16 sps:$4 sm:$0xff]   ;;  %v5672_v58 = vld [vmem:[#allocation2 + $0x1c4] ss:$16 sps:$4 sm:$0xff]   ;;  %v5674_v59 = vld [vmem:[#allocation2 + $0x1cc] ss:$16 sps:$4 sm:$0xff]  }
  0x5c   :  { %1808 = vmatprep.mubr.bf16.mxu0 %v489_v48  ;;  %1972 = vmatprep.mubr.bf16.mxu1 %v489_v48  ;;  %v5676_v60 = vld [vmem:[#allocation2 + $0x1c0] ss:$16 sps:$4 sm:$0xff]   ;;  %v5677_v61 = vld [vmem:[#allocation2 + $0x1c8] ss:$16 sps:$4 sm:$0xff]   ;;  %v5678_v62 = vld [vmem:[#allocation2 + $0x1e4] ss:$16 sps:$4 sm:$0xff]  }
  0x5d   :  { %v5680_v63 = vld [vmem:[#allocation2 + $0x1ec] ss:$16 sps:$4 sm:$0xff]   ;;  %v5682_v0 = vld [vmem:[#allocation2 + $0x1e0] ss:$16 sps:$4 sm:$0xff]   ;;  %v5683_v1 = vld [vmem:[#allocation2 + $0x1e8] ss:$16 sps:$4 sm:$0xff]  }
  0x5e   :  { %1787 = vmatpush1.bf16.msra.mxu0 %v5622_v22  ;;  %1951 = vmatpush1.bf16.msra.mxu1 %v5623_v23  ;;  %v94_v2 = vld [vmem:[%s6918_s0] sm:$0xff]  ;;  %v5689_v4 = vld [vmem:[#allocation2 + $0x20c] ss:$16 sps:$4 sm:$0xff]   ;;  %v5687_v7 = vld [vmem:[#allocation2 + $0x208] ss:$16 sps:$4 sm:$0xff]  }
  0x5f   :  { %1788 = vmatprep.subr.bf16.mxu0 %v5624_v24  ;;  %1952 = vmatprep.subr.bf16.mxu1 %v5626_v25  ;;  %v5686_v3 = vld [vmem:[#allocation2 + $0x204] ss:$16 sps:$4 sm:$0xff]   ;;  %v488_v5 = vpack.c.bf16 %v94_v2, %v94_v2  ;;  %v5684_v6 = vld [vmem:[#allocation2 + $0x200] ss:$16 sps:$4 sm:$0xff]   ;;  %v5695_v9 = vld [vmem:[#allocation2 + $0x22c] ss:$16 sps:$4 sm:$0xff]  }
  0x60   :  { %v5692_v8 = vld [vmem:[#allocation2 + $0x224] ss:$16 sps:$4 sm:$0xff]   ;;  %v5690_v10 = vld [vmem:[#allocation2 + $0x220] ss:$16 sps:$4 sm:$0xff]   ;;  %v5693_v11 = vld [vmem:[#allocation2 + $0x228] ss:$16 sps:$4 sm:$0xff]  }
  0x61   :  { %v5698_v12 = vld [vmem:[#allocation2 + $0x244] ss:$16 sps:$4 sm:$0xff]   ;;  %v5701_v13 = vld [vmem:[#allocation2 + $0x24c] ss:$16 sps:$4 sm:$0xff]   ;;  %v5696_v14 = vld [vmem:[#allocation2 + $0x240] ss:$16 sps:$4 sm:$0xff]  }
  0x62   :  { %1789 = vmatpush1.bf16.msra.mxu0 %v5628_v26  ;;  %1953 = vmatpush1.bf16.msra.mxu1 %v5629_v27  ;;  %v5699_v15 = vld [vmem:[#allocation2 + $0x248] ss:$16 sps:$4 sm:$0xff]   ;;  %v5704_v16 = vld [vmem:[#allocation2 + $0x264] ss:$16 sps:$4 sm:$0xff]   ;;  %v5707_v17 = vld [vmem:[#allocation2 + $0x26c] ss:$16 sps:$4 sm:$0xff]  }
  0x63   :  { %1790 = vmatprep.subr.bf16.mxu0 %v5630_v28  ;;  %1954 = vmatprep.subr.bf16.mxu1 %v5632_v29  ;;  %v5702_v18 = vld [vmem:[#allocation2 + $0x260] ss:$16 sps:$4 sm:$0xff]   ;;  %v5705_v19 = vld [vmem:[#allocation2 + $0x268] ss:$16 sps:$4 sm:$0xff]   ;;  %v5710_v20 = vld [vmem:[#allocation2 + $0x284] ss:$16 sps:$4 sm:$0xff]  }
  0x64   :  { %v5713_v21 = vld [vmem:[#allocation2 + $0x28c] ss:$16 sps:$4 sm:$0xff]   ;;  %v5708_v22 = vld [vmem:[#allocation2 + $0x280] ss:$16 sps:$4 sm:$0xff]   ;;  %v5711_v23 = vld [vmem:[#allocation2 + $0x288] ss:$16 sps:$4 sm:$0xff]  }
  0x65   :  { %v5716_v24 = vld [vmem:[#allocation2 + $0x2a4] ss:$16 sps:$4 sm:$0xff]   ;;  %v5719_v25 = vld [vmem:[#allocation2 + $0x2ac] ss:$16 sps:$4 sm:$0xff]   ;;  %v5714_v26 = vld [vmem:[#allocation2 + $0x2a0] ss:$16 sps:$4 sm:$0xff]  }
  0x66   :  { %1791 = vmatpush1.bf16.msra.mxu0 %v5634_v30  ;;  %1955 = vmatpush1.bf16.msra.mxu1 %v5635_v31  ;;  %v5717_v27 = vld [vmem:[#allocation2 + $0x2a8] ss:$16 sps:$4 sm:$0xff]   ;;  %v5722_v28 = vld [vmem:[#allocation2 + $0x2c4] ss:$16 sps:$4 sm:$0xff]   ;;  %v5725_v29 = vld [vmem:[#allocation2 + $0x2cc] ss:$16 sps:$4 sm:$0xff]  }
  0x67   :  { %1792 = vmatprep.subr.bf16.mxu0 %v5636_v32  ;;  %1956 = vmatprep.subr.bf16.mxu1 %v5638_v33  ;;  %v97_v30 = vld [vmem:[%s6918_s0 + $0x18] sm:$0xff]  ;;  %v5720_v31 = vld [vmem:[#allocation2 + $0x2c0] ss:$16 sps:$4 sm:$0xff]   ;;  %v5746_v46 = vld [vmem:[#allocation2 + $0x344] ss:$16 sps:$4 sm:$0xff]  }
  0x68   :  { %v491_v32 = vpack.c.bf16 %v97_v30, %v97_v30  ;;  %v5723_v33 = vld [vmem:[#allocation2 + $0x2c8] ss:$16 sps:$4 sm:$0xff]   ;;  %v5744_v48 = vld [vmem:[#allocation2 + $0x340] ss:$16 sps:$4 sm:$0xff]   ;;  %v5776_v2 = vld [vmem:[#allocation2 + $0x3e4] ss:$16 sps:$4 sm:$0xff]  }
  0x69   :  { %v5812_v30 = vld [vmem:[#allocation2 + $0x4a4] ss:$16 sps:$4 sm:$0xff]  }
  0x6a   :  { %1793 = vmatpush1.bf16.msra.mxu0 %v5640_v34  ;;  %1957 = vmatpush1.bf16.msra.mxu1 %v5641_v35  ;;  %v5728_v34 = vld [vmem:[#allocation2 + $0x2e4] ss:$16 sps:$4 sm:$0xff]   ;;  %v5731_v35 = vld [vmem:[#allocation2 + $0x2ec] ss:$16 sps:$4 sm:$0xff]  }
  0x6b   :  { %1794 = vmatprep.subr.bf16.mxu0 %v5642_v36  ;;  %1958 = vmatprep.subr.bf16.mxu1 %v5644_v37  ;;  %v5726_v36 = vld [vmem:[#allocation2 + $0x2e0] ss:$16 sps:$4 sm:$0xff]   ;;  %v5729_v37 = vld [vmem:[#allocation2 + $0x2e8] ss:$16 sps:$4 sm:$0xff]  }
  0x6e   :  { %1795 = vmatpush1.bf16.msra.mxu0 %v5646_v38  ;;  %1959 = vmatpush1.bf16.msra.mxu1 %v5647_v39  ;;  %v5734_v38 = vld [vmem:[#allocation2 + $0x304] ss:$16 sps:$4 sm:$0xff]   ;;  %v5737_v39 = vld [vmem:[#allocation2 + $0x30c] ss:$16 sps:$4 sm:$0xff]  }
  0x6f   :  { %1796 = vmatprep.subr.bf16.mxu0 %v5648_v40  ;;  %1960 = vmatprep.subr.bf16.mxu1 %v5650_v41  ;;  %v5732_v40 = vld [vmem:[#allocation2 + $0x300] ss:$16 sps:$4 sm:$0xff]   ;;  %v5735_v41 = vld [vmem:[#allocation2 + $0x308] ss:$16 sps:$4 sm:$0xff]  }
  0x72   :  { %1797 = vmatpush1.bf16.msra.mxu0 %v5652_v42  ;;  %1961 = vmatpush1.bf16.msra.mxu1 %v5653_v43  ;;  %v5740_v42 = vld [vmem:[#allocation2 + $0x324] ss:$16 sps:$4 sm:$0xff]   ;;  %v5743_v43 = vld [vmem:[#allocation2 + $0x32c] ss:$16 sps:$4 sm:$0xff]  }
  0x73   :  { %1798 = vmatprep.subr.bf16.mxu0 %v5654_v44  ;;  %1962 = vmatprep.subr.bf16.mxu1 %v5656_v45  ;;  %v5738_v44 = vld [vmem:[#allocation2 + $0x320] ss:$16 sps:$4 sm:$0xff]   ;;  %v5741_v45 = vld [vmem:[#allocation2 + $0x328] ss:$16 sps:$4 sm:$0xff]  }
  0x76   :  { %1799 = vmatpush1.bf16.msra.mxu0 %v5658_v47  ;;  %1963 = vmatpush1.bf16.msra.mxu1 %v5659_v49  ;;  %v5749_v47 = vld [vmem:[#allocation2 + $0x34c] ss:$16 sps:$4 sm:$0xff]   ;;  %v5747_v49 = vld [vmem:[#allocation2 + $0x348] ss:$16 sps:$4 sm:$0xff]  }
  0x77   :  { %1800 = vmatprep.subr.bf16.mxu0 %v5660_v50  ;;  %1964 = vmatprep.subr.bf16.mxu1 %v5662_v51  ;;  %v5752_v50 = vld [vmem:[#allocation2 + $0x364] ss:$16 sps:$4 sm:$0xff]   ;;  %v5755_v51 = vld [vmem:[#allocation2 + $0x36c] ss:$16 sps:$4 sm:$0xff]  }
  0x7a   :  { %1801 = vmatpush1.bf16.msra.mxu0 %v5664_v52  ;;  %1965 = vmatpush1.bf16.msra.mxu1 %v5665_v53  ;;  %v5750_v52 = vld [vmem:[#allocation2 + $0x360] ss:$16 sps:$4 sm:$0xff]   ;;  %v5753_v53 = vld [vmem:[#allocation2 + $0x368] ss:$16 sps:$4 sm:$0xff]  }
  0x7b   :  { %1802 = vmatprep.subr.bf16.mxu0 %v5666_v54  ;;  %1966 = vmatprep.subr.bf16.mxu1 %v5668_v55  ;;  %v5758_v54 = vld [vmem:[#allocation2 + $0x384] ss:$16 sps:$4 sm:$0xff]   ;;  %v5761_v55 = vld [vmem:[#allocation2 + $0x38c] ss:$16 sps:$4 sm:$0xff]  }
  0x7e   :  { %1803 = vmatpush1.bf16.msra.mxu0 %v5670_v56  ;;  %1967 = vmatpush1.bf16.msra.mxu1 %v5671_v57  ;;  %v5756_v56 = vld [vmem:[#allocation2 + $0x380] ss:$16 sps:$4 sm:$0xff]   ;;  %v5759_v57 = vld [vmem:[#allocation2 + $0x388] ss:$16 sps:$4 sm:$0xff]  }
  0x7f   :  { %1804 = vmatprep.subr.bf16.mxu0 %v5672_v58  ;;  %1968 = vmatprep.subr.bf16.mxu1 %v5674_v59  ;;  %v5764_v58 = vld [vmem:[#allocation2 + $0x3a4] ss:$16 sps:$4 sm:$0xff]   ;;  %v5767_v59 = vld [vmem:[#allocation2 + $0x3ac] ss:$16 sps:$4 sm:$0xff]  }
  0x82   :  { %1805 = vmatpush1.bf16.msra.mxu0 %v5676_v60  ;;  %1969 = vmatpush1.bf16.msra.mxu1 %v5677_v61  ;;  %v5762_v60 = vld [vmem:[#allocation2 + $0x3a0] ss:$16 sps:$4 sm:$0xff]   ;;  %v5765_v61 = vld [vmem:[#allocation2 + $0x3a8] ss:$16 sps:$4 sm:$0xff]  }
  0x83   :  { %1806 = vmatprep.subr.bf16.mxu0 %v5678_v62  ;;  %1970 = vmatprep.subr.bf16.mxu1 %v5680_v63  ;;  %v5770_v62 = vld [vmem:[#allocation2 + $0x3c4] ss:$16 sps:$4 sm:$0xff]   ;;  %v5773_v63 = vld [vmem:[#allocation2 + $0x3cc] ss:$16 sps:$4 sm:$0xff]  }
  0x86   :  { %1807 = vmatpush1.bf16.msra.mxu0 %v5682_v0  ;;  %1971 = vmatpush1.bf16.msra.mxu1 %v5683_v1  ;;  %v5768_v0 = vld [vmem:[#allocation2 + $0x3c0] ss:$16 sps:$4 sm:$0xff]   ;;  %v5771_v1 = vld [vmem:[#allocation2 + $0x3c8] ss:$16 sps:$4 sm:$0xff]  }
  0x87   :  { %1817 = vmatprep.subr.bf16.mxu0 %v5686_v3  ;;  %1981 = vmatprep.subr.bf16.mxu1 %v5689_v4  ;;  %v5779_v3 = vld [vmem:[#allocation2 + $0x3ec] ss:$16 sps:$4 sm:$0xff]   ;;  %v5774_v4 = vld [vmem:[#allocation2 + $0x3e0] ss:$16 sps:$4 sm:$0xff]  }
  0x89   :  { %1809 = vmatmul.mubr.bf16.vlgmr.msra.gmra.mrb[0].mxu0 %v488_v5  ;;  %1973 = vmatmul.mubr.bf16.vlgmr.msra.gmra.mrb[0].mxu1 %v488_v5  ;;  %v5777_v5 = vld [vmem:[#allocation2 + $0x3e8] ss:$16 sps:$4 sm:$0xff]  }
  0x8a   :  { %1818 = vmatpush1.bf16.msra.mxu0 %v5684_v6  ;;  %1982 = vmatpush1.bf16.msra.mxu1 %v5687_v7  ;;  %v5782_v6 = vld [vmem:[#allocation2 + $0x404] ss:$16 sps:$4 sm:$0xff]  }
  0x8b   :  { %1819 = vmatprep.subr.bf16.mxu0 %v5692_v8  ;;  %1983 = vmatprep.subr.bf16.mxu1 %v5695_v9  ;;  %v96_v7 = vld [vmem:[%s6918_s0 + $0x10] sm:$0xff]  ;;  %v5785_v8 = vld [vmem:[#allocation2 + $0x40c] ss:$16 sps:$4 sm:$0xff]  }
  0x8c   :  { %1849 = vmatprep.mubr.bf16.mxu0 %v491_v32  ;;  %2013 = vmatprep.mubr.bf16.mxu1 %v491_v32  ;;  %v5780_v9 = vld [vmem:[#allocation2 + $0x400] ss:$16 sps:$4 sm:$0xff]  }
  0x8d   :  { %v5810_v32 = vld [vmem:[#allocation2 + $0x4a0] ss:$16 sps:$4 sm:$0xff]  }
  0x8e   :  { %1820 = vmatpush1.bf16.msra.mxu0 %v5690_v10  ;;  %1984 = vmatpush1.bf16.msra.mxu1 %v5693_v11  ;;  %v5783_v10 = vld [vmem:[#allocation2 + $0x408] ss:$16 sps:$4 sm:$0xff]   ;;  %v490_v11 = vpack.c.bf16 %v96_v7, %v96_v7  ;;  %v5875_v7 = vld [vmem:[#allocation2 + $0x5ec] ss:$16 sps:$4 sm:$0xff]  }
  0x8f   :  { %1821 = vmatprep.subr.bf16.mxu0 %v5698_v12  ;;  %1985 = vmatprep.subr.bf16.mxu1 %v5701_v13  ;;  %v5788_v12 = vld [vmem:[#allocation2 + $0x424] ss:$16 sps:$4 sm:$0xff]   ;;  %v5791_v13 = vld [vmem:[#allocation2 + $0x42c] ss:$16 sps:$4 sm:$0xff]  }
  0x92   :  { %1822 = vmatpush1.bf16.msra.mxu0 %v5696_v14  ;;  %1986 = vmatpush1.bf16.msra.mxu1 %v5699_v15  ;;  %v99_v14 = vld [vmem:[%s6918_s0 + $0x28] sm:$0xff] }
  0x93   :  { %1823 = vmatprep.subr.bf16.mxu0 %v5704_v16  ;;  %1987 = vmatprep.subr.bf16.mxu1 %v5707_v17  ;;  %v493_v15 = vpack.c.bf16 %v99_v14, %v99_v14  ;;  %v5786_v16 = vld [vmem:[#allocation2 + $0x420] ss:$16 sps:$4 sm:$0xff]   ;;  %v5789_v17 = vld [vmem:[#allocation2 + $0x428] ss:$16 sps:$4 sm:$0xff]  }
  0x94   :  { %v5879_v14 = vld [vmem:[#allocation2 + $0x608] ss:$16 sps:$4 sm:$0xff]  }
  0x96   :  { %1824 = vmatpush1.bf16.msra.mxu0 %v5702_v18  ;;  %1988 = vmatpush1.bf16.msra.mxu1 %v5705_v19  ;;  %v5794_v18 = vld [vmem:[#allocation2 + $0x444] ss:$16 sps:$4 sm:$0xff]   ;;  %v5797_v19 = vld [vmem:[#allocation2 + $0x44c] ss:$16 sps:$4 sm:$0xff]  }
  0x97   :  { %1825 = vmatprep.subr.bf16.mxu0 %v5710_v20  ;;  %1989 = vmatprep.subr.bf16.mxu1 %v5713_v21  ;;  %v5792_v20 = vld [vmem:[#allocation2 + $0x440] ss:$16 sps:$4 sm:$0xff]   ;;  %v5795_v21 = vld [vmem:[#allocation2 + $0x448] ss:$16 sps:$4 sm:$0xff]  }
  0x9a   :  { %1826 = vmatpush1.bf16.msra.mxu0 %v5708_v22  ;;  %1990 = vmatpush1.bf16.msra.mxu1 %v5711_v23  ;;  %v5800_v22 = vld [vmem:[#allocation2 + $0x464] ss:$16 sps:$4 sm:$0xff]   ;;  %v5803_v23 = vld [vmem:[#allocation2 + $0x46c] ss:$16 sps:$4 sm:$0xff]  }
  0x9b   :  { %1827 = vmatprep.subr.bf16.mxu0 %v5716_v24  ;;  %1991 = vmatprep.subr.bf16.mxu1 %v5719_v25  ;;  %v5798_v24 = vld [vmem:[#allocation2 + $0x460] ss:$16 sps:$4 sm:$0xff]   ;;  %v5801_v25 = vld [vmem:[#allocation2 + $0x468] ss:$16 sps:$4 sm:$0xff]  }
  0x9e   :  { %1828 = vmatpush1.bf16.msra.mxu0 %v5714_v26  ;;  %1992 = vmatpush1.bf16.msra.mxu1 %v5717_v27  ;;  %v5806_v26 = vld [vmem:[#allocation2 + $0x484] ss:$16 sps:$4 sm:$0xff]   ;;  %v5809_v27 = vld [vmem:[#allocation2 + $0x48c] ss:$16 sps:$4 sm:$0xff]  }
  0x9f   :  { %1829 = vmatprep.subr.bf16.mxu0 %v5722_v28  ;;  %1993 = vmatprep.subr.bf16.mxu1 %v5725_v29  ;;  %v5804_v28 = vld [vmem:[#allocation2 + $0x480] ss:$16 sps:$4 sm:$0xff]   ;;  %v5807_v29 = vld [vmem:[#allocation2 + $0x488] ss:$16 sps:$4 sm:$0xff]  }
  0xa2   :  { %1830 = vmatpush1.bf16.msra.mxu0 %v5720_v31  ;;  %1994 = vmatpush1.bf16.msra.mxu1 %v5723_v33  ;;  %v5815_v31 = vld [vmem:[#allocation2 + $0x4ac] ss:$16 sps:$4 sm:$0xff]   ;;  %v5813_v33 = vld [vmem:[#allocation2 + $0x4a8] ss:$16 sps:$4 sm:$0xff]  }
  0xa3   :  { %1831 = vmatprep.subr.bf16.mxu0 %v5728_v34  ;;  %1995 = vmatprep.subr.bf16.mxu1 %v5731_v35  ;;  %v5818_v34 = vld [vmem:[#allocation2 + $0x4c4] ss:$16 sps:$4 sm:$0xff]   ;;  %v5821_v35 = vld [vmem:[#allocation2 + $0x4cc] ss:$16 sps:$4 sm:$0xff]  }
  0xa6   :  { %1832 = vmatpush1.bf16.msra.mxu0 %v5726_v36  ;;  %1996 = vmatpush1.bf16.msra.mxu1 %v5729_v37  ;;  %v5816_v36 = vld [vmem:[#allocation2 + $0x4c0] ss:$16 sps:$4 sm:$0xff]   ;;  %v5819_v37 = vld [vmem:[#allocation2 + $0x4c8] ss:$16 sps:$4 sm:$0xff]  }
  0xa7   :  { %1833 = vmatprep.subr.bf16.mxu0 %v5734_v38  ;;  %1997 = vmatprep.subr.bf16.mxu1 %v5737_v39  ;;  %v5824_v38 = vld [vmem:[#allocation2 + $0x4e4] ss:$16 sps:$4 sm:$0xff]   ;;  %v5827_v39 = vld [vmem:[#allocation2 + $0x4ec] ss:$16 sps:$4 sm:$0xff]  }
  0xaa   :  { %1834 = vmatpush1.bf16.msra.mxu0 %v5732_v40  ;;  %1998 = vmatpush1.bf16.msra.mxu1 %v5735_v41  ;;  %v5822_v40 = vld [vmem:[#allocation2 + $0x4e0] ss:$16 sps:$4 sm:$0xff]   ;;  %v5825_v41 = vld [vmem:[#allocation2 + $0x4e8] ss:$16 sps:$4 sm:$0xff]  }
  0xab   :  { %1835 = vmatprep.subr.bf16.mxu0 %v5740_v42  ;;  %1999 = vmatprep.subr.bf16.mxu1 %v5743_v43  ;;  %v5830_v42 = vld [vmem:[#allocation2 + $0x504] ss:$16 sps:$4 sm:$0xff]   ;;  %v5833_v43 = vld [vmem:[#allocation2 + $0x50c] ss:$16 sps:$4 sm:$0xff]  }
  0xae   :  { %1836 = vmatpush1.bf16.msra.mxu0 %v5738_v44  ;;  %2000 = vmatpush1.bf16.msra.mxu1 %v5741_v45  ;;  %v5828_v44 = vld [vmem:[#allocation2 + $0x500] ss:$16 sps:$4 sm:$0xff]   ;;  %v5831_v45 = vld [vmem:[#allocation2 + $0x508] ss:$16 sps:$4 sm:$0xff]  }
  0xaf   :  { %1837 = vmatprep.subr.bf16.mxu0 %v5746_v46  ;;  %2001 = vmatprep.subr.bf16.mxu1 %v5749_v47  ;;  %v5836_v46 = vld [vmem:[#allocation2 + $0x524] ss:$16 sps:$4 sm:$0xff]   ;;  %v5839_v47 = vld [vmem:[#allocation2 + $0x52c] ss:$16 sps:$4 sm:$0xff]  }
  0xb2   :  { %1838 = vmatpush1.bf16.msra.mxu0 %v5744_v48  ;;  %2002 = vmatpush1.bf16.msra.mxu1 %v5747_v49  ;;  %v5834_v48 = vld [vmem:[#allocation2 + $0x520] ss:$16 sps:$4 sm:$0xff]   ;;  %v5837_v49 = vld [vmem:[#allocation2 + $0x528] ss:$16 sps:$4 sm:$0xff]  }
  0xb3   :  { %1839 = vmatprep.subr.bf16.mxu0 %v5752_v50  ;;  %2003 = vmatprep.subr.bf16.mxu1 %v5755_v51  ;;  %v5842_v50 = vld [vmem:[#allocation2 + $0x544] ss:$16 sps:$4 sm:$0xff]   ;;  %v5845_v51 = vld [vmem:[#allocation2 + $0x54c] ss:$16 sps:$4 sm:$0xff]  }
  0xb6   :  { %1840 = vmatpush1.bf16.msra.mxu0 %v5750_v52  ;;  %2004 = vmatpush1.bf16.msra.mxu1 %v5753_v53  ;;  %v5840_v52 = vld [vmem:[#allocation2 + $0x540] ss:$16 sps:$4 sm:$0xff]   ;;  %v5843_v53 = vld [vmem:[#allocation2 + $0x548] ss:$16 sps:$4 sm:$0xff]  }
  0xb7   :  { %1841 = vmatprep.subr.bf16.mxu0 %v5758_v54  ;;  %2005 = vmatprep.subr.bf16.mxu1 %v5761_v55  ;;  %v5848_v54 = vld [vmem:[#allocation2 + $0x564] ss:$16 sps:$4 sm:$0xff]   ;;  %v5851_v55 = vld [vmem:[#allocation2 + $0x56c] ss:$16 sps:$4 sm:$0xff]  }
  0xba   :  { %1842 = vmatpush1.bf16.msra.mxu0 %v5756_v56  ;;  %2006 = vmatpush1.bf16.msra.mxu1 %v5759_v57  ;;  %v5846_v56 = vld [vmem:[#allocation2 + $0x560] ss:$16 sps:$4 sm:$0xff]   ;;  %v5849_v57 = vld [vmem:[#allocation2 + $0x568] ss:$16 sps:$4 sm:$0xff]  }
  0xbb   :  { %1843 = vmatprep.subr.bf16.mxu0 %v5764_v58  ;;  %2007 = vmatprep.subr.bf16.mxu1 %v5767_v59  ;;  %v5854_v58 = vld [vmem:[#allocation2 + $0x584] ss:$16 sps:$4 sm:$0xff]   ;;  %v5857_v59 = vld [vmem:[#allocation2 + $0x58c] ss:$16 sps:$4 sm:$0xff]  }
  0xbe   :  { %1844 = vmatpush1.bf16.msra.mxu0 %v5762_v60  ;;  %2008 = vmatpush1.bf16.msra.mxu1 %v5765_v61  ;;  %v5852_v60 = vld [vmem:[#allocation2 + $0x580] ss:$16 sps:$4 sm:$0xff]   ;;  %v5855_v61 = vld [vmem:[#allocation2 + $0x588] ss:$16 sps:$4 sm:$0xff]  }
  0xbf   :  { %1845 = vmatprep.subr.bf16.mxu0 %v5770_v62  ;;  %2009 = vmatprep.subr.bf16.mxu1 %v5773_v63  ;;  %v5860_v62 = vld [vmem:[#allocation2 + $0x5a4] ss:$16 sps:$4 sm:$0xff]   ;;  %v5863_v63 = vld [vmem:[#allocation2 + $0x5ac] ss:$16 sps:$4 sm:$0xff]  }
  0xc2   :  { %1846 = vmatpush1.bf16.msra.mxu0 %v5768_v0  ;;  %2010 = vmatpush1.bf16.msra.mxu1 %v5771_v1  ;;  %v5858_v0 = vld [vmem:[#allocation2 + $0x5a0] ss:$16 sps:$4 sm:$0xff]   ;;  %v5861_v1 = vld [vmem:[#allocation2 + $0x5a8] ss:$16 sps:$4 sm:$0xff]  }
  0xc3   :  { %1847 = vmatprep.subr.bf16.mxu0 %v5776_v2  ;;  %2011 = vmatprep.subr.bf16.mxu1 %v5779_v3  ;;  %v5866_v2 = vld [vmem:[#allocation2 + $0x5c4] ss:$16 sps:$4 sm:$0xff]   ;;  %v5869_v3 = vld [vmem:[#allocation2 + $0x5cc] ss:$16 sps:$4 sm:$0xff]  }
  0xc6   :  { %1848 = vmatpush1.bf16.msra.mxu0 %v5774_v4  ;;  %2012 = vmatpush1.bf16.msra.mxu1 %v5777_v5  ;;  %v5864_v4 = vld [vmem:[#allocation2 + $0x5c0] ss:$16 sps:$4 sm:$0xff]   ;;  %v5867_v5 = vld [vmem:[#allocation2 + $0x5c8] ss:$16 sps:$4 sm:$0xff]  }
  0xc7   :  { %1858 = vmatprep.subr.bf16.mxu0 %v5782_v6  ;;  %2022 = vmatprep.subr.bf16.mxu1 %v5785_v8  ;;  %v5872_v6 = vld [vmem:[#allocation2 + $0x5e4] ss:$16 sps:$4 sm:$0xff]   ;;  %v5870_v8 = vld [vmem:[#allocation2 + $0x5e0] ss:$16 sps:$4 sm:$0xff]  }
  0xc9   :  { %1850 = vmatmul.mubr.bf16.vlgmr.msra.gmra.mrb[0].mxu0 %v490_v11  ;;  %2014 = vmatmul.mubr.bf16.vlgmr.msra.gmra.mrb[0].mxu1 %v490_v11  ;;  %v98_v11 = vld [vmem:[%s6918_s0 + $0x20] sm:$0xff] }
  0xca   :  { %1859 = vmatpush1.bf16.msra.mxu0 %v5780_v9  ;;  %2023 = vmatpush1.bf16.msra.mxu1 %v5783_v10  ;;  %v5873_v9 = vld [vmem:[#allocation2 + $0x5e8] ss:$16 sps:$4 sm:$0xff]   ;;  %v5878_v10 = vld [vmem:[#allocation2 + $0x604] ss:$16 sps:$4 sm:$0xff]  }
  0xcb   :  { %1860 = vmatprep.subr.bf16.mxu0 %v5788_v12  ;;  %2024 = vmatprep.subr.bf16.mxu1 %v5791_v13  ;;  %v5881_v12 = vld [vmem:[#allocation2 + $0x60c] ss:$16 sps:$4 sm:$0xff]   ;;  %v5876_v13 = vld [vmem:[#allocation2 + $0x600] ss:$16 sps:$4 sm:$0xff]  }
  0xcc   :  { %1890 = vmatprep.mubr.bf16.mxu0 %v493_v15  ;;  %2054 = vmatprep.mubr.bf16.mxu1 %v493_v15  ;;  %v492_v15 = vpack.c.bf16 %v98_v11, %v98_v11  ;;  %v5971_v11 = vld [vmem:[#allocation2 + $0x7ec] ss:$16 sps:$4 sm:$0xff]  }
  0xce   :  { %1861 = vmatpush1.bf16.msra.mxu0 %v5786_v16  ;;  %2025 = vmatpush1.bf16.msra.mxu1 %v5789_v17  ;;  %v101_v16 = vld [vmem:[%s6918_s0 + $0x38] sm:$0xff]  ;;  %v5884_v17 = vld [vmem:[#allocation2 + $0x624] ss:$16 sps:$4 sm:$0xff]  }
  0xcf   :  { %1862 = vmatprep.subr.bf16.mxu0 %v5794_v18  ;;  %2026 = vmatprep.subr.bf16.mxu1 %v5797_v19  ;;  %v5887_v18 = vld [vmem:[#allocation2 + $0x62c] ss:$16 sps:$4 sm:$0xff]   ;;  %v495_v19 = vpack.c.bf16 %v101_v16, %v101_v16  ;;  %v5977_v16 = vld [vmem:[#allocation4 + $0x204] ss:$16 sps:$4 sm:$0xff]  }
  0xd2   :  { %1863 = vmatpush1.bf16.msra.mxu0 %v5792_v20  ;;  %2027 = vmatpush1.bf16.msra.mxu1 %v5795_v21  ;;  %v5882_v20 = vld [vmem:[#allocation2 + $0x620] ss:$16 sps:$4 sm:$0xff]   ;;  %v5885_v21 = vld [vmem:[#allocation2 + $0x628] ss:$16 sps:$4 sm:$0xff]  }
  0xd3   :  { %1864 = vmatprep.subr.bf16.mxu0 %v5800_v22  ;;  %2028 = vmatprep.subr.bf16.mxu1 %v5803_v23  ;;  %v5890_v22 = vld [vmem:[#allocation2 + $0x644] ss:$16 sps:$4 sm:$0xff]   ;;  %v5893_v23 = vld [vmem:[#allocation2 + $0x64c] ss:$16 sps:$4 sm:$0xff]  }
  0xd6   :  { %1865 = vmatpush1.bf16.msra.mxu0 %v5798_v24  ;;  %2029 = vmatpush1.bf16.msra.mxu1 %v5801_v25  ;;  %v5888_v24 = vld [vmem:[#allocation2 + $0x640] ss:$16 sps:$4 sm:$0xff]   ;;  %v5891_v25 = vld [vmem:[#allocation2 + $0x648] ss:$16 sps:$4 sm:$0xff]  }
  0xd7   :  { %1866 = vmatprep.subr.bf16.mxu0 %v5806_v26  ;;  %2030 = vmatprep.subr.bf16.mxu1 %v5809_v27  ;;  %v5896_v26 = vld [vmem:[#allocation2 + $0x664] ss:$16 sps:$4 sm:$0xff]   ;;  %v5899_v27 = vld [vmem:[#allocation2 + $0x66c] ss:$16 sps:$4 sm:$0xff]  }
  0xda   :  { %1867 = vmatpush1.bf16.msra.mxu0 %v5804_v28  ;;  %2031 = vmatpush1.bf16.msra.mxu1 %v5807_v29  ;;  %v5894_v28 = vld [vmem:[#allocation2 + $0x660] ss:$16 sps:$4 sm:$0xff]   ;;  %v5897_v29 = vld [vmem:[#allocation2 + $0x668] ss:$16 sps:$4 sm:$0xff]  }
  0xdb   :  { %1868 = vmatprep.subr.bf16.mxu0 %v5812_v30  ;;  %2032 = vmatprep.subr.bf16.mxu1 %v5815_v31  ;;  %v5902_v30 = vld [vmem:[#allocation2 + $0x684] ss:$16 sps:$4 sm:$0xff]   ;;  %v5905_v31 = vld [vmem:[#allocation2 + $0x68c] ss:$16 sps:$4 sm:$0xff]  }
  0xde   :  { %1869 = vmatpush1.bf16.msra.mxu0 %v5810_v32  ;;  %2033 = vmatpush1.bf16.msra.mxu1 %v5813_v33  ;;  %v5900_v32 = vld [vmem:[#allocation2 + $0x680] ss:$16 sps:$4 sm:$0xff]   ;;  %v5903_v33 = vld [vmem:[#allocation2 + $0x688] ss:$16 sps:$4 sm:$0xff]  }
  0xdf   :  { %1870 = vmatprep.subr.bf16.mxu0 %v5818_v34  ;;  %2034 = vmatprep.subr.bf16.mxu1 %v5821_v35  ;;  %v5908_v34 = vld [vmem:[#allocation2 + $0x6a4] ss:$16 sps:$4 sm:$0xff]   ;;  %v5911_v35 = vld [vmem:[#allocation2 + $0x6ac] ss:$16 sps:$4 sm:$0xff]  }
  0xe2   :  { %1871 = vmatpush1.bf16.msra.mxu0 %v5816_v36  ;;  %2035 = vmatpush1.bf16.msra.mxu1 %v5819_v37  ;;  %v5906_v36 = vld [vmem:[#allocation2 + $0x6a0] ss:$16 sps:$4 sm:$0xff]   ;;  %v5909_v37 = vld [vmem:[#allocation2 + $0x6a8] ss:$16 sps:$4 sm:$0xff]  }
  0xe3   :  { %1872 = vmatprep.subr.bf16.mxu0 %v5824_v38  ;;  %2036 = vmatprep.subr.bf16.mxu1 %v5827_v39  ;;  %v5914_v38 = vld [vmem:[#allocation2 + $0x6c4] ss:$16 sps:$4 sm:$0xff]   ;;  %v5917_v39 = vld [vmem:[#allocation2 + $0x6cc] ss:$16 sps:$4 sm:$0xff]  }
  0xe6   :  { %1873 = vmatpush1.bf16.msra.mxu0 %v5822_v40  ;;  %2037 = vmatpush1.bf16.msra.mxu1 %v5825_v41  ;;  %v5912_v40 = vld [vmem:[#allocation2 + $0x6c0] ss:$16 sps:$4 sm:$0xff]   ;;  %v5915_v41 = vld [vmem:[#allocation2 + $0x6c8] ss:$16 sps:$4 sm:$0xff]  }
  0xe7   :  { %1874 = vmatprep.subr.bf16.mxu0 %v5830_v42  ;;  %2038 = vmatprep.subr.bf16.mxu1 %v5833_v43  ;;  %v5920_v42 = vld [vmem:[#allocation2 + $0x6e4] ss:$16 sps:$4 sm:$0xff]   ;;  %v5923_v43 = vld [vmem:[#allocation2 + $0x6ec] ss:$16 sps:$4 sm:$0xff]  }
  0xea   :  { %1875 = vmatpush1.bf16.msra.mxu0 %v5828_v44  ;;  %2039 = vmatpush1.bf16.msra.mxu1 %v5831_v45  ;;  %v5918_v44 = vld [vmem:[#allocation2 + $0x6e0] ss:$16 sps:$4 sm:$0xff]   ;;  %v5921_v45 = vld [vmem:[#allocation2 + $0x6e8] ss:$16 sps:$4 sm:$0xff]  }
  0xeb   :  { %1876 = vmatprep.subr.bf16.mxu0 %v5836_v46  ;;  %2040 = vmatprep.subr.bf16.mxu1 %v5839_v47  ;;  %v5926_v46 = vld [vmem:[#allocation2 + $0x704] ss:$16 sps:$4 sm:$0xff]   ;;  %v5929_v47 = vld [vmem:[#allocation2 + $0x70c] ss:$16 sps:$4 sm:$0xff]  }
  0xee   :  { %1877 = vmatpush1.bf16.msra.mxu0 %v5834_v48  ;;  %2041 = vmatpush1.bf16.msra.mxu1 %v5837_v49  ;;  %v5924_v48 = vld [vmem:[#allocation2 + $0x700] ss:$16 sps:$4 sm:$0xff]   ;;  %v5927_v49 = vld [vmem:[#allocation2 + $0x708] ss:$16 sps:$4 sm:$0xff]  }
  0xef   :  { %1878 = vmatprep.subr.bf16.mxu0 %v5842_v50  ;;  %2042 = vmatprep.subr.bf16.mxu1 %v5845_v51  ;;  %v5932_v50 = vld [vmem:[#allocation2 + $0x724] ss:$16 sps:$4 sm:$0xff]   ;;  %v5935_v51 = vld [vmem:[#allocation2 + $0x72c] ss:$16 sps:$4 sm:$0xff]  }
  0xf2   :  { %1879 = vmatpush1.bf16.msra.mxu0 %v5840_v52  ;;  %2043 = vmatpush1.bf16.msra.mxu1 %v5843_v53  ;;  %v5930_v52 = vld [vmem:[#allocation2 + $0x720] ss:$16 sps:$4 sm:$0xff]   ;;  %v5933_v53 = vld [vmem:[#allocation2 + $0x728] ss:$16 sps:$4 sm:$0xff]  }
  0xf3   :  { %1880 = vmatprep.subr.bf16.mxu0 %v5848_v54  ;;  %2044 = vmatprep.subr.bf16.mxu1 %v5851_v55  ;;  %v5938_v54 = vld [vmem:[#allocation2 + $0x744] ss:$16 sps:$4 sm:$0xff]   ;;  %v5941_v55 = vld [vmem:[#allocation2 + $0x74c] ss:$16 sps:$4 sm:$0xff]  }
  0xf6   :  { %1881 = vmatpush1.bf16.msra.mxu0 %v5846_v56  ;;  %2045 = vmatpush1.bf16.msra.mxu1 %v5849_v57  ;;  %v5936_v56 = vld [vmem:[#allocation2 + $0x740] ss:$16 sps:$4 sm:$0xff]   ;;  %v5939_v57 = vld [vmem:[#allocation2 + $0x748] ss:$16 sps:$4 sm:$0xff]  }
  0xf7   :  { %1882 = vmatprep.subr.bf16.mxu0 %v5854_v58  ;;  %2046 = vmatprep.subr.bf16.mxu1 %v5857_v59  ;;  %v5944_v58 = vld [vmem:[#allocation2 + $0x764] ss:$16 sps:$4 sm:$0xff]   ;;  %v5947_v59 = vld [vmem:[#allocation2 + $0x76c] ss:$16 sps:$4 sm:$0xff]  }
  0xfa   :  { %1883 = vmatpush1.bf16.msra.mxu0 %v5852_v60  ;;  %2047 = vmatpush1.bf16.msra.mxu1 %v5855_v61  ;;  %v5942_v60 = vld [vmem:[#allocation2 + $0x760] ss:$16 sps:$4 sm:$0xff]   ;;  %v5945_v61 = vld [vmem:[#allocation2 + $0x768] ss:$16 sps:$4 sm:$0xff]  }
  0xfb   :  { %1884 = vmatprep.subr.bf16.mxu0 %v5860_v62  ;;  %2048 = vmatprep.subr.bf16.mxu1 %v5863_v63  ;;  %v5950_v62 = vld [vmem:[#allocation2 + $0x784] ss:$16 sps:$4 sm:$0xff]   ;;  %v5953_v63 = vld [vmem:[#allocation2 + $0x78c] ss:$16 sps:$4 sm:$0xff]  }
  0xfe   :  { %1885 = vmatpush1.bf16.msra.mxu0 %v5858_v0  ;;  %2049 = vmatpush1.bf16.msra.mxu1 %v5861_v1  ;;  %v5948_v0 = vld [vmem:[#allocation2 + $0x780] ss:$16 sps:$4 sm:$0xff]   ;;  %v5951_v1 = vld [vmem:[#allocation2 + $0x788] ss:$16 sps:$4 sm:$0xff]  }
  0xff   :  { %1886 = vmatprep.subr.bf16.mxu0 %v5866_v2  ;;  %2050 = vmatprep.subr.bf16.mxu1 %v5869_v3  ;;  %v5956_v2 = vld [vmem:[#allocation2 + $0x7a4] ss:$16 sps:$4 sm:$0xff]   ;;  %v5959_v3 = vld [vmem:[#allocation2 + $0x7ac] ss:$16 sps:$4 sm:$0xff]  }
 0x102   :  { %1887 = vmatpush1.bf16.msra.mxu0 %v5864_v4  ;;  %2051 = vmatpush1.bf16.msra.mxu1 %v5867_v5  ;;  %v5954_v4 = vld [vmem:[#allocation2 + $0x7a0] ss:$16 sps:$4 sm:$0xff]   ;;  %v5957_v5 = vld [vmem:[#allocation2 + $0x7a8] ss:$16 sps:$4 sm:$0xff]  }
 0x103   :  { %1888 = vmatprep.subr.bf16.mxu0 %v5872_v6  ;;  %2052 = vmatprep.subr.bf16.mxu1 %v5875_v7  ;;  %v5962_v6 = vld [vmem:[#allocation2 + $0x7c4] ss:$16 sps:$4 sm:$0xff]   ;;  %v5965_v7 = vld [vmem:[#allocation2 + $0x7cc] ss:$16 sps:$4 sm:$0xff]  }
 0x106   :  { %1889 = vmatpush1.bf16.msra.mxu0 %v5870_v8  ;;  %2053 = vmatpush1.bf16.msra.mxu1 %v5873_v9  ;;  %v5960_v8 = vld [vmem:[#allocation2 + $0x7c0] ss:$16 sps:$4 sm:$0xff]   ;;  %v5963_v9 = vld [vmem:[#allocation2 + $0x7c8] ss:$16 sps:$4 sm:$0xff]  }
 0x107   :  { %1899 = vmatprep.subr.bf16.mxu0 %v5878_v10  ;;  %2063 = vmatprep.subr.bf16.mxu1 %v5881_v12  ;;  %v5968_v10 = vld [vmem:[#allocation2 + $0x7e4] ss:$16 sps:$4 sm:$0xff]   ;;  %v5966_v12 = vld [vmem:[#allocation2 + $0x7e0] ss:$16 sps:$4 sm:$0xff]  }
 0x109   :  { %1891 = vmatmul.mubr.bf16.vlgmr.msra.gmra.mrb[0].mxu0 %v492_v15  ;;  %2055 = vmatmul.mubr.bf16.vlgmr.msra.gmra.mrb[0].mxu1 %v492_v15  ;;  %v5974_v15 = vld [vmem:[#allocation4 + $0x4] ss:$16 sps:$4 sm:$0xff]  }
 0x10a   :  { %1900 = vmatpush1.bf16.msra.mxu0 %v5876_v13  ;;  %2064 = vmatpush1.bf16.msra.mxu1 %v5879_v14  ;;  %v5969_v13 = vld [vmem:[#allocation2 + $0x7e8] ss:$16 sps:$4 sm:$0xff]   ;;  %v100_v14 = vld [vmem:[%s6918_s0 + $0x30] sm:$0xff] }
 0x10b   :  { %1901 = vmatprep.subr.bf16.mxu0 %v5884_v17  ;;  %2065 = vmatprep.subr.bf16.mxu1 %v5887_v18  ;;  %v5972_v17 = vld [vmem:[#allocation4] ss:$16 sps:$4 sm:$0xff]  }
 0x10c   :  { %1931 = vmatprep.mubr.bf16.mxu0 %v495_v19  ;;  %2095 = vmatprep.mubr.bf16.mxu1 %v495_v19  ;;  %v5975_v18 = vld [vmem:[#allocation4 + $0x200] ss:$16 sps:$4 sm:$0xff]   ;;  %v494_v19 = vpack.c.bf16 %v100_v14, %v100_v14 }
 0x10d   :  { %v6062_v14 = vld [vmem:[#allocation4 + $0x1e0] ss:$16 sps:$4 sm:$0xff]  }
 0x10e   :  { %1902 = vmatpush1.bf16.msra.mxu0 %v5882_v20  ;;  %2066 = vmatpush1.bf16.msra.mxu1 %v5885_v21  ;;  %v5980_v20 = vld [vmem:[#allocation4 + $0x24] ss:$16 sps:$4 sm:$0xff]  }
 0x10f   :  { %1903 = vmatprep.subr.bf16.mxu0 %v5890_v22  ;;  %2067 = vmatprep.subr.bf16.mxu1 %v5893_v23  ;;  %v5983_v21 = vld [vmem:[#allocation4 + $0x224] ss:$16 sps:$4 sm:$0xff]   ;;  %v5978_v22 = vld [vmem:[#allocation4 + $0x20] ss:$16 sps:$4 sm:$0xff]  }
 0x110   :  { %v5981_v23 = vld [vmem:[#allocation4 + $0x220] ss:$16 sps:$4 sm:$0xff]  }
 0x112   :  { %1904 = vmatpush1.bf16.msra.mxu0 %v5888_v24  ;;  %2068 = vmatpush1.bf16.msra.mxu1 %v5891_v25  ;;  %v5986_v24 = vld [vmem:[#allocation4 + $0x44] ss:$16 sps:$4 sm:$0xff]  }
 0x113   :  { %1905 = vmatprep.subr.bf16.mxu0 %v5896_v26  ;;  %2069 = vmatprep.subr.bf16.mxu1 %v5899_v27  ;;  %v5989_v25 = vld [vmem:[#allocation4 + $0x244] ss:$16 sps:$4 sm:$0xff]   ;;  %v5984_v26 = vld [vmem:[#allocation4 + $0x40] ss:$16 sps:$4 sm:$0xff]  }
 0x114   :  { %v5987_v27 = vld [vmem:[#allocation4 + $0x240] ss:$16 sps:$4 sm:$0xff]  }
 0x116   :  { %1906 = vmatpush1.bf16.msra.mxu0 %v5894_v28  ;;  %2070 = vmatpush1.bf16.msra.mxu1 %v5897_v29  ;;  %v5992_v28 = vld [vmem:[#allocation4 + $0x64] ss:$16 sps:$4 sm:$0xff]  }
 0x117   :  { %1907 = vmatprep.subr.bf16.mxu0 %v5902_v30  ;;  %2071 = vmatprep.subr.bf16.mxu1 %v5905_v31  ;;  %v5995_v29 = vld [vmem:[#allocation4 + $0x264] ss:$16 sps:$4 sm:$0xff]   ;;  %v5990_v30 = vld [vmem:[#allocation4 + $0x60] ss:$16 sps:$4 sm:$0xff]  }
 0x118   :  { %v5993_v31 = vld [vmem:[#allocation4 + $0x260] ss:$16 sps:$4 sm:$0xff]  }
 0x11a   :  { %1908 = vmatpush1.bf16.msra.mxu0 %v5900_v32  ;;  %2072 = vmatpush1.bf16.msra.mxu1 %v5903_v33  ;;  %v5998_v32 = vld [vmem:[#allocation4 + $0x84] ss:$16 sps:$4 sm:$0xff]  }
 0x11b   :  { %1909 = vmatprep.subr.bf16.mxu0 %v5908_v34  ;;  %2073 = vmatprep.subr.bf16.mxu1 %v5911_v35  ;;  %v6001_v33 = vld [vmem:[#allocation4 + $0x284] ss:$16 sps:$4 sm:$0xff]   ;;  %v5996_v34 = vld [vmem:[#allocation4 + $0x80] ss:$16 sps:$4 sm:$0xff]  }
 0x11c   :  { %v5999_v35 = vld [vmem:[#allocation4 + $0x280] ss:$16 sps:$4 sm:$0xff]  }
 0x11e   :  { %1910 = vmatpush1.bf16.msra.mxu0 %v5906_v36  ;;  %2074 = vmatpush1.bf16.msra.mxu1 %v5909_v37  ;;  %v6004_v36 = vld [vmem:[#allocation4 + $0xa4] ss:$16 sps:$4 sm:$0xff]  }
 0x11f   :  { %1911 = vmatprep.subr.bf16.mxu0 %v5914_v38  ;;  %2075 = vmatprep.subr.bf16.mxu1 %v5917_v39  ;;  %v6007_v37 = vld [vmem:[#allocation4 + $0x2a4] ss:$16 sps:$4 sm:$0xff]   ;;  %v6002_v38 = vld [vmem:[#allocation4 + $0xa0] ss:$16 sps:$4 sm:$0xff]  }
 0x120   :  { %v6005_v39 = vld [vmem:[#allocation4 + $0x2a0] ss:$16 sps:$4 sm:$0xff]  }
 0x122   :  { %1912 = vmatpush1.bf16.msra.mxu0 %v5912_v40  ;;  %2076 = vmatpush1.bf16.msra.mxu1 %v5915_v41  ;;  %v6010_v40 = vld [vmem:[#allocation4 + $0xc4] ss:$16 sps:$4 sm:$0xff]  }
 0x123   :  { %1913 = vmatprep.subr.bf16.mxu0 %v5920_v42  ;;  %2077 = vmatprep.subr.bf16.mxu1 %v5923_v43  ;;  %v6013_v41 = vld [vmem:[#allocation4 + $0x2c4] ss:$16 sps:$4 sm:$0xff]   ;;  %v6008_v42 = vld [vmem:[#allocation4 + $0xc0] ss:$16 sps:$4 sm:$0xff]  }
 0x124   :  { %v6011_v43 = vld [vmem:[#allocation4 + $0x2c0] ss:$16 sps:$4 sm:$0xff]  }
 0x126   :  { %1914 = vmatpush1.bf16.msra.mxu0 %v5918_v44  ;;  %2078 = vmatpush1.bf16.msra.mxu1 %v5921_v45  ;;  %v6016_v44 = vld [vmem:[#allocation4 + $0xe4] ss:$16 sps:$4 sm:$0xff]  }
 0x127   :  { %1915 = vmatprep.subr.bf16.mxu0 %v5926_v46  ;;  %2079 = vmatprep.subr.bf16.mxu1 %v5929_v47  ;;  %v6019_v45 = vld [vmem:[#allocation4 + $0x2e4] ss:$16 sps:$4 sm:$0xff]   ;;  %v6014_v46 = vld [vmem:[#allocation4 + $0xe0] ss:$16 sps:$4 sm:$0xff]  }
 0x128   :  { %v6017_v47 = vld [vmem:[#allocation4 + $0x2e0] ss:$16 sps:$4 sm:$0xff]  }
 0x12a   :  { %1916 = vmatpush1.bf16.msra.mxu0 %v5924_v48  ;;  %2080 = vmatpush1.bf16.msra.mxu1 %v5927_v49  ;;  %v6022_v48 = vld [vmem:[#allocation4 + $0x104] ss:$16 sps:$4 sm:$0xff]  }
 0x12b   :  { %1917 = vmatprep.subr.bf16.mxu0 %v5932_v50  ;;  %2081 = vmatprep.subr.bf16.mxu1 %v5935_v51  ;;  %v6025_v49 = vld [vmem:[#allocation4 + $0x304] ss:$16 sps:$4 sm:$0xff]   ;;  %v6020_v50 = vld [vmem:[#allocation4 + $0x100] ss:$16 sps:$4 sm:$0xff]  }
 0x12c   :  { %v6023_v51 = vld [vmem:[#allocation4 + $0x300] ss:$16 sps:$4 sm:$0xff]  }
 0x12e   :  { %1918 = vmatpush1.bf16.msra.mxu0 %v5930_v52  ;;  %2082 = vmatpush1.bf16.msra.mxu1 %v5933_v53  ;;  %v6028_v52 = vld [vmem:[#allocation4 + $0x124] ss:$16 sps:$4 sm:$0xff]  }
 0x12f   :  { %1919 = vmatprep.subr.bf16.mxu0 %v5938_v54  ;;  %2083 = vmatprep.subr.bf16.mxu1 %v5941_v55  ;;  %v6031_v53 = vld [vmem:[#allocation4 + $0x324] ss:$16 sps:$4 sm:$0xff]   ;;  %v6026_v54 = vld [vmem:[#allocation4 + $0x120] ss:$16 sps:$4 sm:$0xff]  }
 0x130   :  { %v6029_v55 = vld [vmem:[#allocation4 + $0x320] ss:$16 sps:$4 sm:$0xff]  }
 0x132   :  { %1920 = vmatpush1.bf16.msra.mxu0 %v5936_v56  ;;  %2084 = vmatpush1.bf16.msra.mxu1 %v5939_v57  ;;  %v6034_v56 = vld [vmem:[#allocation4 + $0x144] ss:$16 sps:$4 sm:$0xff]  }
 0x133   :  { %1921 = vmatprep.subr.bf16.mxu0 %v5944_v58  ;;  %2085 = vmatprep.subr.bf16.mxu1 %v5947_v59  ;;  %v6037_v57 = vld [vmem:[#allocation4 + $0x344] ss:$16 sps:$4 sm:$0xff]   ;;  %v6032_v58 = vld [vmem:[#allocation4 + $0x140] ss:$16 sps:$4 sm:$0xff]  }
 0x134   :  { %v6035_v59 = vld [vmem:[#allocation4 + $0x340] ss:$16 sps:$4 sm:$0xff]  }
 0x136   :  { %1922 = vmatpush1.bf16.msra.mxu0 %v5942_v60  ;;  %2086 = vmatpush1.bf16.msra.mxu1 %v5945_v61  ;;  %v6040_v60 = vld [vmem:[#allocation4 + $0x164] ss:$16 sps:$4 sm:$0xff]  }
 0x137   :  { %1923 = vmatprep.subr.bf16.mxu0 %v5950_v62  ;;  %2087 = vmatprep.subr.bf16.mxu1 %v5953_v63  ;;  %v6043_v61 = vld [vmem:[#allocation4 + $0x364] ss:$16 sps:$4 sm:$0xff]   ;;  %v6038_v62 = vld [vmem:[#allocation4 + $0x160] ss:$16 sps:$4 sm:$0xff]  }
 0x138   :  { %v6041_v63 = vld [vmem:[#allocation4 + $0x360] ss:$16 sps:$4 sm:$0xff]  }
 0x13a   :  { %1924 = vmatpush1.bf16.msra.mxu0 %v5948_v0  ;;  %2088 = vmatpush1.bf16.msra.mxu1 %v5951_v1  ;;  %v6046_v0 = vld [vmem:[#allocation4 + $0x184] ss:$16 sps:$4 sm:$0xff]  }
 0x13b   :  { %1925 = vmatprep.subr.bf16.mxu0 %v5956_v2  ;;  %2089 = vmatprep.subr.bf16.mxu1 %v5959_v3  ;;  %v6049_v1 = vld [vmem:[#allocation4 + $0x384] ss:$16 sps:$4 sm:$0xff]   ;;  %v6044_v2 = vld [vmem:[#allocation4 + $0x180] ss:$16 sps:$4 sm:$0xff]  }
 0x13c   :  { %v6047_v3 = vld [vmem:[#allocation4 + $0x380] ss:$16 sps:$4 sm:$0xff]  }
 0x13e   :  { %1926 = vmatpush1.bf16.msra.mxu0 %v5954_v4  ;;  %2090 = vmatpush1.bf16.msra.mxu1 %v5957_v5  ;;  %v6052_v4 = vld [vmem:[#allocation4 + $0x1a4] ss:$16 sps:$4 sm:$0xff]  }
 0x13f   :  { %1927 = vmatprep.subr.bf16.mxu0 %v5962_v6  ;;  %2091 = vmatprep.subr.bf16.mxu1 %v5965_v7  ;;  %v6055_v5 = vld [vmem:[#allocation4 + $0x3a4] ss:$16 sps:$4 sm:$0xff]   ;;  %v6050_v6 = vld [vmem:[#allocation4 + $0x1a0] ss:$16 sps:$4 sm:$0xff]  }
 0x140   :  { %v6053_v7 = vld [vmem:[#allocation4 + $0x3a0] ss:$16 sps:$4 sm:$0xff]  }
 0x142   :  { %1928 = vmatpush1.bf16.msra.mxu0 %v5960_v8  ;;  %2092 = vmatpush1.bf16.msra.mxu1 %v5963_v9  ;;  %v6058_v8 = vld [vmem:[#allocation4 + $0x1c4] ss:$16 sps:$4 sm:$0xff]  }
 0x143   :  { %1929 = vmatprep.subr.bf16.mxu0 %v5968_v10  ;;  %2093 = vmatprep.subr.bf16.mxu1 %v5971_v11  ;;  %v6061_v9 = vld [vmem:[#allocation4 + $0x3c4] ss:$16 sps:$4 sm:$0xff]   ;;  %v6056_v10 = vld [vmem:[#allocation4 + $0x1c0] ss:$16 sps:$4 sm:$0xff]  }
 0x144   :  { %v6059_v11 = vld [vmem:[#allocation4 + $0x3c0] ss:$16 sps:$4 sm:$0xff]  }
 0x146   :  { %1930 = vmatpush1.bf16.msra.mxu0 %v5966_v12  ;;  %2094 = vmatpush1.bf16.msra.mxu1 %v5969_v13  ;;  %v6064_v12 = vld [vmem:[#allocation4 + $0x1e4] ss:$16 sps:$4 sm:$0xff]  }
 0x147   :  { %2768 = vmatprep.subr.bf16.mxu0 %v5974_v15  ;;  %2809 = vmatprep.subr.bf16.mxu1 %v5977_v16  ;;  %v6067_v13 = vld [vmem:[#allocation4 + $0x3e4] ss:$16 sps:$4 sm:$0xff]   ;;  %v6065_v15 = vld [vmem:[#allocation4 + $0x3e0] ss:$16 sps:$4 sm:$0xff]   ;;  %v6070_v16 = vld [vmem:[#allocation4 + $0xc] ss:$16 sps:$4 sm:$0xff]  }
 0x149   :  { %1932 = vmatmul.mubr.bf16.vlgmr.msra.gmra.mrb[0].mxu0 %v494_v19  ;;  %2096 = vmatmul.mubr.bf16.vlgmr.msra.gmra.mrb[0].mxu1 %v494_v19 }
 0x14a   :  { %2769 = vmatpush1.bf16.msra.mxu0 %v5972_v17  ;;  %2810 = vmatpush1.bf16.msra.mxu1 %v5975_v18  ;;  %v6073_v17 = vld [vmem:[#allocation4 + $0x20c] ss:$16 sps:$4 sm:$0xff]  }
 0x14b   :  { %2770 = vmatprep.subr.bf16.mxu0 %v5980_v20  ;;  %2811 = vmatprep.subr.bf16.mxu1 %v5983_v21 }
 0x14e   :  { %2771 = vmatpush1.bf16.msra.mxu0 %v5978_v22  ;;  %2812 = vmatpush1.bf16.msra.mxu1 %v5981_v23 }
 0x14f   :  { %2772 = vmatprep.subr.bf16.mxu0 %v5986_v24  ;;  %2813 = vmatprep.subr.bf16.mxu1 %v5989_v25 }
 0x152   :  { %2773 = vmatpush1.bf16.msra.mxu0 %v5984_v26  ;;  %2814 = vmatpush1.bf16.msra.mxu1 %v5987_v27 }
 0x153   :  { %2774 = vmatprep.subr.bf16.mxu0 %v5992_v28  ;;  %2815 = vmatprep.subr.bf16.mxu1 %v5995_v29 }
 0x156   :  { %2775 = vmatpush1.bf16.msra.mxu0 %v5990_v30  ;;  %2816 = vmatpush1.bf16.msra.mxu1 %v5993_v31 }
 0x157   :  { %2776 = vmatprep.subr.bf16.mxu0 %v5998_v32  ;;  %2817 = vmatprep.subr.bf16.mxu1 %v6001_v33 }
 0x15a   :  { %2777 = vmatpush1.bf16.msra.mxu0 %v5996_v34  ;;  %2818 = vmatpush1.bf16.msra.mxu1 %v5999_v35 }
 0x15b   :  { %2778 = vmatprep.subr.bf16.mxu0 %v6004_v36  ;;  %2819 = vmatprep.subr.bf16.mxu1 %v6007_v37 }
 0x15e   :  { %2779 = vmatpush1.bf16.msra.mxu0 %v6002_v38  ;;  %2820 = vmatpush1.bf16.msra.mxu1 %v6005_v39 }
 0x15f   :  { %2780 = vmatprep.subr.bf16.mxu0 %v6010_v40  ;;  %2821 = vmatprep.subr.bf16.mxu1 %v6013_v41 }
 0x162   :  { %2781 = vmatpush1.bf16.msra.mxu0 %v6008_v42  ;;  %2822 = vmatpush1.bf16.msra.mxu1 %v6011_v43 }
 0x163   :  { %2782 = vmatprep.subr.bf16.mxu0 %v6016_v44  ;;  %2823 = vmatprep.subr.bf16.mxu1 %v6019_v45 }
 0x166   :  { %2783 = vmatpush1.bf16.msra.mxu0 %v6014_v46  ;;  %2824 = vmatpush1.bf16.msra.mxu1 %v6017_v47  ;;  %v6068_v47 = vld [vmem:[#allocation4 + $0x8] ss:$16 sps:$4 sm:$0xff]  }
 0x167   :  { %2784 = vmatprep.subr.bf16.mxu0 %v6022_v48  ;;  %2825 = vmatprep.subr.bf16.mxu1 %v6025_v49 }
 0x16a   :  { %2785 = vmatpush1.bf16.msra.mxu0 %v6020_v50  ;;  %2826 = vmatpush1.bf16.msra.mxu1 %v6023_v51  ;;  %v6071_v50 = vld [vmem:[#allocation4 + $0x208] ss:$16 sps:$4 sm:$0xff]  }
 0x16b   :  { %2786 = vmatprep.subr.bf16.mxu0 %v6028_v52  ;;  %2827 = vmatprep.subr.bf16.mxu1 %v6031_v53  ;;  %v6076_v52 = vld [vmem:[#allocation4 + $0x2c] ss:$16 sps:$4 sm:$0xff]  }
 0x16c   :  { %v6079_v53 = vld [vmem:[#allocation4 + $0x22c] ss:$16 sps:$4 sm:$0xff]  }
 0x16e   :  { %2787 = vmatpush1.bf16.msra.mxu0 %v6026_v54  ;;  %2828 = vmatpush1.bf16.msra.mxu1 %v6029_v55  ;;  %v6074_v54 = vld [vmem:[#allocation4 + $0x28] ss:$16 sps:$4 sm:$0xff]  }
 0x16f   :  { %2788 = vmatprep.subr.bf16.mxu0 %v6034_v56  ;;  %2829 = vmatprep.subr.bf16.mxu1 %v6037_v57  ;;  %v6077_v55 = vld [vmem:[#allocation4 + $0x228] ss:$16 sps:$4 sm:$0xff]   ;;  %v6082_v56 = vld [vmem:[#allocation4 + $0x4c] ss:$16 sps:$4 sm:$0xff]  }
 0x170   :  { %v6085_v57 = vld [vmem:[#allocation4 + $0x24c] ss:$16 sps:$4 sm:$0xff]  }
 0x172   :  { %2789 = vmatpush1.bf16.msra.mxu0 %v6032_v58  ;;  %2830 = vmatpush1.bf16.msra.mxu1 %v6035_v59  ;;  %v6080_v58 = vld [vmem:[#allocation4 + $0x48] ss:$16 sps:$4 sm:$0xff]  }
 0x173   :  { %2790 = vmatprep.subr.bf16.mxu0 %v6040_v60  ;;  %2831 = vmatprep.subr.bf16.mxu1 %v6043_v61  ;;  %v6083_v59 = vld [vmem:[#allocation4 + $0x248] ss:$16 sps:$4 sm:$0xff]   ;;  %v6088_v60 = vld [vmem:[#allocation4 + $0x6c] ss:$16 sps:$4 sm:$0xff]  }
 0x174   :  { %v6091_v61 = vld [vmem:[#allocation4 + $0x26c] ss:$16 sps:$4 sm:$0xff]  }
 0x176   :  { %2791 = vmatpush1.bf16.msra.mxu0 %v6038_v62  ;;  %2832 = vmatpush1.bf16.msra.mxu1 %v6041_v63  ;;  %v6086_v62 = vld [vmem:[#allocation4 + $0x68] ss:$16 sps:$4 sm:$0xff]  }
 0x177   :  { %2792 = vmatprep.subr.bf16.mxu0 %v6046_v0  ;;  %2833 = vmatprep.subr.bf16.mxu1 %v6049_v1  ;;  %v6089_v63 = vld [vmem:[#allocation4 + $0x268] ss:$16 sps:$4 sm:$0xff]   ;;  %v6094_v0 = vld [vmem:[#allocation4 + $0x8c] ss:$16 sps:$4 sm:$0xff]  }
 0x178   :  { %v6097_v1 = vld [vmem:[#allocation4 + $0x28c] ss:$16 sps:$4 sm:$0xff]  }
 0x17a   :  { %2793 = vmatpush1.bf16.msra.mxu0 %v6044_v2  ;;  %2834 = vmatpush1.bf16.msra.mxu1 %v6047_v3  ;;  %v6092_v2 = vld [vmem:[#allocation4 + $0x88] ss:$16 sps:$4 sm:$0xff]  }
 0x17b   :  { %2794 = vmatprep.subr.bf16.mxu0 %v6052_v4  ;;  %2835 = vmatprep.subr.bf16.mxu1 %v6055_v5  ;;  %v6095_v3 = vld [vmem:[#allocation4 + $0x288] ss:$16 sps:$4 sm:$0xff]   ;;  %v6100_v4 = vld [vmem:[#allocation4 + $0xac] ss:$16 sps:$4 sm:$0xff]  }
 0x17c   :  { %v6103_v5 = vld [vmem:[#allocation4 + $0x2ac] ss:$16 sps:$4 sm:$0xff]  }
 0x17e   :  { %2795 = vmatpush1.bf16.msra.mxu0 %v6050_v6  ;;  %2836 = vmatpush1.bf16.msra.mxu1 %v6053_v7  ;;  %v6098_v6 = vld [vmem:[#allocation4 + $0xa8] ss:$16 sps:$4 sm:$0xff]  }
 0x17f   :  { %2796 = vmatprep.subr.bf16.mxu0 %v6058_v8  ;;  %2837 = vmatprep.subr.bf16.mxu1 %v6061_v9  ;;  %v6101_v7 = vld [vmem:[#allocation4 + $0x2a8] ss:$16 sps:$4 sm:$0xff]   ;;  %v6106_v8 = vld [vmem:[#allocation4 + $0xcc] ss:$16 sps:$4 sm:$0xff]  }
 0x180   :  { %v6109_v9 = vld [vmem:[#allocation4 + $0x2cc] ss:$16 sps:$4 sm:$0xff]  }
 0x182   :  { %2797 = vmatpush1.bf16.msra.mxu0 %v6056_v10  ;;  %2838 = vmatpush1.bf16.msra.mxu1 %v6059_v11  ;;  %v6104_v10 = vld [vmem:[#allocation4 + $0xc8] ss:$16 sps:$4 sm:$0xff]  }
 0x183   :  { %2798 = vmatprep.subr.bf16.mxu0 %v6064_v12  ;;  %2839 = vmatprep.subr.bf16.mxu1 %v6067_v13  ;;  %v6107_v11 = vld [vmem:[#allocation4 + $0x2c8] ss:$16 sps:$4 sm:$0xff]   ;;  %v6112_v12 = vld [vmem:[#allocation4 + $0xec] ss:$16 sps:$4 sm:$0xff]  }
 0x184   :  { %v6115_v13 = vld [vmem:[#allocation4 + $0x2ec] ss:$16 sps:$4 sm:$0xff]  }
 0x186   :  { %2799 = vmatpush1.bf16.msra.mxu0 %v6062_v14  ;;  %2840 = vmatpush1.bf16.msra.mxu1 %v6065_v15  ;;  %v6110_v14 = vld [vmem:[#allocation4 + $0xe8] ss:$16 sps:$4 sm:$0xff]  }
 0x187   :  { %2850 = vmatprep.subr.bf16.mxu0 %v6070_v16  ;;  %2891 = vmatprep.subr.bf16.mxu1 %v6073_v17  ;;  %v6113_v15 = vld [vmem:[#allocation4 + $0x2e8] ss:$16 sps:$4 sm:$0xff]   ;;  %v6118_v16 = vld [vmem:[#allocation4 + $0x10c] ss:$16 sps:$4 sm:$0xff]  }
 0x188   :  { %v6121_v17 = vld [vmem:[#allocation4 + $0x30c] ss:$16 sps:$4 sm:$0xff]  }
 0x21c   :  { %v6788_v18 = vpop.f32.mrb[0].mxu0  ;;  %v6790_v19 = vpop.f32.mrb[0].mxu1 }
 0x21d   :  { %v2108_v20 = vmul.f32 0.70710677, %v6788_v18  ;;  %v2110_v21 = vmul.f32 0.70710677, %v6790_v19  ;;  %v6794_v22 = vpop.f32.mrb[1].mxu0  ;;  %v6796_v23 = vpop.f32.mrb[1].mxu1 }
 0x21e   :  { %v2109_v24 = vmul.f32 0.70710677, %v6794_v22  ;;  %v1937_v25 = vpop.f32.mrb[2].mxu0  ;;  %v2101_v26 = vpop.f32.mrb[2].mxu1  ;;  %v2111_v27 = vmul.f32 0.70710677, %v6796_v23 }
 0x21f   :  { %6500 = verf.f32 %v2108_v20  ;;  %v1938_v28 = vpop.f32.mrb[3].mxu0  ;;  %v2102_v29 = vpop.f32.mrb[3].mxu1  ;;  %v2104_v34 = vmul.f32 0.5, %v6788_v18  ;;  %v2106_v37 = vmul.f32 0.5, %v6790_v19  ;;  %v2105_v38 = vmul.f32 0.5, %v6794_v22 }
 0x220   :  { %6502 = verf.f32 %v2110_v21  ;;  %v2107_v41 = vmul.f32 0.5, %v6796_v23  ;;  %v6116_v20 = vld [vmem:[#allocation4 + $0x108] ss:$16 sps:$4 sm:$0xff]   ;;  %v6127_v25 = vld [vmem:[#allocation4 + $0x32c] ss:$16 sps:$4 sm:$0xff]  }
 0x221   :  { %6504 = verf.f32 %v2109_v24  ;;  %v6119_v21 = vld [vmem:[#allocation4 + $0x308] ss:$16 sps:$4 sm:$0xff]   ;;  %v6124_v24 = vld [vmem:[#allocation4 + $0x12c] ss:$16 sps:$4 sm:$0xff]  }
 0x222   :  { %6506 = verf.f32 %v2111_v27  ;;  %v6122_v26 = vld [vmem:[#allocation4 + $0x128] ss:$16 sps:$4 sm:$0xff]   ;;  %v6130_v28 = vld [vmem:[#allocation4 + $0x14c] ss:$16 sps:$4 sm:$0xff]  }
 0x223   :  { %v6125_v27 = vld [vmem:[#allocation4 + $0x328] ss:$16 sps:$4 sm:$0xff]   ;;  %v6133_v29 = vld [vmem:[#allocation4 + $0x34c] ss:$16 sps:$4 sm:$0xff]  }
 0x229   :  { %v6501_v30 = vpop.eup %6500 }
 0x22a   :  { %v6503_v31 = vpop.eup %6502  ;;  %v2116_v32 = vadd.f32 1.0, %v6501_v30  ;;  %v6128_v30 = vld [vmem:[#allocation4 + $0x148] ss:$16 sps:$4 sm:$0xff]  }
 0x22b   :  { %v6505_v33 = vpop.eup %6504  ;;  %v2118_v35 = vadd.f32 1.0, %v6503_v31  ;;  %v6131_v31 = vld [vmem:[#allocation4 + $0x348] ss:$16 sps:$4 sm:$0xff]  }
 0x22c   :  { %v6507_v36 = vpop.eup %6506  ;;  %v2117_v39 = vadd.f32 1.0, %v6505_v33  ;;  %v2120_v40 = vmul.f32 %v2116_v32, %v2104_v34  ;;  %v6136_v32 = vld [vmem:[#allocation4 + $0x16c] ss:$16 sps:$4 sm:$0xff]   ;;  %v6134_v34 = vld [vmem:[#allocation4 + $0x168] ss:$16 sps:$4 sm:$0xff]  }
 0x22d   :  { %v2119_v42 = vadd.f32 1.0, %v6507_v36  ;;  %v2122_v43 = vmul.f32 %v2118_v35, %v2106_v37  ;;  %v6139_v33 = vld [vmem:[#allocation4 + $0x36c] ss:$16 sps:$4 sm:$0xff]   ;;  %v6137_v35 = vld [vmem:[#allocation4 + $0x368] ss:$16 sps:$4 sm:$0xff]  }
 0x22e   :  { %v2121_v44 = vmul.f32 %v2117_v39, %v2105_v38  ;;  %v6804_v48 = vpack.c.bf16 %v2120_v40, %v2120_v40  ;;  %v6142_v36 = vld [vmem:[#allocation4 + $0x18c] ss:$16 sps:$4 sm:$0xff]   ;;  %v6140_v38 = vld [vmem:[#allocation4 + $0x188] ss:$16 sps:$4 sm:$0xff]  }
 0x22f   :  { %v2123_v45 = vmul.f32 %v2119_v42, %v2107_v41  ;;  %v6806_v51 = vpack.c.bf16 %v2122_v43, %v2122_v43  ;;  %v6145_v37 = vld [vmem:[#allocation4 + $0x38c] ss:$16 sps:$4 sm:$0xff]   ;;  %v6143_v39 = vld [vmem:[#allocation4 + $0x388] ss:$16 sps:$4 sm:$0xff]  }
 0x230   :  { %v2125_v46 = vpack.c.bf16 %v2121_v44, %v2121_v44  ;;  %v6148_v40 = vld [vmem:[#allocation4 + $0x1ac] ss:$16 sps:$4 sm:$0xff]   ;;  %v6146_v42 = vld [vmem:[#allocation4 + $0x1a8] ss:$16 sps:$4 sm:$0xff]  }
 0x231   :  { %v2127_v49 = vpack.c.bf16 %v2123_v45, %v2123_v45  ;;  %v6151_v41 = vld [vmem:[#allocation4 + $0x3ac] ss:$16 sps:$4 sm:$0xff]   ;;  %v6149_v43 = vld [vmem:[#allocation4 + $0x3a8] ss:$16 sps:$4 sm:$0xff]  }
 0x232   :  { %2800 = vmatprep.mubr.bf16.mxu0 %v2125_v46  ;;  %v6154_v44 = vld [vmem:[#allocation4 + $0x1cc] ss:$16 sps:$4 sm:$0xff]  }
 0x233   :  { %2841 = vmatprep.mubr.bf16.mxu1 %v2127_v49  ;;  %2801 = vmatmul.mubr.bf16.vlgmr.msra.gmra.mrb[4].mxu0 %v6804_v48  ;;  %v6157_v45 = vld [vmem:[#allocation4 + $0x3cc] ss:$16 sps:$4 sm:$0xff]  }
 0x234   :  { %2842 = vmatmul.mubr.bf16.vlgmr.msra.gmra.mrb[4].mxu1 %v6806_v51  ;;  %2851 = vmatpush1.bf16.msra.mxu0 %v6068_v47  ;;  %v6155_v47 = vld [vmem:[#allocation4 + $0x3c8] ss:$16 sps:$4 sm:$0xff]  }
 0x235   :  { %2892 = vmatpush1.bf16.msra.mxu1 %v6071_v50  ;;  %2882 = vmatprep.mubr.bf16.mxu0 %v2125_v46  ;;  %v6152_v46 = vld [vmem:[#allocation4 + $0x1c8] ss:$16 sps:$4 sm:$0xff]   ;;  %v6163_v50 = vld [vmem:[#allocation4 + $0x3ec] ss:$16 sps:$4 sm:$0xff]  }
 0x236   :  { %2923 = vmatprep.mubr.bf16.mxu1 %v2127_v49  ;;  %2852 = vmatprep.subr.bf16.mxu0 %v6076_v52  ;;  %v6160_v49 = vld [vmem:[#allocation4 + $0x1ec] ss:$16 sps:$4 sm:$0xff]   ;;  %v6158_v52 = vld [vmem:[#allocation4 + $0x1e8] ss:$16 sps:$4 sm:$0xff]  }
 0x237   :  { %2893 = vmatprep.subr.bf16.mxu1 %v6079_v53  ;;  %v6161_v53 = vld [vmem:[#allocation4 + $0x3e8] ss:$16 sps:$4 sm:$0xff]  }
 0x238   :  { %2853 = vmatpush1.bf16.msra.mxu0 %v6074_v54  ;;  %v6166_v54 = vld [vmem:[#allocation6 + $0x4] ss:$16 sps:$4 sm:$0xff]  }
 0x239   :  { %2894 = vmatpush1.bf16.msra.mxu1 %v6077_v55  ;;  %2854 = vmatprep.subr.bf16.mxu0 %v6082_v56  ;;  %v6169_v55 = vld [vmem:[#allocation6 + $0xc] ss:$16 sps:$4 sm:$0xff]  }
 0x23a   :  { %2895 = vmatprep.subr.bf16.mxu1 %v6085_v57  ;;  %v3029_v56 = vld [vmem:[%s6919_s1 + $0x8] sm:$0xff]  ;;  %v6164_v57 = vld [vmem:[#allocation6] ss:$16 sps:$4 sm:$0xff]  }
 0x23c   :  { %2855 = vmatpush1.bf16.msra.mxu0 %v6080_v58  ;;  %v6167_v58 = vld [vmem:[#allocation6 + $0x8] ss:$16 sps:$4 sm:$0xff]  }
 0x23d   :  { %2896 = vmatpush1.bf16.msra.mxu1 %v6083_v59  ;;  %2856 = vmatprep.subr.bf16.mxu0 %v6088_v60  ;;  %v6172_v59 = vld [vmem:[#allocation6 + $0x24] ss:$16 sps:$4 sm:$0xff]   ;;  %v6175_v60 = vld [vmem:[#allocation6 + $0x2c] ss:$16 sps:$4 sm:$0xff]  }
 0x23e   :  { %2897 = vmatprep.subr.bf16.mxu1 %v6091_v61  ;;  %v3258_v61 = vpack.c.bf16 %v3029_v56, %v3029_v56  ;;  %v6256_v56 = vld [vmem:[#allocation6 + $0x1e4] ss:$16 sps:$4 sm:$0xff]  }
 0x240   :  { %2857 = vmatpush1.bf16.msra.mxu0 %v6086_v62  ;;  %v6170_v62 = vld [vmem:[#allocation6 + $0x20] ss:$16 sps:$4 sm:$0xff]  }
 0x241   :  { %2898 = vmatpush1.bf16.msra.mxu1 %v6089_v63  ;;  %2858 = vmatprep.subr.bf16.mxu0 %v6094_v0  ;;  %v6173_v63 = vld [vmem:[#allocation6 + $0x28] ss:$16 sps:$4 sm:$0xff]   ;;  %v6178_v0 = vld [vmem:[#allocation6 + $0x44] ss:$16 sps:$4 sm:$0xff]  }
 0x242   :  { %2899 = vmatprep.subr.bf16.mxu1 %v6097_v1  ;;  %v6181_v1 = vld [vmem:[#allocation6 + $0x4c] ss:$16 sps:$4 sm:$0xff]  }
 0x244   :  { %2859 = vmatpush1.bf16.msra.mxu0 %v6092_v2  ;;  %v6176_v2 = vld [vmem:[#allocation6 + $0x40] ss:$16 sps:$4 sm:$0xff]  }
 0x245   :  { %2900 = vmatpush1.bf16.msra.mxu1 %v6095_v3  ;;  %2860 = vmatprep.subr.bf16.mxu0 %v6100_v4  ;;  %v6179_v3 = vld [vmem:[#allocation6 + $0x48] ss:$16 sps:$4 sm:$0xff]   ;;  %v6184_v4 = vld [vmem:[#allocation6 + $0x64] ss:$16 sps:$4 sm:$0xff]  }
 0x246   :  { %2901 = vmatprep.subr.bf16.mxu1 %v6103_v5  ;;  %v6185_v5 = vld [vmem:[#allocation6 + $0x68] ss:$16 sps:$4 sm:$0xff]  }
 0x248   :  { %2861 = vmatpush1.bf16.msra.mxu0 %v6098_v6  ;;  %v6190_v6 = vld [vmem:[#allocation6 + $0x84] ss:$16 sps:$4 sm:$0xff]  }
 0x249   :  { %2902 = vmatpush1.bf16.msra.mxu1 %v6101_v7  ;;  %2862 = vmatprep.subr.bf16.mxu0 %v6106_v8  ;;  %v6193_v7 = vld [vmem:[#allocation6 + $0x8c] ss:$16 sps:$4 sm:$0xff]   ;;  %v6188_v8 = vld [vmem:[#allocation6 + $0x80] ss:$16 sps:$4 sm:$0xff]  }
 0x24a   :  { %2903 = vmatprep.subr.bf16.mxu1 %v6109_v9  ;;  %v6191_v9 = vld [vmem:[#allocation6 + $0x88] ss:$16 sps:$4 sm:$0xff]  }
 0x24c   :  { %2863 = vmatpush1.bf16.msra.mxu0 %v6104_v10  ;;  %v6196_v10 = vld [vmem:[#allocation6 + $0xa4] ss:$16 sps:$4 sm:$0xff]  }
 0x24d   :  { %2904 = vmatpush1.bf16.msra.mxu1 %v6107_v11  ;;  %2864 = vmatprep.subr.bf16.mxu0 %v6112_v12  ;;  %v6199_v11 = vld [vmem:[#allocation6 + $0xac] ss:$16 sps:$4 sm:$0xff]   ;;  %v6194_v12 = vld [vmem:[#allocation6 + $0xa0] ss:$16 sps:$4 sm:$0xff]  }
 0x24e   :  { %2905 = vmatprep.subr.bf16.mxu1 %v6115_v13  ;;  %v6197_v13 = vld [vmem:[#allocation6 + $0xa8] ss:$16 sps:$4 sm:$0xff]  }
 0x250   :  { %2865 = vmatpush1.bf16.msra.mxu0 %v6110_v14  ;;  %v6202_v14 = vld [vmem:[#allocation6 + $0xc4] ss:$16 sps:$4 sm:$0xff]  }
 0x251   :  { %2906 = vmatpush1.bf16.msra.mxu1 %v6113_v15  ;;  %2866 = vmatprep.subr.bf16.mxu0 %v6118_v16  ;;  %v6205_v15 = vld [vmem:[#allocation6 + $0xcc] ss:$16 sps:$4 sm:$0xff]   ;;  %v6200_v16 = vld [vmem:[#allocation6 + $0xc0] ss:$16 sps:$4 sm:$0xff]  }
 0x252   :  { %2907 = vmatprep.subr.bf16.mxu1 %v6121_v17  ;;  %v6203_v17 = vld [vmem:[#allocation6 + $0xc8] ss:$16 sps:$4 sm:$0xff]  }
 0x254   :  { %2867 = vmatpush1.bf16.msra.mxu0 %v6116_v20  ;;  %v6208_v20 = vld [vmem:[#allocation6 + $0xe4] ss:$16 sps:$4 sm:$0xff]  }
 0x255   :  { %2908 = vmatpush1.bf16.msra.mxu1 %v6119_v21  ;;  %2868 = vmatprep.subr.bf16.mxu0 %v6124_v24  ;;  %v6211_v21 = vld [vmem:[#allocation6 + $0xec] ss:$16 sps:$4 sm:$0xff]   ;;  %v6206_v24 = vld [vmem:[#allocation6 + $0xe0] ss:$16 sps:$4 sm:$0xff]  }
 0x256   :  { %2909 = vmatprep.subr.bf16.mxu1 %v6127_v25  ;;  %v6209_v25 = vld [vmem:[#allocation6 + $0xe8] ss:$16 sps:$4 sm:$0xff]  }
 0x258   :  { %2869 = vmatpush1.bf16.msra.mxu0 %v6122_v26  ;;  %v6214_v26 = vld [vmem:[#allocation6 + $0x104] ss:$16 sps:$4 sm:$0xff]  }
 0x259   :  { %2910 = vmatpush1.bf16.msra.mxu1 %v6125_v27  ;;  %2870 = vmatprep.subr.bf16.mxu0 %v6130_v28  ;;  %v6217_v27 = vld [vmem:[#allocation6 + $0x10c] ss:$16 sps:$4 sm:$0xff]   ;;  %v6212_v28 = vld [vmem:[#allocation6 + $0x100] ss:$16 sps:$4 sm:$0xff]  }
 0x25a   :  { %2911 = vmatprep.subr.bf16.mxu1 %v6133_v29  ;;  %v6215_v29 = vld [vmem:[#allocation6 + $0x108] ss:$16 sps:$4 sm:$0xff]  }
 0x25c   :  { %2871 = vmatpush1.bf16.msra.mxu0 %v6128_v30  ;;  %v6220_v30 = vld [vmem:[#allocation6 + $0x124] ss:$16 sps:$4 sm:$0xff]  }
 0x25d   :  { %2912 = vmatpush1.bf16.msra.mxu1 %v6131_v31  ;;  %2872 = vmatprep.subr.bf16.mxu0 %v6136_v32  ;;  %v6223_v31 = vld [vmem:[#allocation6 + $0x12c] ss:$16 sps:$4 sm:$0xff]   ;;  %v6218_v32 = vld [vmem:[#allocation6 + $0x120] ss:$16 sps:$4 sm:$0xff]  }
 0x25e   :  { %2913 = vmatprep.subr.bf16.mxu1 %v6139_v33  ;;  %v6221_v33 = vld [vmem:[#allocation6 + $0x128] ss:$16 sps:$4 sm:$0xff]  }
 0x260   :  { %2873 = vmatpush1.bf16.msra.mxu0 %v6134_v34  ;;  %v6226_v34 = vld [vmem:[#allocation6 + $0x144] ss:$16 sps:$4 sm:$0xff]  }
 0x261   :  { %2914 = vmatpush1.bf16.msra.mxu1 %v6137_v35  ;;  %2874 = vmatprep.subr.bf16.mxu0 %v6142_v36  ;;  %v6229_v35 = vld [vmem:[#allocation6 + $0x14c] ss:$16 sps:$4 sm:$0xff]   ;;  %v6224_v36 = vld [vmem:[#allocation6 + $0x140] ss:$16 sps:$4 sm:$0xff]  }
 0x262   :  { %2915 = vmatprep.subr.bf16.mxu1 %v6145_v37  ;;  %v6227_v37 = vld [vmem:[#allocation6 + $0x148] ss:$16 sps:$4 sm:$0xff]  }
 0x264   :  { %2875 = vmatpush1.bf16.msra.mxu0 %v6140_v38  ;;  %v6232_v38 = vld [vmem:[#allocation6 + $0x164] ss:$16 sps:$4 sm:$0xff]  }
 0x265   :  { %2916 = vmatpush1.bf16.msra.mxu1 %v6143_v39  ;;  %2876 = vmatprep.subr.bf16.mxu0 %v6148_v40  ;;  %v6235_v39 = vld [vmem:[#allocation6 + $0x16c] ss:$16 sps:$4 sm:$0xff]   ;;  %v6230_v40 = vld [vmem:[#allocation6 + $0x160] ss:$16 sps:$4 sm:$0xff]  }
 0x266   :  { %2917 = vmatprep.subr.bf16.mxu1 %v6151_v41  ;;  %v6233_v41 = vld [vmem:[#allocation6 + $0x168] ss:$16 sps:$4 sm:$0xff]  }
 0x268   :  { %2877 = vmatpush1.bf16.msra.mxu0 %v6146_v42  ;;  %v6238_v42 = vld [vmem:[#allocation6 + $0x184] ss:$16 sps:$4 sm:$0xff]  }
 0x269   :  { %2918 = vmatpush1.bf16.msra.mxu1 %v6149_v43  ;;  %2878 = vmatprep.subr.bf16.mxu0 %v6154_v44  ;;  %v6241_v43 = vld [vmem:[#allocation6 + $0x18c] ss:$16 sps:$4 sm:$0xff]   ;;  %v6236_v44 = vld [vmem:[#allocation6 + $0x180] ss:$16 sps:$4 sm:$0xff]  }
 0x26a   :  { %2919 = vmatprep.subr.bf16.mxu1 %v6157_v45  ;;  %v6239_v45 = vld [vmem:[#allocation6 + $0x188] ss:$16 sps:$4 sm:$0xff]  }
 0x26c   :  { %2879 = vmatpush1.bf16.msra.mxu0 %v6152_v46  ;;  %v6244_v46 = vld [vmem:[#allocation6 + $0x1a4] ss:$16 sps:$4 sm:$0xff]  }
 0x26d   :  { %2920 = vmatpush1.bf16.msra.mxu1 %v6155_v47  ;;  %2880 = vmatprep.subr.bf16.mxu0 %v6160_v49  ;;  %v6247_v47 = vld [vmem:[#allocation6 + $0x1ac] ss:$16 sps:$4 sm:$0xff]   ;;  %v6242_v49 = vld [vmem:[#allocation6 + $0x1a0] ss:$16 sps:$4 sm:$0xff]  }
 0x26e   :  { %2921 = vmatprep.subr.bf16.mxu1 %v6163_v50  ;;  %v6245_v50 = vld [vmem:[#allocation6 + $0x1a8] ss:$16 sps:$4 sm:$0xff]  }
 0x270   :  { %2881 = vmatpush1.bf16.msra.mxu0 %v6158_v52  ;;  %v6250_v52 = vld [vmem:[#allocation6 + $0x1c4] ss:$16 sps:$4 sm:$0xff]  }
 0x271   :  { %2922 = vmatpush1.bf16.msra.mxu1 %v6161_v53  ;;  %3740 = vmatprep.subr.bf16.mxu0 %v6166_v54  ;;  %v6253_v53 = vld [vmem:[#allocation6 + $0x1cc] ss:$16 sps:$4 sm:$0xff]   ;;  %v6248_v54 = vld [vmem:[#allocation6 + $0x1c0] ss:$16 sps:$4 sm:$0xff]  }
 0x272   :  { %3822 = vmatprep.subr.bf16.mxu1 %v6169_v55  ;;  %v6251_v55 = vld [vmem:[#allocation6 + $0x1c8] ss:$16 sps:$4 sm:$0xff]  }
 0x273   :  { %2883 = vmatmul.mubr.bf16.vlgmr.msra.gmra.mrb[8].mxu0 %v6804_v48  ;;  %v6187_v48 = vld [vmem:[#allocation6 + $0x6c] ss:$16 sps:$4 sm:$0xff]  }
 0x274   :  { %2924 = vmatmul.mubr.bf16.vlgmr.msra.gmra.mrb[8].mxu1 %v6806_v51  ;;  %3741 = vmatpush1.bf16.msra.mxu0 %v6164_v57  ;;  %v6182_v51 = vld [vmem:[#allocation6 + $0x60] ss:$16 sps:$4 sm:$0xff]   ;;  %v6259_v57 = vld [vmem:[#allocation6 + $0x1ec] ss:$16 sps:$4 sm:$0xff]  }
 0x275   :  { %3823 = vmatpush1.bf16.msra.mxu1 %v6167_v58  ;;  %3742 = vmatprep.subr.bf16.mxu0 %v6172_v59  ;;  %v6254_v58 = vld [vmem:[#allocation6 + $0x1e0] ss:$16 sps:$4 sm:$0xff]  }
 0x276   :  { %3824 = vmatprep.subr.bf16.mxu1 %v6175_v60  ;;  %3772 = vmatprep.mubr.bf16.mxu0 %v3258_v61  ;;  %v3028_v59 = vld [vmem:[%s6919_s1] sm:$0xff]  ;;  %v6257_v60 = vld [vmem:[#allocation6 + $0x1e8] ss:$16 sps:$4 sm:$0xff]  }
 0x277   :  { %3854 = vmatprep.mubr.bf16.mxu1 %v3258_v61  ;;  %v6262_v61 = vld [vmem:[#allocation6 + $0x204] ss:$16 sps:$4 sm:$0xff]  }
 0x278   :  { %3743 = vmatpush1.bf16.msra.mxu0 %v6170_v62  ;;  %v6265_v62 = vld [vmem:[#allocation6 + $0x20c] ss:$16 sps:$4 sm:$0xff]  }
 0x279   :  { %3825 = vmatpush1.bf16.msra.mxu1 %v6173_v63  ;;  %3744 = vmatprep.subr.bf16.mxu0 %v6178_v0  ;;  %v3257_v63 = vpack.c.bf16 %v3028_v59, %v3028_v59  ;;  %v6260_v0 = vld [vmem:[#allocation6 + $0x200] ss:$16 sps:$4 sm:$0xff]  }
 0x27a   :  { %3826 = vmatprep.subr.bf16.mxu1 %v6181_v1  ;;  %v6263_v1 = vld [vmem:[#allocation6 + $0x208] ss:$16 sps:$4 sm:$0xff]   ;;  %v6338_v59 = vld [vmem:[#allocation7 + $0xa0] ss:$16 sps:$4 sm:$0xff]  }
 0x27c   :  { %3745 = vmatpush1.bf16.msra.mxu0 %v6176_v2  ;;  %v6268_v2 = vld [vmem:[#allocation6 + $0x224] ss:$16 sps:$4 sm:$0xff]  }
 0x27d   :  { %3827 = vmatpush1.bf16.msra.mxu1 %v6179_v3  ;;  %3746 = vmatprep.subr.bf16.mxu0 %v6184_v4  ;;  %v6271_v3 = vld [vmem:[#allocation6 + $0x22c] ss:$16 sps:$4 sm:$0xff]   ;;  %v6266_v4 = vld [vmem:[#allocation6 + $0x220] ss:$16 sps:$4 sm:$0xff]  }
 0x27e   :  { %3828 = vmatprep.subr.bf16.mxu1 %v6187_v48  ;;  %v6269_v48 = vld [vmem:[#allocation6 + $0x228] ss:$16 sps:$4 sm:$0xff]  }
 0x280   :  { %3747 = vmatpush1.bf16.msra.mxu0 %v6182_v51  ;;  %v6274_v51 = vld [vmem:[#allocation6 + $0x244] ss:$16 sps:$4 sm:$0xff]  }
 0x281   :  { %3829 = vmatpush1.bf16.msra.mxu1 %v6185_v5  ;;  %3748 = vmatprep.subr.bf16.mxu0 %v6190_v6  ;;  %v6277_v5 = vld [vmem:[#allocation6 + $0x24c] ss:$16 sps:$4 sm:$0xff]   ;;  %v6624_v6 = vmov 0  }
 0x282   :  { %3830 = vmatprep.subr.bf16.mxu1 %v6193_v7  ;;  %v6272_v7 = vld [vmem:[#allocation6 + $0x240] ss:$16 sps:$4 sm:$0xff]  }
 0x284   :  { %3749 = vmatpush1.bf16.msra.mxu0 %v6188_v8  ;;  %v6275_v8 = vld [vmem:[#allocation6 + $0x248] ss:$16 sps:$4 sm:$0xff]  }
 0x285   :  { %3831 = vmatpush1.bf16.msra.mxu1 %v6191_v9  ;;  %3750 = vmatprep.subr.bf16.mxu0 %v6196_v10  ;;  %v6280_v9 = vld [vmem:[#allocation6 + $0x264] ss:$16 sps:$4 sm:$0xff]   ;;  %v6283_v10 = vld [vmem:[#allocation6 + $0x26c] ss:$16 sps:$4 sm:$0xff]  }
 0x286   :  { %3832 = vmatprep.subr.bf16.mxu1 %v6199_v11  ;;  %v6278_v11 = vld [vmem:[#allocation6 + $0x260] ss:$16 sps:$4 sm:$0xff]  }
 0x288   :  { %3751 = vmatpush1.bf16.msra.mxu0 %v6194_v12  ;;  %v6281_v12 = vld [vmem:[#allocation6 + $0x268] ss:$16 sps:$4 sm:$0xff]  }
 0x289   :  { %3833 = vmatpush1.bf16.msra.mxu1 %v6197_v13  ;;  %3752 = vmatprep.subr.bf16.mxu0 %v6202_v14  ;;  %v6286_v13 = vld [vmem:[#allocation6 + $0x284] ss:$16 sps:$4 sm:$0xff]   ;;  %v6289_v14 = vld [vmem:[#allocation6 + $0x28c] ss:$16 sps:$4 sm:$0xff]  }
 0x28a   :  { %3834 = vmatprep.subr.bf16.mxu1 %v6205_v15  ;;  %v6284_v15 = vld [vmem:[#allocation6 + $0x280] ss:$16 sps:$4 sm:$0xff]  }
 0x28c   :  { %3753 = vmatpush1.bf16.msra.mxu0 %v6200_v16  ;;  %v6287_v16 = vld [vmem:[#allocation6 + $0x288] ss:$16 sps:$4 sm:$0xff]  }
 0x28d   :  { %3835 = vmatpush1.bf16.msra.mxu1 %v6203_v17  ;;  %3754 = vmatprep.subr.bf16.mxu0 %v6208_v20  ;;  %v6292_v17 = vld [vmem:[#allocation6 + $0x2a4] ss:$16 sps:$4 sm:$0xff]   ;;  %v6295_v20 = vld [vmem:[#allocation6 + $0x2ac] ss:$16 sps:$4 sm:$0xff]  }
 0x28e   :  { %3836 = vmatprep.subr.bf16.mxu1 %v6211_v21  ;;  %v6290_v21 = vld [vmem:[#allocation6 + $0x2a0] ss:$16 sps:$4 sm:$0xff]  }
 0x290   :  { %3755 = vmatpush1.bf16.msra.mxu0 %v6206_v24  ;;  %v6293_v24 = vld [vmem:[#allocation6 + $0x2a8] ss:$16 sps:$4 sm:$0xff]  }
 0x291   :  { %3837 = vmatpush1.bf16.msra.mxu1 %v6209_v25  ;;  %3756 = vmatprep.subr.bf16.mxu0 %v6214_v26  ;;  %v6298_v25 = vld [vmem:[#allocation6 + $0x2c4] ss:$16 sps:$4 sm:$0xff]   ;;  %v6301_v26 = vld [vmem:[#allocation6 + $0x2cc] ss:$16 sps:$4 sm:$0xff]  }
 0x292   :  { %3838 = vmatprep.subr.bf16.mxu1 %v6217_v27  ;;  %v6296_v27 = vld [vmem:[#allocation6 + $0x2c0] ss:$16 sps:$4 sm:$0xff]  }
 0x294   :  { %3757 = vmatpush1.bf16.msra.mxu0 %v6212_v28  ;;  %v6299_v28 = vld [vmem:[#allocation6 + $0x2c8] ss:$16 sps:$4 sm:$0xff]  }
 0x295   :  { %3839 = vmatpush1.bf16.msra.mxu1 %v6215_v29  ;;  %3758 = vmatprep.subr.bf16.mxu0 %v6220_v30  ;;  %v6304_v29 = vld [vmem:[#allocation6 + $0x2e4] ss:$16 sps:$4 sm:$0xff]   ;;  %v6307_v30 = vld [vmem:[#allocation6 + $0x2ec] ss:$16 sps:$4 sm:$0xff]  }
 0x296   :  { %3840 = vmatprep.subr.bf16.mxu1 %v6223_v31  ;;  %v6302_v31 = vld [vmem:[#allocation6 + $0x2e0] ss:$16 sps:$4 sm:$0xff]  }
 0x298   :  { %3759 = vmatpush1.bf16.msra.mxu0 %v6218_v32  ;;  %v3030_v32 = vld [vmem:[%s6919_s1 + $0x10] sm:$0xff] }
 0x299   :  { %3841 = vmatpush1.bf16.msra.mxu1 %v6221_v33  ;;  %3760 = vmatprep.subr.bf16.mxu0 %v6226_v34  ;;  %v6305_v33 = vld [vmem:[#allocation6 + $0x2e8] ss:$16 sps:$4 sm:$0xff]   ;;  %v6310_v34 = vld [vmem:[#allocation7 + $0x4] ss:$16 sps:$4 sm:$0xff]  }
 0x29a   :  { %3842 = vmatprep.subr.bf16.mxu1 %v6229_v35  ;;  %v6313_v35 = vld [vmem:[#allocation7 + $0x204] ss:$16 sps:$4 sm:$0xff]  }
 0x29c   :  { %3761 = vmatpush1.bf16.msra.mxu0 %v6224_v36  ;;  %v3259_v36 = vpack.c.bf16 %v3030_v32, %v3030_v32  ;;  %v6379_v32 = vld [vmem:[#allocation7 + $0x364] ss:$16 sps:$4 sm:$0xff]  }
 0x29d   :  { %3843 = vmatpush1.bf16.msra.mxu1 %v6227_v37  ;;  %3762 = vmatprep.subr.bf16.mxu0 %v6232_v38  ;;  %v6308_v37 = vld [vmem:[#allocation7] ss:$16 sps:$4 sm:$0xff]  }
 0x29e   :  { %3844 = vmatprep.subr.bf16.mxu1 %v6235_v39  ;;  %v6311_v38 = vld [vmem:[#allocation7 + $0x200] ss:$16 sps:$4 sm:$0xff]   ;;  %v6316_v39 = vld [vmem:[#allocation7 + $0x24] ss:$16 sps:$4 sm:$0xff]  }
 0x2a0   :  { %3763 = vmatpush1.bf16.msra.mxu0 %v6230_v40  ;;  %v6319_v40 = vld [vmem:[#allocation7 + $0x224] ss:$16 sps:$4 sm:$0xff]  }
 0x2a1   :  { %3845 = vmatpush1.bf16.msra.mxu1 %v6233_v41  ;;  %3764 = vmatprep.subr.bf16.mxu0 %v6238_v42  ;;  %v6314_v41 = vld [vmem:[#allocation7 + $0x20] ss:$16 sps:$4 sm:$0xff]  }
 0x2a2   :  { %3846 = vmatprep.subr.bf16.mxu1 %v6241_v43  ;;  %v6317_v42 = vld [vmem:[#allocation7 + $0x220] ss:$16 sps:$4 sm:$0xff]   ;;  %v6322_v43 = vld [vmem:[#allocation7 + $0x44] ss:$16 sps:$4 sm:$0xff]  }
 0x2a4   :  { %3765 = vmatpush1.bf16.msra.mxu0 %v6236_v44  ;;  %v6325_v44 = vld [vmem:[#allocation7 + $0x244] ss:$16 sps:$4 sm:$0xff]  }
 0x2a5   :  { %3847 = vmatpush1.bf16.msra.mxu1 %v6239_v45  ;;  %3766 = vmatprep.subr.bf16.mxu0 %v6244_v46  ;;  %v6320_v45 = vld [vmem:[#allocation7 + $0x40] ss:$16 sps:$4 sm:$0xff]  }
 0x2a6   :  { %3848 = vmatprep.subr.bf16.mxu1 %v6247_v47  ;;  %v6323_v46 = vld [vmem:[#allocation7 + $0x240] ss:$16 sps:$4 sm:$0xff]   ;;  %v6328_v47 = vld [vmem:[#allocation7 + $0x64] ss:$16 sps:$4 sm:$0xff]  }
 0x2a8   :  { %3767 = vmatpush1.bf16.msra.mxu0 %v6242_v49  ;;  %v6331_v49 = vld [vmem:[#allocation7 + $0x264] ss:$16 sps:$4 sm:$0xff]  }
 0x2a9   :  { %3849 = vmatpush1.bf16.msra.mxu1 %v6245_v50  ;;  %3768 = vmatprep.subr.bf16.mxu0 %v6250_v52  ;;  %v6326_v50 = vld [vmem:[#allocation7 + $0x60] ss:$16 sps:$4 sm:$0xff]  }
 0x2aa   :  { %3850 = vmatprep.subr.bf16.mxu1 %v6253_v53  ;;  %v6329_v52 = vld [vmem:[#allocation7 + $0x260] ss:$16 sps:$4 sm:$0xff]   ;;  %v6334_v53 = vld [vmem:[#allocation7 + $0x84] ss:$16 sps:$4 sm:$0xff]  }
 0x2ac   :  { %3769 = vmatpush1.bf16.msra.mxu0 %v6248_v54  ;;  %v6337_v54 = vld [vmem:[#allocation7 + $0x284] ss:$16 sps:$4 sm:$0xff]  }
 0x2ad   :  { %3851 = vmatpush1.bf16.msra.mxu1 %v6251_v55  ;;  %3770 = vmatprep.subr.bf16.mxu0 %v6256_v56  ;;  %v6332_v55 = vld [vmem:[#allocation7 + $0x80] ss:$16 sps:$4 sm:$0xff]  }
 0x2ae   :  { %3852 = vmatprep.subr.bf16.mxu1 %v6259_v57  ;;  %v6335_v56 = vld [vmem:[#allocation7 + $0x280] ss:$16 sps:$4 sm:$0xff]   ;;  %v6340_v57 = vld [vmem:[#allocation7 + $0xa4] ss:$16 sps:$4 sm:$0xff]  }
 0x2b0   :  { %3771 = vmatpush1.bf16.msra.mxu0 %v6254_v58  ;;  %v6343_v58 = vld [vmem:[#allocation7 + $0x2a4] ss:$16 sps:$4 sm:$0xff]  }
 0x2b1   :  { %3853 = vmatpush1.bf16.msra.mxu1 %v6257_v60  ;;  %3781 = vmatprep.subr.bf16.mxu0 %v6262_v61  ;;  %v6341_v60 = vld [vmem:[#allocation7 + $0x2a0] ss:$16 sps:$4 sm:$0xff]   ;;  %v6346_v61 = vld [vmem:[#allocation7 + $0xc4] ss:$16 sps:$4 sm:$0xff]  }
 0x2b2   :  { %3863 = vmatprep.subr.bf16.mxu1 %v6265_v62  ;;  %v6349_v62 = vld [vmem:[#allocation7 + $0x2c4] ss:$16 sps:$4 sm:$0xff]  }
 0x2b3   :  { %3773 = vmatmul.mubr.bf16.vlgmr.msra.gmra.mrb[12].mxu0 %v3257_v63 }
 0x2b4   :  { %3782 = vmatpush1.bf16.msra.mxu0 %v6260_v0  ;;  %3855 = vmatmul.mubr.bf16.vlgmr.msra.gmra.mrb[12].mxu1 %v3257_v63  ;;  %v6344_v63 = vld [vmem:[#allocation7 + $0xc0] ss:$16 sps:$4 sm:$0xff]  }
 0x2b5   :  { %3864 = vmatpush1.bf16.msra.mxu1 %v6263_v1  ;;  %3783 = vmatprep.subr.bf16.mxu0 %v6268_v2  ;;  %v6347_v0 = vld [vmem:[#allocation7 + $0x2c0] ss:$16 sps:$4 sm:$0xff]   ;;  %v6352_v1 = vld [vmem:[#allocation7 + $0xe4] ss:$16 sps:$4 sm:$0xff]  }
 0x2b6   :  { %3865 = vmatprep.subr.bf16.mxu1 %v6271_v3  ;;  %3813 = vmatprep.mubr.bf16.mxu0 %v6624_v6  ;;  %v6355_v2 = vld [vmem:[#allocation7 + $0x2e4] ss:$16 sps:$4 sm:$0xff]   ;;  %v6350_v3 = vld [vmem:[#allocation7 + $0xe0] ss:$16 sps:$4 sm:$0xff]  }
 0x2b7   :  { %3895 = vmatprep.mubr.bf16.mxu1 %v6624_v6  ;;  %v6359_v6 = vld [vmem:[#allocation7 + $0x300] ss:$16 sps:$4 sm:$0xff]  }
 0x2b8   :  { %3784 = vmatpush1.bf16.msra.mxu0 %v6266_v4  ;;  %v6353_v4 = vld [vmem:[#allocation7 + $0x2e0] ss:$16 sps:$4 sm:$0xff]  }
 0x2b9   :  { %3866 = vmatpush1.bf16.msra.mxu1 %v6269_v48  ;;  %3785 = vmatprep.subr.bf16.mxu0 %v6274_v51  ;;  %v6358_v48 = vld [vmem:[#allocation7 + $0x104] ss:$16 sps:$4 sm:$0xff]  }
 0x2ba   :  { %3867 = vmatprep.subr.bf16.mxu1 %v6277_v5  ;;  %v6361_v51 = vld [vmem:[#allocation7 + $0x304] ss:$16 sps:$4 sm:$0xff]   ;;  %v6356_v5 = vld [vmem:[#allocation7 + $0x100] ss:$16 sps:$4 sm:$0xff]  }
 0x2bc   :  { %3786 = vmatpush1.bf16.msra.mxu0 %v6272_v7  ;;  %v6364_v7 = vld [vmem:[#allocation7 + $0x124] ss:$16 sps:$4 sm:$0xff]  }
 0x2bd   :  { %3868 = vmatpush1.bf16.msra.mxu1 %v6275_v8  ;;  %3787 = vmatprep.subr.bf16.mxu0 %v6280_v9  ;;  %v6367_v8 = vld [vmem:[#allocation7 + $0x324] ss:$16 sps:$4 sm:$0xff]   ;;  %v6362_v9 = vld [vmem:[#allocation7 + $0x120] ss:$16 sps:$4 sm:$0xff]  }
 0x2be   :  { %3869 = vmatprep.subr.bf16.mxu1 %v6283_v10  ;;  %v6365_v10 = vld [vmem:[#allocation7 + $0x320] ss:$16 sps:$4 sm:$0xff]  }
 0x2c0   :  { %3788 = vmatpush1.bf16.msra.mxu0 %v6278_v11  ;;  %v6370_v11 = vld [vmem:[#allocation7 + $0x144] ss:$16 sps:$4 sm:$0xff]  }
 0x2c1   :  { %3870 = vmatpush1.bf16.msra.mxu1 %v6281_v12  ;;  %3789 = vmatprep.subr.bf16.mxu0 %v6286_v13  ;;  %v6373_v12 = vld [vmem:[#allocation7 + $0x344] ss:$16 sps:$4 sm:$0xff]   ;;  %v6368_v13 = vld [vmem:[#allocation7 + $0x140] ss:$16 sps:$4 sm:$0xff]  }
 0x2c2   :  { %3871 = vmatprep.subr.bf16.mxu1 %v6289_v14  ;;  %v6371_v14 = vld [vmem:[#allocation7 + $0x340] ss:$16 sps:$4 sm:$0xff]  }
 0x2c4   :  { %3790 = vmatpush1.bf16.msra.mxu0 %v6284_v15 }
 0x2c5   :  { %3872 = vmatpush1.bf16.msra.mxu1 %v6287_v16  ;;  %3791 = vmatprep.subr.bf16.mxu0 %v6292_v17 }
 0x2c6   :  { %3873 = vmatprep.subr.bf16.mxu1 %v6295_v20 }
 0x2c8   :  { %3792 = vmatpush1.bf16.msra.mxu0 %v6290_v21 }
 0x2c9   :  { %3874 = vmatpush1.bf16.msra.mxu1 %v6293_v24  ;;  %3793 = vmatprep.subr.bf16.mxu0 %v6298_v25 }
 0x2ca   :  { %3875 = vmatprep.subr.bf16.mxu1 %v6301_v26 }
 0x2cc   :  { %3794 = vmatpush1.bf16.msra.mxu0 %v6296_v27 }
 0x2cd   :  { %3876 = vmatpush1.bf16.msra.mxu1 %v6299_v28  ;;  %3795 = vmatprep.subr.bf16.mxu0 %v6304_v29 }
 0x2ce   :  { %3877 = vmatprep.subr.bf16.mxu1 %v6307_v30 }
 0x2d0   :  { %3796 = vmatpush1.bf16.msra.mxu0 %v6302_v31  ;;  %v6376_v31 = vld [vmem:[#allocation7 + $0x164] ss:$16 sps:$4 sm:$0xff]  }
 0x2d1   :  { %3878 = vmatpush1.bf16.msra.mxu1 %v6305_v33  ;;  %4568 = vmatprep.subr.bf16.mxu0 %v6310_v34  ;;  %v6374_v33 = vld [vmem:[#allocation7 + $0x160] ss:$16 sps:$4 sm:$0xff]  }
 0x2d2   :  { %4609 = vmatprep.subr.bf16.mxu1 %v6313_v35  ;;  %v6377_v34 = vld [vmem:[#allocation7 + $0x360] ss:$16 sps:$4 sm:$0xff]   ;;  %v6382_v35 = vld [vmem:[#allocation7 + $0x184] ss:$16 sps:$4 sm:$0xff]  }
 0x2d3   :  { %3814 = vmatmul.mubr.bf16.vlgmr.msra.gmra.mrb[12].mxu0 %v3259_v36 }
 0x2d4   :  { %3896 = vmatmul.mubr.bf16.vlgmr.msra.gmra.mrb[12].mxu1 %v3259_v36  ;;  %4569 = vmatpush1.bf16.msra.mxu0 %v6308_v37  ;;  %v6385_v36 = vld [vmem:[#allocation7 + $0x384] ss:$16 sps:$4 sm:$0xff]   ;;  %v6380_v37 = vld [vmem:[#allocation7 + $0x180] ss:$16 sps:$4 sm:$0xff]  }
 0x2d5   :  { %4610 = vmatpush1.bf16.msra.mxu1 %v6311_v38  ;;  %4570 = vmatprep.subr.bf16.mxu0 %v6316_v39  ;;  %v6383_v38 = vld [vmem:[#allocation7 + $0x380] ss:$16 sps:$4 sm:$0xff]   ;;  %v6391_v39 = vld [vmem:[#allocation7 + $0x3a4] ss:$16 sps:$4 sm:$0xff]  }
 0x2d6   :  { %4611 = vmatprep.subr.bf16.mxu1 %v6319_v40  ;;  %v6389_v40 = vld [vmem:[#allocation7 + $0x3a0] ss:$16 sps:$4 sm:$0xff]  }
 0x2d8   :  { %4571 = vmatpush1.bf16.msra.mxu0 %v6314_v41  ;;  %v6394_v41 = vld [vmem:[#allocation7 + $0x1c4] ss:$16 sps:$4 sm:$0xff]  }
 0x2d9   :  { %4612 = vmatpush1.bf16.msra.mxu1 %v6317_v42  ;;  %4572 = vmatprep.subr.bf16.mxu0 %v6322_v43  ;;  %v6397_v42 = vld [vmem:[#allocation7 + $0x3c4] ss:$16 sps:$4 sm:$0xff]   ;;  %v6392_v43 = vld [vmem:[#allocation7 + $0x1c0] ss:$16 sps:$4 sm:$0xff]  }
 0x2da   :  { %4613 = vmatprep.subr.bf16.mxu1 %v6325_v44  ;;  %v6395_v44 = vld [vmem:[#allocation7 + $0x3c0] ss:$16 sps:$4 sm:$0xff]  }
 0x2dc   :  { %4573 = vmatpush1.bf16.msra.mxu0 %v6320_v45  ;;  %v6400_v45 = vld [vmem:[#allocation7 + $0x1e4] ss:$16 sps:$4 sm:$0xff]  }
 0x2dd   :  { %4614 = vmatpush1.bf16.msra.mxu1 %v6323_v46  ;;  %4574 = vmatprep.subr.bf16.mxu0 %v6328_v47  ;;  %v6403_v46 = vld [vmem:[#allocation7 + $0x3e4] ss:$16 sps:$4 sm:$0xff]   ;;  %v6398_v47 = vld [vmem:[#allocation7 + $0x1e0] ss:$16 sps:$4 sm:$0xff]  }
 0x2de   :  { %4615 = vmatprep.subr.bf16.mxu1 %v6331_v49  ;;  %v6401_v49 = vld [vmem:[#allocation7 + $0x3e0] ss:$16 sps:$4 sm:$0xff]  }
 0x2e0   :  { %4575 = vmatpush1.bf16.msra.mxu0 %v6326_v50  ;;  %v6406_v50 = vld [vmem:[#allocation7 + $0xc] ss:$16 sps:$4 sm:$0xff]  }
 0x2e1   :  { %4616 = vmatpush1.bf16.msra.mxu1 %v6329_v52  ;;  %4576 = vmatprep.subr.bf16.mxu0 %v6334_v53  ;;  %v6409_v52 = vld [vmem:[#allocation7 + $0x20c] ss:$16 sps:$4 sm:$0xff]  }
 0x2e2   :  { %4617 = vmatprep.subr.bf16.mxu1 %v6337_v54 }
 0x2e4   :  { %4577 = vmatpush1.bf16.msra.mxu0 %v6332_v55 }
 0x2e5   :  { %4618 = vmatpush1.bf16.msra.mxu1 %v6335_v56  ;;  %4578 = vmatprep.subr.bf16.mxu0 %v6340_v57 }
 0x2e6   :  { %4619 = vmatprep.subr.bf16.mxu1 %v6343_v58 }
 0x2e8   :  { %4579 = vmatpush1.bf16.msra.mxu0 %v6338_v59 }
 0x2e9   :  { %4620 = vmatpush1.bf16.msra.mxu1 %v6341_v60  ;;  %4580 = vmatprep.subr.bf16.mxu0 %v6346_v61 }
 0x2ea   :  { %4621 = vmatprep.subr.bf16.mxu1 %v6349_v62 }
 0x2ec   :  { %4581 = vmatpush1.bf16.msra.mxu0 %v6344_v63 }
 0x2ed   :  { %4622 = vmatpush1.bf16.msra.mxu1 %v6347_v0  ;;  %4582 = vmatprep.subr.bf16.mxu0 %v6352_v1 }
 0x2ee   :  { %4623 = vmatprep.subr.bf16.mxu1 %v6355_v2 }
 0x2f0   :  { %4583 = vmatpush1.bf16.msra.mxu0 %v6350_v3 }
 0x2f1   :  { %4624 = vmatpush1.bf16.msra.mxu1 %v6353_v4  ;;  %4584 = vmatprep.subr.bf16.mxu0 %v6358_v48 }
 0x2f2   :  { %4625 = vmatprep.subr.bf16.mxu1 %v6361_v51 }
 0x2f4   :  { %4585 = vmatpush1.bf16.msra.mxu0 %v6356_v5 }
 0x2f5   :  { %4626 = vmatpush1.bf16.msra.mxu1 %v6359_v6  ;;  %4586 = vmatprep.subr.bf16.mxu0 %v6364_v7 }
 0x2f6   :  { %4627 = vmatprep.subr.bf16.mxu1 %v6367_v8 }
 0x2f8   :  { %4587 = vmatpush1.bf16.msra.mxu0 %v6362_v9 }
 0x2f9   :  { %4628 = vmatpush1.bf16.msra.mxu1 %v6365_v10  ;;  %4588 = vmatprep.subr.bf16.mxu0 %v6370_v11 }
 0x2fa   :  { %4629 = vmatprep.subr.bf16.mxu1 %v6373_v12 }
 0x2fc   :  { %4589 = vmatpush1.bf16.msra.mxu0 %v6368_v13 }
 0x2fd   :  { %4630 = vmatpush1.bf16.msra.mxu1 %v6371_v14  ;;  %4590 = vmatprep.subr.bf16.mxu0 %v6376_v31 }
 0x2fe   :  { %4631 = vmatprep.subr.bf16.mxu1 %v6379_v32  ;;  %v6404_v32 = vld [vmem:[#allocation7 + $0x8] ss:$16 sps:$4 sm:$0xff]  }
 0x300   :  { %4591 = vmatpush1.bf16.msra.mxu0 %v6374_v33 }
 0x301   :  { %4632 = vmatpush1.bf16.msra.mxu1 %v6377_v34  ;;  %4592 = vmatprep.subr.bf16.mxu0 %v6382_v35  ;;  %v6407_v35 = vld [vmem:[#allocation7 + $0x208] ss:$16 sps:$4 sm:$0xff]  }
 0x302   :  { %4633 = vmatprep.subr.bf16.mxu1 %v6385_v36 }
 0x304   :  { %4593 = vmatpush1.bf16.msra.mxu0 %v6380_v37  ;;  %v6412_v37 = vld [vmem:[#allocation7 + $0x2c] ss:$16 sps:$4 sm:$0xff]  }
 0x305   :  { %4634 = vmatpush1.bf16.msra.mxu1 %v6383_v38  ;;  %v6415_v38 = vld [vmem:[#allocation7 + $0x22c] ss:$16 sps:$4 sm:$0xff]  }
 0x306   :  { %v2802_v15 = vpop.f32.mrb[4].mxu0  ;;  %4635 = vmatprep.subr.bf16.mxu1 %v6391_v39  ;;  %v6413_v39 = vld [vmem:[#allocation7 + $0x228] ss:$16 sps:$4 sm:$0xff]  }
 0x307   :  { %v2843_v16 = vpop.f32.mrb[4].mxu1  ;;  %v2804_v17 = vpop.f32.mrb[5].mxu0 }
 0x308   :  { %v2844_v20 = vadd.f32 %v2843_v16, %v2802_v15  ;;  %v2845_v21 = vpop.f32.mrb[5].mxu1  ;;  %v2806_v24 = vpop.f32.mrb[6].mxu0 }
 0x309   :  { %v2846_v25 = vadd.f32 %v2845_v21, %v2804_v17  ;;  %v2847_v26 = vpop.f32.mrb[6].mxu1  ;;  %v2807_v27 = vpop.f32.mrb[7].mxu0  ;;  %4636 = vmatpush1.bf16.msra.mxu1 %v6389_v40  ;;  %v6421_v40 = vld [vmem:[#allocation7 + $0x24c] ss:$16 sps:$4 sm:$0xff]  }
 0x30a   :  { %v6822_v28 = vadd.f32 %v2844_v20, %v6788_v18  ;;  %v2848_v29 = vpop.f32.mrb[7].mxu1  ;;  %v6388_v18 = vld [vmem:[#allocation7 + $0x1a4] ss:$16 sps:$4 sm:$0xff]   ;;  %4637 = vmatprep.subr.bf16.mxu1 %v6397_v42  ;;  %v6419_v42 = vld [vmem:[#allocation7 + $0x248] ss:$16 sps:$4 sm:$0xff]  }
 0x30b   :  { %v6825_v30 = vadd.f32 %v2846_v25, %v6794_v22  ;;  %v6386_v22 = vld [vmem:[#allocation7 + $0x1a0] ss:$16 sps:$4 sm:$0xff]   ;;  %4594 = vmatprep.subr.bf16.mxu0 %v6388_v18  ;;  %v6410_v18 = vld [vmem:[#allocation7 + $0x28] ss:$16 sps:$4 sm:$0xff]  }
 0x30c   :  { %4595 = vmatpush1.bf16.msra.mxu0 %v6386_v22  ;;  %v6418_v22 = vld [vmem:[#allocation7 + $0x4c] ss:$16 sps:$4 sm:$0xff]  }
 0x30d   :  { %4596 = vmatprep.subr.bf16.mxu0 %v6394_v41  ;;  %4638 = vmatpush1.bf16.msra.mxu1 %v6395_v44  ;;  %v6416_v41 = vld [vmem:[#allocation7 + $0x48] ss:$16 sps:$4 sm:$0xff]   ;;  %v6427_v44 = vld [vmem:[#allocation7 + $0x26c] ss:$16 sps:$4 sm:$0xff]  }
 0x30e   :  { %4639 = vmatprep.subr.bf16.mxu1 %v6403_v46  ;;  %v6425_v46 = vld [vmem:[#allocation7 + $0x268] ss:$16 sps:$4 sm:$0xff]  }
 0x310   :  { %4597 = vmatpush1.bf16.msra.mxu0 %v6392_v43  ;;  %v6424_v43 = vld [vmem:[#allocation7 + $0x6c] ss:$16 sps:$4 sm:$0xff]  }
 0x311   :  { %4598 = vmatprep.subr.bf16.mxu0 %v6400_v45  ;;  %4640 = vmatpush1.bf16.msra.mxu1 %v6401_v49  ;;  %v6422_v45 = vld [vmem:[#allocation7 + $0x68] ss:$16 sps:$4 sm:$0xff]   ;;  %v6433_v49 = vld [vmem:[#allocation7 + $0x28c] ss:$16 sps:$4 sm:$0xff]  }
 0x312   :  { %4691 = vmatprep.subr.bf16.mxu1 %v6409_v52  ;;  %v6431_v52 = vld [vmem:[#allocation7 + $0x288] ss:$16 sps:$4 sm:$0xff]  }
 0x314   :  { %4599 = vmatpush1.bf16.msra.mxu0 %v6398_v47  ;;  %v6430_v47 = vld [vmem:[#allocation7 + $0x8c] ss:$16 sps:$4 sm:$0xff]  }
 0x315   :  { %4650 = vmatprep.subr.bf16.mxu0 %v6406_v50  ;;  %v6428_v50 = vld [vmem:[#allocation7 + $0x88] ss:$16 sps:$4 sm:$0xff]  }
 0x346   :  { %v2884_v53 = vpop.f32.mrb[8].mxu0 }
 0x347   :  { %v2925_v54 = vpop.f32.mrb[8].mxu1  ;;  %v2886_v55 = vpop.f32.mrb[9].mxu0 }
 0x348   :  { %v2926_v56 = vadd.f32 %v2925_v54, %v2884_v53  ;;  %v2927_v57 = vpop.f32.mrb[9].mxu1  ;;  %v2888_v58 = vpop.f32.mrb[10].mxu0  ;;  %v6436_v53 = vld [vmem:[#allocation7 + $0xac] ss:$16 sps:$4 sm:$0xff]  }
 0x349   :  { %v2928_v59 = vadd.f32 %v2927_v57, %v2886_v55  ;;  %v2929_v60 = vpop.f32.mrb[10].mxu1  ;;  %v2889_v61 = vpop.f32.mrb[11].mxu0  ;;  %v6439_v54 = vld [vmem:[#allocation7 + $0x2ac] ss:$16 sps:$4 sm:$0xff]   ;;  %v6434_v55 = vld [vmem:[#allocation7 + $0xa8] ss:$16 sps:$4 sm:$0xff]  }
 0x34a   :  { %v6828_v62 = vadd.f32 %v2926_v56, %v6790_v19  ;;  %v2930_v63 = vpop.f32.mrb[11].mxu1  ;;  %v6437_v56 = vld [vmem:[#allocation7 + $0x2a8] ss:$16 sps:$4 sm:$0xff]   ;;  %v6442_v57 = vld [vmem:[#allocation7 + $0xcc] ss:$16 sps:$4 sm:$0xff]  }
 0x34b   :  { %v6831_v0 = vadd.f32 %v2928_v59, %v6796_v23  ;;  %v6445_v58 = vld [vmem:[#allocation7 + $0x2cc] ss:$16 sps:$4 sm:$0xff]   ;;  %v6440_v59 = vld [vmem:[#allocation7 + $0xc8] ss:$16 sps:$4 sm:$0xff]  }
 0x34c   :  { %v6443_v60 = vld [vmem:[#allocation7 + $0x2c8] ss:$16 sps:$4 sm:$0xff]   ;;  %v6448_v61 = vld [vmem:[#allocation7 + $0xec] ss:$16 sps:$4 sm:$0xff]  }
 0x34d   :  { %v6451_v63 = vld [vmem:[#allocation7 + $0x2ec] ss:$16 sps:$4 sm:$0xff]  }
 0x3a6   :  { %v6833_v1 = vpop.f32.mrb[12].mxu0 }
 0x3a7   :  { %v3908_v2 = vmul.f32 0.70710677, %v6833_v1  ;;  %v6836_v3 = vpop.f32.mrb[12].mxu1  ;;  %v6838_v4 = vpop.f32.mrb[13].mxu0  ;;  %v3904_v13 = vmul.f32 0.5, %v6833_v1 }
 0x3a8   :  { %v3910_v48 = vmul.f32 0.70710677, %v6836_v3  ;;  %v3909_v51 = vmul.f32 0.70710677, %v6838_v4  ;;  %v6842_v5 = vpop.f32.mrb[13].mxu1  ;;  %v3819_v19 = vpop.f32.mrb[14].mxu0 }
 0x3a9   :  { %6508 = verf.f32 %v3908_v2  ;;  %v3911_v23 = vmul.f32 0.70710677, %v6842_v5  ;;  %v3901_v6 = vpop.f32.mrb[14].mxu1  ;;  %v3820_v7 = vpop.f32.mrb[15].mxu0  ;;  %v3906_v16 = vmul.f32 0.5, %v6836_v3  ;;  %v3905_v17 = vmul.f32 0.5, %v6838_v4 }
 0x3aa   :  { %6510 = verf.f32 %v3910_v48  ;;  %v3902_v8 = vpop.f32.mrb[15].mxu1  ;;  %v3907_v24 = vmul.f32 0.5, %v6842_v5  ;;  %v6446_v2 = vld [vmem:[#allocation7 + $0xe8] ss:$16 sps:$4 sm:$0xff]   ;;  %v6457_v19 = vld [vmem:[#allocation7 + $0x30c] ss:$16 sps:$4 sm:$0xff]  }
 0x3ab   :  { %6512 = verf.f32 %v3909_v51  ;;  %v6449_v48 = vld [vmem:[#allocation7 + $0x2e8] ss:$16 sps:$4 sm:$0xff]   ;;  %v6454_v51 = vld [vmem:[#allocation7 + $0x10c] ss:$16 sps:$4 sm:$0xff]  }
 0x3ac   :  { %6514 = verf.f32 %v3911_v23  ;;  %v6452_v23 = vld [vmem:[#allocation7 + $0x108] ss:$16 sps:$4 sm:$0xff]   ;;  %v6460_v7 = vld [vmem:[#allocation7 + $0x12c] ss:$16 sps:$4 sm:$0xff]  }
 0x3ad   :  { %v6455_v6 = vld [vmem:[#allocation7 + $0x308] ss:$16 sps:$4 sm:$0xff]   ;;  %v6463_v8 = vld [vmem:[#allocation7 + $0x32c] ss:$16 sps:$4 sm:$0xff]  }
 0x3b3   :  { %v6509_v9 = vpop.eup %6508 }
 0x3b4   :  { %v6511_v10 = vpop.eup %6510  ;;  %v3916_v11 = vadd.f32 1.0, %v6509_v9  ;;  %v6458_v9 = vld [vmem:[#allocation7 + $0x128] ss:$16 sps:$4 sm:$0xff]  }
 0x3b5   :  { %v6513_v12 = vpop.eup %6512  ;;  %v3918_v14 = vadd.f32 1.0, %v6511_v10  ;;  %v6461_v10 = vld [vmem:[#allocation7 + $0x328] ss:$16 sps:$4 sm:$0xff]  }
 0x3b6   :  { %v6515_v15 = vpop.eup %6514  ;;  %v3917_v20 = vadd.f32 1.0, %v6513_v12  ;;  %v3920_v21 = vmul.f32 %v3916_v11, %v3904_v13  ;;  %v6466_v11 = vld [vmem:[#allocation7 + $0x14c] ss:$16 sps:$4 sm:$0xff]   ;;  %v6464_v13 = vld [vmem:[#allocation7 + $0x148] ss:$16 sps:$4 sm:$0xff]  }
 0x3b7   :  { %v3919_v25 = vadd.f32 1.0, %v6515_v15  ;;  %v3922_v26 = vmul.f32 %v3918_v14, %v3906_v16  ;;  %v6469_v12 = vld [vmem:[#allocation7 + $0x34c] ss:$16 sps:$4 sm:$0xff]   ;;  %v6467_v14 = vld [vmem:[#allocation7 + $0x348] ss:$16 sps:$4 sm:$0xff]  }
 0x3b8   :  { %v3921_v27 = vmul.f32 %v3917_v20, %v3905_v17  ;;  %v6849_v33 = vpack.c.bf16 %v3920_v21, %v3920_v21  ;;  %v6472_v15 = vld [vmem:[#allocation7 + $0x16c] ss:$16 sps:$4 sm:$0xff]   ;;  %v6470_v17 = vld [vmem:[#allocation7 + $0x168] ss:$16 sps:$4 sm:$0xff]  }
 0x3b9   :  { %v3923_v29 = vmul.f32 %v3919_v25, %v3907_v24  ;;  %v6851_v36 = vpack.c.bf16 %v3922_v26, %v3922_v26  ;;  %v6475_v16 = vld [vmem:[#allocation7 + $0x36c] ss:$16 sps:$4 sm:$0xff]   ;;  %v6473_v20 = vld [vmem:[#allocation7 + $0x368] ss:$16 sps:$4 sm:$0xff]  }
 0x3ba   :  { %v3925_v31 = vpack.c.bf16 %v3921_v27, %v3921_v27  ;;  %v6478_v21 = vld [vmem:[#allocation7 + $0x18c] ss:$16 sps:$4 sm:$0xff]   ;;  %v6476_v25 = vld [vmem:[#allocation7 + $0x188] ss:$16 sps:$4 sm:$0xff]  }
 0x3bb   :  { %v3927_v34 = vpack.c.bf16 %v3923_v29, %v3923_v29  ;;  %v6481_v24 = vld [vmem:[#allocation7 + $0x38c] ss:$16 sps:$4 sm:$0xff]   ;;  %v6479_v26 = vld [vmem:[#allocation7 + $0x388] ss:$16 sps:$4 sm:$0xff]  }
 0x3bc   :  { %4600 = vmatprep.mubr.bf16.mxu0 %v3925_v31  ;;  %v6484_v27 = vld [vmem:[#allocation7 + $0x1ac] ss:$16 sps:$4 sm:$0xff]  }
 0x3bd   :  { %4641 = vmatprep.mubr.bf16.mxu1 %v3927_v34  ;;  %4601 = vmatmul.mubr.bf16.vlgmr.msra.gmra.mrb[16].mxu0 %v6849_v33  ;;  %v6487_v29 = vld [vmem:[#allocation7 + $0x3ac] ss:$16 sps:$4 sm:$0xff]  }
 0x3be   :  { %4642 = vmatmul.mubr.bf16.vlgmr.msra.gmra.mrb[16].mxu1 %v6851_v36  ;;  %4651 = vmatpush1.bf16.msra.mxu0 %v6404_v32  ;;  %v6485_v32 = vld [vmem:[#allocation7 + $0x3a8] ss:$16 sps:$4 sm:$0xff]  }
 0x3bf   :  { %4692 = vmatpush1.bf16.msra.mxu1 %v6407_v35  ;;  %4682 = vmatprep.mubr.bf16.mxu0 %v3925_v31  ;;  %v6482_v31 = vld [vmem:[#allocation7 + $0x1a8] ss:$16 sps:$4 sm:$0xff]   ;;  %v6493_v35 = vld [vmem:[#allocation7 + $0x3cc] ss:$16 sps:$4 sm:$0xff]  }
 0x3c0   :  { %4723 = vmatprep.mubr.bf16.mxu1 %v3927_v34  ;;  %4652 = vmatprep.subr.bf16.mxu0 %v6412_v37  ;;  %v6490_v34 = vld [vmem:[#allocation7 + $0x1cc] ss:$16 sps:$4 sm:$0xff]   ;;  %v6488_v37 = vld [vmem:[#allocation7 + $0x1c8] ss:$16 sps:$4 sm:$0xff]  }
 0x3c1   :  { %4693 = vmatprep.subr.bf16.mxu1 %v6415_v38  ;;  %v6491_v38 = vld [vmem:[#allocation7 + $0x3c8] ss:$16 sps:$4 sm:$0xff]  }
 0x3c2   :  { %4653 = vmatpush1.bf16.msra.mxu0 %v6410_v18  ;;  %v6496_v18 = vld [vmem:[#allocation7 + $0x1ec] ss:$16 sps:$4 sm:$0xff]  }
 0x3c3   :  { %4694 = vmatpush1.bf16.msra.mxu1 %v6413_v39  ;;  %4654 = vmatprep.subr.bf16.mxu0 %v6418_v22  ;;  %v6499_v39 = vld [vmem:[#allocation7 + $0x3ec] ss:$16 sps:$4 sm:$0xff]   ;;  %v6494_v22 = vld [vmem:[#allocation7 + $0x1e8] ss:$16 sps:$4 sm:$0xff]  }
 0x3c4   :  { %4695 = vmatprep.subr.bf16.mxu1 %v6421_v40  ;;  %v6497_v40 = vld [vmem:[#allocation7 + $0x3e8] ss:$16 sps:$4 sm:$0xff]  }
 0x3c6   :  { %4655 = vmatpush1.bf16.msra.mxu0 %v6416_v41 }
 0x3c7   :  { %4696 = vmatpush1.bf16.msra.mxu1 %v6419_v42  ;;  %4656 = vmatprep.subr.bf16.mxu0 %v6424_v43 }
 0x3c8   :  { %4697 = vmatprep.subr.bf16.mxu1 %v6427_v44 }
 0x3ca   :  { %4657 = vmatpush1.bf16.msra.mxu0 %v6422_v45 }
 0x3cb   :  { %4698 = vmatpush1.bf16.msra.mxu1 %v6425_v46  ;;  %4658 = vmatprep.subr.bf16.mxu0 %v6430_v47 }
 0x3cc   :  { %4699 = vmatprep.subr.bf16.mxu1 %v6433_v49 }
 0x3ce   :  { %4659 = vmatpush1.bf16.msra.mxu0 %v6428_v50 }
 0x3cf   :  { %4700 = vmatpush1.bf16.msra.mxu1 %v6431_v52  ;;  %4660 = vmatprep.subr.bf16.mxu0 %v6436_v53 }
 0x3d0   :  { %4701 = vmatprep.subr.bf16.mxu1 %v6439_v54 }
 0x3d2   :  { %4661 = vmatpush1.bf16.msra.mxu0 %v6434_v55 }
 0x3d3   :  { %4702 = vmatpush1.bf16.msra.mxu1 %v6437_v56  ;;  %4662 = vmatprep.subr.bf16.mxu0 %v6442_v57 }
 0x3d4   :  { %4703 = vmatprep.subr.bf16.mxu1 %v6445_v58 }
 0x3d6   :  { %4663 = vmatpush1.bf16.msra.mxu0 %v6440_v59 }
 0x3d7   :  { %4704 = vmatpush1.bf16.msra.mxu1 %v6443_v60  ;;  %4664 = vmatprep.subr.bf16.mxu0 %v6448_v61 }
 0x3d8   :  { %4705 = vmatprep.subr.bf16.mxu1 %v6451_v63 }
 0x3da   :  { %4665 = vmatpush1.bf16.msra.mxu0 %v6446_v2 }
 0x3db   :  { %4706 = vmatpush1.bf16.msra.mxu1 %v6449_v48  ;;  %4666 = vmatprep.subr.bf16.mxu0 %v6454_v51 }
 0x3dc   :  { %4707 = vmatprep.subr.bf16.mxu1 %v6457_v19 }
 0x3de   :  { %4667 = vmatpush1.bf16.msra.mxu0 %v6452_v23 }
 0x3df   :  { %4708 = vmatpush1.bf16.msra.mxu1 %v6455_v6  ;;  %4668 = vmatprep.subr.bf16.mxu0 %v6460_v7 }
 0x3e0   :  { %4709 = vmatprep.subr.bf16.mxu1 %v6463_v8 }
 0x3e2   :  { %4669 = vmatpush1.bf16.msra.mxu0 %v6458_v9 }
 0x3e3   :  { %4710 = vmatpush1.bf16.msra.mxu1 %v6461_v10  ;;  %4670 = vmatprep.subr.bf16.mxu0 %v6466_v11 }
 0x3e4   :  { %4711 = vmatprep.subr.bf16.mxu1 %v6469_v12 }
 0x3e6   :  { %4671 = vmatpush1.bf16.msra.mxu0 %v6464_v13 }
 0x3e7   :  { %4712 = vmatpush1.bf16.msra.mxu1 %v6467_v14  ;;  %4672 = vmatprep.subr.bf16.mxu0 %v6472_v15 }
 0x3e8   :  { %4713 = vmatprep.subr.bf16.mxu1 %v6475_v16 }
 0x3ea   :  { %4673 = vmatpush1.bf16.msra.mxu0 %v6470_v17 }
 0x3eb   :  { %4714 = vmatpush1.bf16.msra.mxu1 %v6473_v20  ;;  %4674 = vmatprep.subr.bf16.mxu0 %v6478_v21 }
 0x3ec   :  { %4715 = vmatprep.subr.bf16.mxu1 %v6481_v24 }
 0x3ee   :  { %4675 = vmatpush1.bf16.msra.mxu0 %v6476_v25 }
 0x3ef   :  { %4716 = vmatpush1.bf16.msra.mxu1 %v6479_v26  ;;  %4676 = vmatprep.subr.bf16.mxu0 %v6484_v27 }
 0x3f0   :  { %4717 = vmatprep.subr.bf16.mxu1 %v6487_v29 }
 0x3f2   :  { %4677 = vmatpush1.bf16.msra.mxu0 %v6482_v31 }
 0x3f3   :  { %4718 = vmatpush1.bf16.msra.mxu1 %v6485_v32  ;;  %4678 = vmatprep.subr.bf16.mxu0 %v6490_v34 }
 0x3f4   :  { %4719 = vmatprep.subr.bf16.mxu1 %v6493_v35 }
 0x3f6   :  { %4679 = vmatpush1.bf16.msra.mxu0 %v6488_v37 }
 0x3f7   :  { %4720 = vmatpush1.bf16.msra.mxu1 %v6491_v38  ;;  %4680 = vmatprep.subr.bf16.mxu0 %v6496_v18  ;;  %v2964_v38 = vlaneseq }
 0x3f8   :  { %4721 = vmatprep.subr.bf16.mxu1 %v6499_v39 }
 0x3fa   :  { %4681 = vmatpush1.bf16.msra.mxu0 %v6494_v22  ;;  %v2965_v22 = vshrl.u32 %v2964_v38, 7 }
 0x3fb   :  { %4722 = vmatpush1.bf16.msra.mxu1 %v6497_v40 }
 0x3fd   :  { %4683 = vmatmul.mubr.bf16.vlgmr.msra.gmra.mrb[20].mxu0 %v6849_v33 }
 0x3fe   :  { %4724 = vmatmul.mubr.bf16.vlgmr.msra.gmra.mrb[20].mxu1 %v6851_v36 }
 0x490   :  { %v4602_v41 = vpop.f32.mrb[16].mxu0 }
 0x491   :  { %v4643_v42 = vpop.f32.mrb[16].mxu1  ;;  %v4604_v43 = vpop.f32.mrb[17].mxu0 }
 0x492   :  { %v4644_v44 = vadd.f32 %v4643_v42, %v4602_v41  ;;  %v4645_v45 = vpop.f32.mrb[17].mxu1  ;;  %v4606_v46 = vpop.f32.mrb[18].mxu0  ;;  %v2966_v41 = vsub.s32 0, %v2965_v22  ;;  %v2970_v42 = vsub.s32 1, %v2965_v22 }
 0x493   :  { %v4646_v47 = vadd.f32 %v4645_v45, %v4604_v43  ;;  %v4647_v49 = vpop.f32.mrb[18].mxu1  ;;  %v4607_v50 = vpop.f32.mrb[19].mxu0  ;;  %v2974_v43 = vsub.s32 2, %v2965_v22  ;;  %v3255_v45 = vld [vmem:[%s6926_s8] sm:$0xf] }
 0x494   :  { %v4732_v52 = vadd.f32 %v4644_v44, %v6833_v1  ;;  %v4648_v53 = vpop.f32.mrb[19].mxu1  ;;  %v2936_v1 = vadd.f32 %v6825_v30, %v6822_v28  ;;  %v2978_v44 = vsub.s32 3, %v2965_v22  ;;  %v3256_v46 = vld [vmem:[%s6927_s9] sm:$0xf]  ;;  %v4770_v49 = vrot.slane %v3255_v45, %v2970_v42 }
 0x495   :  { %v4733_v54 = vadd.f32 %v4646_v47, %v6838_v4  ;;  %v4766_v47 = vrot.slane %v3255_v45, %v2966_v41  ;;  %v4774_v50 = vrot.slane %v3255_v45, %v2974_v43  ;;  %v486_v53 = vld [vmem:[%s6922_s4] sm:$0xf] }
 0x496   :  { %v2937_v23 = vadd.f32 %v2936_v1, %v6828_v62 }
 0x497   :  { %v4736_v48 = vadd.f32 %v4733_v54, %v4732_v52 }
 0x498   :  { %v2938_v6 = vadd.f32 %v2937_v23, %v6831_v0  ;;  %v2975_v23 = vrot.slane %v486_v53, %v2974_v43 }
 0x4d0   :  { %v4684_v55 = vpop.f32.mrb[20].mxu0 }
 0x4d1   :  { %v4725_v56 = vpop.f32.mrb[20].mxu1  ;;  %v4686_v57 = vpop.f32.mrb[21].mxu0 }
 0x4d2   :  { %v4726_v33 = vadd.f32 %v4725_v56, %v4684_v55  ;;  %v4727_v58 = vpop.f32.mrb[21].mxu1  ;;  %v4688_v36 = vpop.f32.mrb[22].mxu0  ;;  %v4791_v55 = vrot.slane %v3256_v46, %v2966_v41  ;;  %v4795_v56 = vrot.slane %v3256_v46, %v2970_v42 }
 0x4d3   :  { %v4728_v59 = vadd.f32 %v4727_v58, %v4686_v57  ;;  %v4729_v60 = vpop.f32.mrb[22].mxu1  ;;  %v4689_v61 = vpop.f32.mrb[23].mxu0  ;;  %v4799_v57 = vrot.slane %v3256_v46, %v2974_v43 }
 0x4d4   :  { %v4734_v63 = vadd.f32 %v4726_v33, %v6836_v3  ;;  %v4730_v2 = vpop.f32.mrb[23].mxu1  ;;  %v487_v60 = vld [vmem:[%s6923_s5] sm:$0xf]  ;;  %v4803_v61 = vrot.slane %v3256_v46, %v2978_v44 }
 0x4d5   :  { %v4735_v51 = vadd.f32 %v4728_v59, %v6842_v5  ;;  %v2971_v2 = vrot.slane %v486_v53, %v2970_v42 }
 0x4d6   :  { %v4737_v19 = vadd.f32 %v4736_v48, %v4734_v63 }
 0x4d8   :  { %v4738_v4 = vadd.f32 %v4737_v19, %v4735_v51 }
 0x4da   :  { %4739 = vadd.xlane.f32.xlu0 %v4738_v4 }
 0x4de   :  { %2939 = vadd.xlane.f32.xlu0 %v2938_v6  ;;  %v2979_v6 = vrot.slane %v486_v53, %v2978_v44 }
 0x567   :  { %v4740_v7 = vpop.xlane.xlu0 %4739 }
 0x568   :  { %v4741_v8 = vmul.f32 0.001953125, %v4740_v7  ;;  %v2992_v7 = vrot.slane %v487_v60, %v2966_v41 }
 0x56a   :  { %v4742_v9 = vsub.f32 %v4732_v52, %v4741_v8  ;;  %v4743_v10 = vsub.f32 %v4733_v54, %v4741_v8  ;;  %v4744_v3 = vsub.f32 %v4734_v63, %v4741_v8  ;;  %v4745_v12 = vsub.f32 %v4735_v51, %v4741_v8 }
 0x56b   :  { %v2940_v11 = vpop.xlane.xlu0 %2939  ;;  %v4778_v52 = vrot.slane %v3255_v45, %v2978_v44  ;;  %v2967_v63 = vrot.slane %v486_v53, %v2966_v41  ;;  %v2996_v8 = vrot.slane %v487_v60, %v2970_v42 }
 0x56c   :  { %v2942_v13 = vmul.f32 0.001953125, %v2940_v11  ;;  %v4746_v5 = vmul.f32 %v4742_v9, %v4742_v9  ;;  %v4747_v14 = vmul.f32 %v4743_v10, %v4743_v10  ;;  %v4748_v15 = vmul.f32 %v4744_v3, %v4744_v3 }
 0x56d   :  { %v4749_v24 = vmul.f32 %v4745_v12, %v4745_v12  ;;  %v3000_v11 = vrot.slane %v487_v60, %v2974_v43 }
 0x56e   :  { %v6866_v16 = vsub.f32 %v6822_v28, %v2942_v13  ;;  %v6869_v17 = vsub.f32 %v6825_v30, %v2942_v13  ;;  %v4750_v20 = vadd.f32 %v4747_v14, %v4746_v5  ;;  %v2945_v21 = vsub.f32 %v6828_v62, %v2942_v13 }
 0x56f   :  { %v2946_v26 = vsub.f32 %v6831_v0, %v2942_v13 }
 0x570   :  { %v4751_v25 = vadd.f32 %v4750_v20, %v4748_v15  ;;  %v2947_v27 = vmul.f32 %v6866_v16, %v6866_v16  ;;  %v2948_v29 = vmul.f32 %v6869_v17, %v6869_v17  ;;  %v2949_v32 = vmul.f32 %v2945_v21, %v2945_v21 }
 0x571   :  { %v2950_v34 = vmul.f32 %v2946_v26, %v2946_v26 }
 0x572   :  { %v4752_v31 = vadd.f32 %v4751_v25, %v4749_v24  ;;  %v2951_v28 = vadd.f32 %v2948_v29, %v2947_v27  ;;  %v3004_v25 = vrot.slane %v487_v60, %v2978_v44 }
 0x574   :  { %4753 = vadd.xlane.f32.xlu1 %v4752_v31  ;;  %v2952_v30 = vadd.f32 %v2951_v28, %v2949_v32 }
 0x576   :  { %v2953_v35 = vadd.f32 %v2952_v30, %v2950_v34 }
 0x578   :  { %2954 = vadd.xlane.f32.xlu1 %v2953_v35 }
 0x601   :  { %v4754_v37 = vpop.xlane.xlu1 %4753 }
 0x602   :  { %v4755_v62 = vmul.f32 0.001953125, %v4754_v37 }
 0x604   :  { %v4756_v18 = vadd.f32 1e-05, %v4755_v62 }
 0x605   :  { %v2955_v39 = vpop.xlane.xlu1 %2954 }
 0x606   :  { %6516 = vrsqrt.f32 %v4756_v18  ;;  %v2956_v0 = vmul.f32 0.001953125, %v2955_v39 }
 0x608   :  { %v2957_v40 = vadd.f32 1e-05, %v2956_v0 }
 0x60a   :  { %6518 = vrsqrt.f32 %v2957_v40 }
 0x610   :  { %v6517_v54 = vpop.eup %6516 }
 0x611   :  { %v4758_v33 = vmul.f32 %v6517_v54, %v4742_v9  ;;  %v4759_v58 = vmul.f32 %v6517_v54, %v4743_v10  ;;  %v4760_v36 = vmul.f32 %v6517_v54, %v4744_v3  ;;  %v4761_v59 = vmul.f32 %v6517_v54, %v4745_v12 }
 0x613   :  { %v4783_v48 = vmul.f32 %v4766_v47, %v4758_v33  ;;  %v4784_v51 = vmul.f32 %v4770_v49, %v4759_v58  ;;  %v4785_v1 = vmul.f32 %v4774_v50, %v4760_v36  ;;  %v4786_v19 = vmul.f32 %v4778_v52, %v4761_v59 }
 0x614   :  { %v6519_v4 = vpop.eup %6518 }
 0x615   :  { %v4808_v9 = vadd.f32 %v4791_v55, %v4783_v48  ;;  %v4809_v10 = vadd.f32 %v4795_v56, %v4784_v51  ;;  %v4810_v3 = vadd.f32 %v4799_v57, %v4785_v1  ;;  %v2959_v12 = vmul.f32 %v6519_v4, %v6866_v16 }
 0x616   :  { %v2960_v13 = vmul.f32 %v6519_v4, %v6869_v17  ;;  %v2961_v5 = vmul.f32 %v6519_v4, %v2945_v21  ;;  %v2962_v14 = vmul.f32 %v6519_v4, %v2946_v26  ;;  %v4811_v15 = vadd.f32 %v4803_v61, %v4786_v19 }
 0x617   :  { %v4812_v20 = vmul.f32 %v4808_v9, %v4808_v9  ;;  %v4813_v24 = vmul.f32 %v4809_v10, %v4809_v10  ;;  %v2984_v27 = vmul.f32 %v2967_v63, %v2959_v12  ;;  %v4814_v28 = vmul.f32 %v4810_v3, %v4810_v3 }
 0x618   :  { %v2985_v29 = vmul.f32 %v2971_v2, %v2960_v13  ;;  %v2986_v31 = vmul.f32 %v2975_v23, %v2961_v5  ;;  %v2987_v32 = vmul.f32 %v2979_v6, %v2962_v14  ;;  %v4815_v62 = vmul.f32 %v4811_v15, %v4811_v15 }
 0x619   :  { %v4816_v34 = vadd.f32 %v4813_v24, %v4812_v20  ;;  %v3009_v30 = vadd.f32 %v2992_v7, %v2984_v27 }
 0x61a   :  { %v3010_v35 = vadd.f32 %v2996_v8, %v2985_v29  ;;  %v3011_v37 = vadd.f32 %v3000_v11, %v2986_v31  ;;  %v3012_v16 = vadd.f32 %v3004_v25, %v2987_v32 }
 0x61b   :  { %v4817_v38 = vadd.f32 %v4816_v34, %v4814_v28  ;;  %v3013_v18 = vmul.f32 %v3009_v30, %v3009_v30 }
 0x61c   :  { %v3014_v17 = vmul.f32 %v3010_v35, %v3010_v35  ;;  %v3015_v26 = vmul.f32 %v3011_v37, %v3011_v37  ;;  %v3016_v0 = vmul.f32 %v3012_v16, %v3012_v16 }
 0x61d   :  { %v4818_v21 = vadd.f32 %v4817_v38, %v4815_v62 }
 0x61e   :  { %v3017_v39 = vadd.f32 %v3014_v17, %v3013_v18 }
 0x61f   :  { %4819 = vadd.xlane.f32.xlu0 %v4818_v21 }
 0x620   :  { %v3018_v22 = vadd.f32 %v3017_v39, %v3015_v26 }
 0x622   :  { %v3019_v40 = vadd.f32 %v3018_v22, %v3016_v0 }
 0x624   :  { %3020 = vadd.xlane.f32.xlu1 %v3019_v40 }
 0x6ac   :  { %v4820_v41 = vpop.xlane.xlu0 %4819 }
 0x6ad   :  { %v4821_v42 = vadd.f32 1e-12, %v4820_v41 }
 0x6af   :  { %6520 = vrsqrt.f32 %v4821_v42 }
 0x6b1   :  { %v3021_v43 = vpop.xlane.xlu1 %3020 }
 0x6b2   :  { %v3022_v44 = vadd.f32 1e-12, %v3021_v43 }
 0x6b4   :  { %6522 = vrsqrt.f32 %v3022_v44 }
 0x6b9   :  { %v6521_v45 = vpop.eup %6520 }
 0x6ba   :  { %v4824_v46 = vmul.f32 %v6521_v45, %v4809_v10  ;;  %v4826_v47 = vmul.f32 %v6521_v45, %v4811_v15  ;;  %v4823_v49 = vmul.f32 %v6521_v45, %v4808_v9  ;;  %v4825_v50 = vmul.f32 %v6521_v45, %v4810_v3 }
 0x6bc   :  { %4832 = vst [vmem:[%s6930_s12 + $0x8] sm:$0xff] %v4824_v46  ;;  %v4840_v52 = vpack.c.bf16 %v4824_v46, %v4824_v46  ;;  %4834 = vst [vmem:[%s6930_s12 + $0x18] sm:$0xff] %v4826_v47  ;;  %v4842_v53 = vpack.c.bf16 %v4826_v47, %v4826_v47  ;;  %v4839_v54 = vpack.c.bf16 %v4823_v49, %v4823_v49 }
 0x6bd   :  { %4831 = vst [vmem:[%s6930_s12] sm:$0xff] %v4823_v49  ;;  %4833 = vst [vmem:[%s6930_s12 + $0x10] sm:$0xff] %v4825_v50  ;;  %v4841_v55 = vpack.c.bf16 %v4825_v50, %v4825_v50 }
 0x6be   :  { %v6523_v56 = vpop.eup %6522  ;;  %4843 = vmatprep.subr.bf16.mxu1 %v4840_v52  ;;  %4883 = vmatprep.subr.bf16.mxu0 %v4842_v53 }
 0x6bf   :  { %4844 = vmatpush1.bf16.xpose.msra.mxu1 %v4839_v54  ;;  %4884 = vmatpush1.bf16.xpose.msra.mxu0 %v4841_v55  ;;  %v3025_v57 = vmul.f32 %v6523_v56, %v3010_v35  ;;  %v3027_v33 = vmul.f32 %v6523_v56, %v3012_v16  ;;  %v3024_v58 = vmul.f32 %v6523_v56, %v3009_v30 }
 0x6c0   :  { %v3026_v36 = vmul.f32 %v6523_v56, %v3011_v37 }
 0x6c1   :  { %4828 = vst [vmem:[%s6929_s11 + $0x8] sm:$0xff] %v3025_v57  ;;  %v4836_v59 = vpack.c.bf16 %v3025_v57, %v3025_v57  ;;  %4830 = vst [vmem:[%s6929_s11 + $0x18] sm:$0xff] %v3027_v33  ;;  %v4838_v60 = vpack.c.bf16 %v3027_v33, %v3027_v33  ;;  %v4835_v61 = vpack.c.bf16 %v3024_v58, %v3024_v58 }
 0x6c2   :  { %4827 = vst [vmem:[%s6929_s11] sm:$0xff] %v3024_v58  ;;  %4829 = vst [vmem:[%s6929_s11 + $0x10] sm:$0xff] %v3026_v36  ;;  %v4837_v63 = vpack.c.bf16 %v3026_v36, %v3026_v36 }
 0x6c3   :  { %4875 = vmatprep.mubr.bf16.mxu1 %v4836_v59  ;;  %4915 = vmatprep.mubr.bf16.mxu0 %v4838_v60 }
 0x6c6   :  { %4876 = vmatmul.mubr.bf16.vlgmr.msra.gmra.mrb[24].mxu1 %v4835_v61  ;;  %4916 = vmatmul.mubr.bf16.vlgmr.msra.gmra.mrb[24].mxu0 %v4837_v63 }
 0x799   :  { %v4877_v2 = vpop.f32.mrb[24].mxu1  ;;  %v4917_v48 = vpop.f32.mrb[24].mxu0 }
 0x79a   :  { %v4918_v51 = vadd.f32 %v4917_v48, %v4877_v2  ;;  %v4879_v1 = vpop.f32.mrb[25].mxu1  ;;  %v4919_v19 = vpop.f32.mrb[25].mxu0 }
 0x79b   :  { %v4880_v4 = vpop.f32.mrb[26].mxu1  ;;  %v4920_v23 = vpop.f32.mrb[26].mxu0 }
 0x79c   :  { %4924 = vst.msk [vmem:[%s6928_s10] sm:$0xff] %vm4923_vm0, %v4918_v51  ;;  %v4881_v6 = vpop.f32.mrb[27].mxu1  ;;  %v4921_v7 = vpop.f32.mrb[27].mxu0 }
 0x79d   :  { %4937 = vsyncpa [#allocation3], 1 }
 0x79e   :  { %4938 = vsyncpa [#allocation5], 1 }
 0x79f   :  { %4939 = vsyncpa [#allocation8], 1 }

</bundles_post_ra>
